<compile_context>
chip_gen: v7x
topology: tpu7x:2x2x1
jax: 0.10.0
libtpu: 0.0.40
codegen_flags: <defaults>
</compile_context>

<pallas_src>
import functools

import jax
import jax.numpy as jnp
from jax.experimental import pallas as pl
from jax.experimental.pallas import tpu as pltpu


# ---------------------------------------------------------------------------
# Kernels
# ---------------------------------------------------------------------------

def _depthwise3x3_kernel(xp_ref, w_ref, b_ref, out_ref):
    """Depthwise 3x3 conv (cross-correlation) on one replicate-padded NHWC image.

    xp_ref : (1, H+2, W+2, C)  padded input block
    w_ref  : (9, C)            taps, k = dy*3 + dx (matches torch Conv2d)
    b_ref  : (1, C)            bias
    out_ref: (1, H, W, C)
    """
    H, W, C = out_ref.shape[1], out_ref.shape[2], out_ref.shape[3]
    acc = jnp.zeros((H, W, C), dtype=jnp.float32)
    for dy in range(3):
        for dx in range(3):
            k = dy * 3 + dx
            patch = xp_ref[0, dy:dy + H, dx:dx + W, :].astype(jnp.float32)  # (H, W, C)
            tap = w_ref[k:k + 1, :].astype(jnp.float32)                     # (1, C)
            acc = acc + patch * tap                                         # broadcast on lanes
    acc = acc + b_ref[0:1, :].astype(jnp.float32)
    out_ref[0] = acc.astype(out_ref.dtype)


def _pointwise_lrelu_kernel(x_ref, w_ref, b_ref, out_ref, *, neg_slope):
    """LeakyReLU(x @ W + b) on a (bm, Cin) tile; 1x1 conv lowered to the MXU."""
    y = jnp.dot(x_ref[...].astype(jnp.float32), w_ref[...].astype(jnp.float32),
                preferred_element_type=jnp.float32)
    y = y + b_ref[...].astype(jnp.float32)
    y = jnp.where(y >= 0.0, y, y * neg_slope)
    out_ref[...] = y.astype(out_ref.dtype)


def _pointwise_lrelu_residual_kernel(h_ref, x_ref, wp_ref, bp_ref, wr_ref, br_ref,
                                     out_ref, *, neg_slope):
    """LeakyReLU(h @ Wp + bp) + (x @ Wr + br): final 1x1 conv, activation,
    residual 1x1 conv (conv_ch) and the residual add, fused in one pass."""
    h = jnp.dot(h_ref[...].astype(jnp.float32), wp_ref[...].astype(jnp.float32),
                preferred_element_type=jnp.float32) + bp_ref[...].astype(jnp.float32)
    h = jnp.where(h >= 0.0, h, h * neg_slope)
    res = jnp.dot(x_ref[...].astype(jnp.float32), wr_ref[...].astype(jnp.float32),
                  preferred_element_type=jnp.float32) + br_ref[...].astype(jnp.float32)
    out_ref[...] = (h + res).astype(out_ref.dtype)


# ---------------------------------------------------------------------------
# pallas_call wrappers
# ---------------------------------------------------------------------------

def depthwise3x3_replicate(x_nhwc, taps_9c, bias_1c):
    """Depthwise 3x3, stride 1, replicate padding.  x_nhwc: (B, H, W, C)."""
    B, H, W, C = x_nhwc.shape
    xp = jnp.pad(x_nhwc, ((0, 0), (1, 1), (1, 1), (0, 0)), mode="edge")
    return pl.pallas_call(
        _depthwise3x3_kernel,
        out_shape=jax.ShapeDtypeStruct((B, H, W, C), x_nhwc.dtype),
        grid=(B,),
        in_specs=[
            pl.BlockSpec((1, H + 2, W + 2, C), lambda b: (b, 0, 0, 0)),
            pl.BlockSpec((9, C), lambda b: (0, 0)),
            pl.BlockSpec((1, C), lambda b: (0, 0)),
        ],
        out_specs=pl.BlockSpec((1, H, W, C), lambda b: (b, 0, 0, 0)),
        compiler_params=pltpu.CompilerParams(dimension_semantics=("parallel",)),
    )(xp, taps_9c, bias_1c)


def _block_m(m, target=256):
    """Row-tile size: multiple of 8 (sublane tiling) unless the whole M fits."""
    if m <= target:
        return m
    return max(8, (target // 8) * 8)


def pointwise_lrelu(x2d, w, b, *, neg_slope=0.2, block_m=256):
    """LeakyReLU(x2d @ w + b).  x2d: (M, Cin) lane-dense 2D view; w: (Cin, Cout)."""
    M, Cin = x2d.shape
    Cout = w.shape[1]
    bm = _block_m(M, block_m)
    isz = jnp.dtype(x2d.dtype).itemsize
    cost = pl.CostEstimate(flops=2 * M * Cin * Cout, transcendentals=0,
                           bytes_accessed=isz * (M * Cin + M * Cout + Cin * Cout + Cout))
    return pl.pallas_call(
        functools.partial(_pointwise_lrelu_kernel, neg_slope=neg_slope),
        out_shape=jax.ShapeDtypeStruct((M, Cout), x2d.dtype),
        grid=(pl.cdiv(M, bm),),
        in_specs=[
            pl.BlockSpec((bm, Cin), lambda i: (i, 0)),
            pl.BlockSpec((Cin, Cout), lambda i: (0, 0)),
            pl.BlockSpec((1, Cout), lambda i: (0, 0)),
        ],
        out_specs=pl.BlockSpec((bm, Cout), lambda i: (i, 0)),
        compiler_params=pltpu.CompilerParams(dimension_semantics=("parallel",)),
        cost_estimate=cost,
    )(x2d, w, b)


def pointwise_lrelu_residual(h2d, x2d, wp, bp, wr, br, *, neg_slope=0.2, block_m=256):
    """LeakyReLU(h2d @ wp + bp) + (x2d @ wr + br)."""
    M, Clat = h2d.shape
    Cin = x2d.shape[1]
    Cout = wp.shape[1]
    bm = _block_m(M, block_m)
    isz = jnp.dtype(h2d.dtype).itemsize
    cost = pl.CostEstimate(
        flops=2 * M * (Clat * Cout + Cin * Cout),
        transcendentals=0,
        bytes_accessed=isz * (M * Clat + M * Cin + M * Cout
                              + Clat * Cout + Cin * Cout + 2 * Cout))
    return pl.pallas_call(
        functools.partial(_pointwise_lrelu_residual_kernel, neg_slope=neg_slope),
        out_shape=jax.ShapeDtypeStruct((M, Cout), h2d.dtype),
        grid=(pl.cdiv(M, bm),),
        in_specs=[
            pl.BlockSpec((bm, Clat), lambda i: (i, 0)),
            pl.BlockSpec((bm, Cin), lambda i: (i, 0)),
            pl.BlockSpec((Clat, Cout), lambda i: (0, 0)),
            pl.BlockSpec((1, Cout), lambda i: (0, 0)),
            pl.BlockSpec((Cin, Cout), lambda i: (0, 0)),
            pl.BlockSpec((1, Cout), lambda i: (0, 0)),
        ],
        out_specs=pl.BlockSpec((bm, Cout), lambda i: (i, 0)),
        compiler_params=pltpu.CompilerParams(dimension_semantics=("parallel",)),
        cost_estimate=cost,
    )(h2d, x2d, wp, bp, wr, br)


# ---------------------------------------------------------------------------
# Weight-layout helpers (PyTorch layouts -> kernel layouts)
# ---------------------------------------------------------------------------

def _dw_taps(w_c133):
    """(C, 1, 3, 3) depthwise weight -> (9, C) taps with k = dy*3 + dx."""
    c = w_c133.shape[0]
    return jnp.transpose(w_c133[:, 0, :, :], (1, 2, 0)).reshape(9, c)


def _pw_mat(w_oi11):
    """(Cout, Cin, 1, 1) 1x1-conv weight -> (Cin, Cout) matmul matrix."""
    return jnp.transpose(w_oi11[:, :, 0, 0], (1, 0))


# ---------------------------------------------------------------------------
# Full DiscriminatorBlock forward (NCHW in, NCHW out — same as PyTorch)
# ---------------------------------------------------------------------------

def discriminator_block_forward(x_nchw, wd1, bd1, wp1, bp1, wd2, bd2, wp2, bp2,
                                wch, bch, neg_slope=0.2):
    B, Cin, H, W = x_nchw.shape
    Clat = wp1.shape[0]
    Cout = wp2.shape[0]
    M = B * H * W

    xh = jnp.transpose(x_nchw, (0, 2, 3, 1))                    # NHWC
    x2d = xh.reshape(M, Cin)                                     # lane-dense 2D view

    # conv1 = depthwise 3x3 (replicate) -> 1x1 pointwise, then LeakyReLU
    d1 = depthwise3x3_replicate(xh, _dw_taps(wd1), bd1.reshape(1, Cin))
    h1 = pointwise_lrelu(d1.reshape(M, Cin), _pw_mat(wp1), bp1.reshape(1, Clat),
                         neg_slope=neg_slope)

    # conv2 = depthwise 3x3 (replicate) -> 1x1 pointwise, LeakyReLU,
    # fused with the residual 1x1 conv (conv_ch) and the residual add.
    d2 = depthwise3x3_replicate(h1.reshape(B, H, W, Clat),
                                _dw_taps(wd2), bd2.reshape(1, Clat))
    out2d = pointwise_lrelu_residual(d2.reshape(M, Clat), x2d,
                                     _pw_mat(wp2), bp2.reshape(1, Cout),
                                     _pw_mat(wch), bch.reshape(1, Cout),
                                     neg_slope=neg_slope)

    return jnp.transpose(out2d.reshape(B, H, W, Cout), (0, 3, 1, 2))  # back to NCHW


# ---------------------------------------------------------------------------
# Pure-JAX reference (independent of the Pallas code path)
# ---------------------------------------------------------------------------

def reference_forward(x, wd1, bd1, wp1, bp1, wd2, bd2, wp2, bp2, wch, bch,
                      neg_slope=0.2):
    def conv1x1(v, w, b):
        y = jax.lax.conv_general_dilated(
            v, w, window_strides=(1, 1), padding="VALID",
            dimension_numbers=("NCHW", "OIHW", "NCHW"))
        return y + b.reshape(1, -1, 1, 1)

    def depthwise(v, w, b):
        vp = jnp.pad(v, ((0, 0), (0, 0), (1, 1), (1, 1)), mode="edge")
        y = jax.lax.conv_general_dilated(
            vp, w, window_strides=(1, 1), padding="VALID",
            dimension_numbers=("NCHW", "OIHW", "NCHW"),
            feature_group_count=v.shape[1])
        return y + b.reshape(1, -1, 1, 1)

    def lrelu(v):
        return jnp.where(v >= 0, v, neg_slope * v)

    res = conv1x1(x, wch, bch)
    h = lrelu(conv1x1(depthwise(x, wd1, bd1), wp1, bp1))
    h = lrelu(conv1x1(depthwise(h, wd2, bd2), wp2, bp2))
    return h + res


# ---------------------------------------------------------------------------
# Demo / self-check
# ---------------------------------------------------------------------------

if __name__ == "__main__":
    key = jax.random.PRNGKey(0)
    ks = jax.random.split(key, 12)

    B, Cin, Clat, Cout, H, W = 2, 4, 8, 8, 16, 16
    x = jax.random.normal(ks[0], (B, Cin, H, W), dtype=jnp.float32)

    def init(k, shape, scale):
        return scale * jax.random.normal(k, shape, dtype=jnp.float32)

    # Parameters in PyTorch layouts.
    wd1 = init(ks[1], (Cin, 1, 3, 3), 0.3)
    bd1 = init(ks[2], (Cin,), 0.1)
    wp1 = init(ks[3], (Clat, Cin, 1, 1), 0.3)
    bp1 = init(ks[4], (Clat,), 0.1)
    wd2 = init(ks[5], (Clat, 1, 3, 3), 0.3)
    bd2 = init(ks[6], (Clat,), 0.1)
    wp2 = init(ks[7], (Cout, Clat, 1, 1), 0.3)
    bp2 = init(ks[8], (Cout,), 0.1)
    wch = init(ks[9], (Cout, Cin, 1, 1), 0.3)
    bch = init(ks[10], (Cout,), 0.1)

    fwd = jax.jit(discriminator_block_forward)
    out = fwd(x, wd1, bd1, wp1, bp1, wd2, bd2, wp2, bp2, wch, bch)
    out = jax.block_until_ready(out)

    ref = reference_forward(x, wd1, bd1, wp1, bp1, wd2, bd2, wp2, bp2, wch, bch)
    ref = jax.block_until_ready(ref)

    assert out.shape == (B, Cout, H, W), f"bad output shape {out.shape}"
    max_err = float(jnp.max(jnp.abs(out - ref)))
    assert jnp.allclose(out, ref, atol=1e-4, rtol=1e-4), f"mismatch, max err {max_err}"

    print("KERNEL_OK")
</pallas_src>

<mosaic_0001>
module attributes {stable_mosaic.version = 11 : i64} {
  func.func @_pointwise_lrelu_kernel(%arg0: i32, %arg1: memref<256x4xf32, #tpu.memory_space<vmem>>, %arg2: memref<4x8xf32, #tpu.memory_space<vmem>>, %arg3: memref<1x8xf32, #tpu.memory_space<vmem>>, %arg4: memref<256x8xf32, #tpu.memory_space<vmem>>) attributes {dimension_semantics = [#tpu.dimension_semantics<parallel>], iteration_bounds = array<i64: 2>, scalar_prefetch = 0 : i64, scratch_operands = 0 : i64, tpu.core_type = #tpu.core_type<tc>, window_params = [{transform_indices = @transform_0, window_bounds = array<i64: 256, 4>}, {pipeline_mode = #tpu.pipeline_mode<synchronous>, transform_indices = @transform_1, window_bounds = array<i64: 4, 8>}, {pipeline_mode = #tpu.pipeline_mode<synchronous>, transform_indices = @transform_2, window_bounds = array<i64: 1, 8>}, {transform_indices = @transform_3, window_bounds = array<i64: 256, 8>}]} {
    %c0 = arith.constant 0 : index
    %c0_0 = arith.constant 0 : index
    %0 = vector.load %arg1[%c0, %c0_0] : memref<256x4xf32, #tpu.memory_space<vmem>>, vector<256x4xf32>
    %c0_1 = arith.constant 0 : index
    %c0_2 = arith.constant 0 : index
    %1 = vector.load %arg2[%c0_1, %c0_2] : memref<4x8xf32, #tpu.memory_space<vmem>>, vector<4x8xf32>
    %cst = arith.constant dense<0.000000e+00> : vector<256x8xf32>
    %2 = tpu.matmul %0, %1, %cst {dimension_numbers = #tpu.dot_dimension_numbers<[1], [0], [0], [1], [0, 0, 1, 1], [], []>} : vector<256x4xf32>, vector<4x8xf32>, vector<256x8xf32> -> vector<256x8xf32>
    %c0_3 = arith.constant 0 : index
    %c0_4 = arith.constant 0 : index
    %3 = vector.load %arg3[%c0_3, %c0_4] : memref<1x8xf32, #tpu.memory_space<vmem>>, vector<1x8xf32>
    %4 = vector.broadcast %3 : vector<1x8xf32> to vector<256x8xf32>
    %5 = arith.addf %2, %4 : vector<256x8xf32>
    %cst_5 = arith.constant 0.000000e+00 : f32
    %6 = vector.broadcast %cst_5 : f32 to vector<256x8xf32>
    %7 = arith.cmpf oge, %5, %6 : vector<256x8xf32>
    %cst_6 = arith.constant 2.000000e-01 : f32
    %8 = vector.broadcast %cst_6 : f32 to vector<256x8xf32>
    %9 = arith.mulf %5, %8 : vector<256x8xf32>
    %10 = arith.select %7, %5, %9 : vector<256x8xi1>, vector<256x8xf32>
    %c0_7 = arith.constant 0 : index
    %c0_8 = arith.constant 0 : index
    %11 = vector.load %arg4[%c0_7, %c0_8] : memref<256x8xf32, #tpu.memory_space<vmem>>, vector<256x8xf32>
    tpu.vector_store %arg4[%c0_7, %c0_8], %10 {strides = array<i32>} : memref<256x8xf32, #tpu.memory_space<vmem>>, vector<256x8xf32>,
    return
  }
  func.func @transform_0(%arg0: i32) -> (i32, i32) {
    %c0_i32 = arith.constant 0 : i32
    %c0_i32_0 = arith.constant 0 : i32
    return %arg0, %c0_i32 : i32, i32
  }
  func.func @transform_1(%arg0: i32) -> (i32, i32) {
    %c0_i32 = arith.constant 0 : i32
    %c0_i32_0 = arith.constant 0 : i32
    %c0_i32_1 = arith.constant 0 : i32
    return %c0_i32, %c0_i32_0 : i32, i32
  }
  func.func @transform_2(%arg0: i32) -> (i32, i32) {
    %c0_i32 = arith.constant 0 : i32
    %c0_i32_0 = arith.constant 0 : i32
    %c0_i32_1 = arith.constant 0 : i32
    return %c0_i32, %c0_i32_0 : i32, i32
  }
  func.func @transform_3(%arg0: i32) -> (i32, i32) {
    %c0_i32 = arith.constant 0 : i32
    %c0_i32_0 = arith.constant 0 : i32
    return %arg0, %c0_i32 : i32, i32
  }
}

module attributes {stable_mosaic.version = 11 : i64} {
  func.func @_depthwise3x3_kernel(%arg0: i32, %arg1: memref<1x18x18x4xf32, #tpu.memory_space<vmem>>, %arg2: memref<9x4xf32, #tpu.memory_space<vmem>>, %arg3: memref<1x4xf32, #tpu.memory_space<vmem>>, %arg4: memref<1x16x16x4xf32, #tpu.memory_space<vmem>>) attributes {dimension_semantics = [#tpu.dimension_semantics<parallel>], iteration_bounds = array<i64: 2>, scalar_prefetch = 0 : i64, scratch_operands = 0 : i64, tpu.core_type = #tpu.core_type<tc>, window_params = [{transform_indices = @transform_0, window_bounds = array<i64: 1, 18, 18, 4>}, {pipeline_mode = #tpu.pipeline_mode<synchronous>, transform_indices = @transform_1, window_bounds = array<i64: 9, 4>}, {pipeline_mode = #tpu.pipeline_mode<synchronous>, transform_indices = @transform_2, window_bounds = array<i64: 1, 4>}, {transform_indices = @transform_3, window_bounds = array<i64: 1, 16, 16, 4>}]} {
    %cst = arith.constant 0.000000e+00 : f32
    %0 = vector.broadcast %cst : f32 to vector<16x16x4xf32>
    %c0 = arith.constant 0 : index
    %c0_0 = arith.constant 0 : index
    %c0_1 = arith.constant 0 : index
    %c0_2 = arith.constant 0 : index
    %1 = vector.load %arg1[%c0, %c0_0, %c0_1, %c0_2] : memref<1x18x18x4xf32, #tpu.memory_space<vmem>>, vector<1x16x16x4xf32>
    %2 = vector.shape_cast %1 : vector<1x16x16x4xf32> to vector<16x16x4xf32>
    %c0_3 = arith.constant 0 : index
    %c0_4 = arith.constant 0 : index
    %3 = vector.load %arg2[%c0_3, %c0_4] : memref<9x4xf32, #tpu.memory_space<vmem>>, vector<1x4xf32>
    %4 = vector.shape_cast %3 : vector<1x4xf32> to vector<1x1x4xf32>
    %5 = vector.broadcast %4 : vector<1x1x4xf32> to vector<16x16x4xf32>
    %6 = arith.mulf %2, %5 : vector<16x16x4xf32>
    %7 = arith.addf %0, %6 : vector<16x16x4xf32>
    %c0_5 = arith.constant 0 : index
    %c0_6 = arith.constant 0 : index
    %c1 = arith.constant 1 : index
    %c0_7 = arith.constant 0 : index
    %8 = vector.load %arg1[%c0_5, %c0_6, %c1, %c0_7] : memref<1x18x18x4xf32, #tpu.memory_space<vmem>>, vector<1x16x16x4xf32>
    %9 = vector.shape_cast %8 : vector<1x16x16x4xf32> to vector<16x16x4xf32>
    %c1_8 = arith.constant 1 : index
    %c0_9 = arith.constant 0 : index
    %10 = vector.load %arg2[%c1_8, %c0_9] : memref<9x4xf32, #tpu.memory_space<vmem>>, vector<1x4xf32>
    %11 = vector.shape_cast %10 : vector<1x4xf32> to vector<1x1x4xf32>
    %12 = vector.broadcast %11 : vector<1x1x4xf32> to vector<16x16x4xf32>
    %13 = arith.mulf %9, %12 : vector<16x16x4xf32>
    %14 = arith.addf %7, %13 : vector<16x16x4xf32>
    %c0_10 = arith.constant 0 : index
    %c0_11 = arith.constant 0 : index
    %c2 = arith.constant 2 : index
    %c0_12 = arith.constant 0 : index
    %15 = vector.load %arg1[%c0_10, %c0_11, %c2, %c0_12] : memref<1x18x18x4xf32, #tpu.memory_space<vmem>>, vector<1x16x16x4xf32>
    %16 = vector.shape_cast %15 : vector<1x16x16x4xf32> to vector<16x16x4xf32>
    %c2_13 = arith.constant 2 : index
    %c0_14 = arith.constant 0 : index
    %17 = vector.load %arg2[%c2_13, %c0_14] : memref<9x4xf32, #tpu.memory_space<vmem>>, vector<1x4xf32>
    %18 = vector.shape_cast %17 : vector<1x4xf32> to vector<1x1x4xf32>
    %19 = vector.broadcast %18 : vector<1x1x4xf32> to vector<16x16x4xf32>
    %20 = arith.mulf %16, %19 : vector<16x16x4xf32>
    %21 = arith.addf %14, %20 : vector<16x16x4xf32>
    %c0_15 = arith.constant 0 : index
    %c1_16 = arith.constant 1 : index
    %c0_17 = arith.constant 0 : index
    %c0_18 = arith.constant 0 : index
    %22 = vector.load %arg1[%c0_15, %c1_16, %c0_17, %c0_18] : memref<1x18x18x4xf32, #tpu.memory_space<vmem>>, vector<1x16x16x4xf32>
    %23 = vector.shape_cast %22 : vector<1x16x16x4xf32> to vector<16x16x4xf32>
    %c3 = arith.constant 3 : index
    %c0_19 = arith.constant 0 : index
    %24 = vector.load %arg2[%c3, %c0_19] : memref<9x4xf32, #tpu.memory_space<vmem>>, vector<1x4xf32>
    %25 = vector.shape_cast %24 : vector<1x4xf32> to vector<1x1x4xf32>
    %26 = vector.broadcast %25 : vector<1x1x4xf32> to vector<16x16x4xf32>
    %27 = arith.mulf %23, %26 : vector<16x16x4xf32>
    %28 = arith.addf %21, %27 : vector<16x16x4xf32>
    %c0_20 = arith.constant 0 : index
    %c1_21 = arith.constant 1 : index
    %c1_22 = arith.constant 1 : index
    %c0_23 = arith.constant 0 : index
    %29 = vector.load %arg1[%c0_20, %c1_21, %c1_22, %c0_23] : memref<1x18x18x4xf32, #tpu.memory_space<vmem>>, vector<1x16x16x4xf32>
    %30 = vector.shape_cast %29 : vector<1x16x16x4xf32> to vector<16x16x4xf32>
    %c4 = arith.constant 4 : index
    %c0_24 = arith.constant 0 : index
    %31 = vector.load %arg2[%c4, %c0_24] : memref<9x4xf32, #tpu.memory_space<vmem>>, vector<1x4xf32>
    %32 = vector.shape_cast %31 : vector<1x4xf32> to vector<1x1x4xf32>
    %33 = vector.broadcast %32 : vector<1x1x4xf32> to vector<16x16x4xf32>
    %34 = arith.mulf %30, %33 : vector<16x16x4xf32>
    %35 = arith.addf %28, %34 : vector<16x16x4xf32>
    %c0_25 = arith.constant 0 : index
    %c1_26 = arith.constant 1 : index
    %c2_27 = arith.constant 2 : index
    %c0_28 = arith.constant 0 : index
    %36 = vector.load %arg1[%c0_25, %c1_26, %c2_27, %c0_28] : memref<1x18x18x4xf32, #tpu.memory_space<vmem>>, vector<1x16x16x4xf32>
    %37 = vector.shape_cast %36 : vector<1x16x16x4xf32> to vector<16x16x4xf32>
    %c5 = arith.constant 5 : index
    %c0_29 = arith.constant 0 : index
    %38 = vector.load %arg2[%c5, %c0_29] : memref<9x4xf32, #tpu.memory_space<vmem>>, vector<1x4xf32>
    %39 = vector.shape_cast %38 : vector<1x4xf32> to vector<1x1x4xf32>
    %40 = vector.broadcast %39 : vector<1x1x4xf32> to vector<16x16x4xf32>
    %41 = arith.mulf %37, %40 : vector<16x16x4xf32>
    %42 = arith.addf %35, %41 : vector<16x16x4xf32>
    %c0_30 = arith.constant 0 : index
    %c2_31 = arith.constant 2 : index
    %c0_32 = arith.constant 0 : index
    %c0_33 = arith.constant 0 : index
    %43 = vector.load %arg1[%c0_30, %c2_31, %c0_32, %c0_33] : memref<1x18x18x4xf32, #tpu.memory_space<vmem>>, vector<1x16x16x4xf32>
    %44 = vector.shape_cast %43 : vector<1x16x16x4xf32> to vector<16x16x4xf32>
    %c6 = arith.constant 6 : index
    %c0_34 = arith.constant 0 : index
    %45 = vector.load %arg2[%c6, %c0_34] : memref<9x4xf32, #tpu.memory_space<vmem>>, vector<1x4xf32>
    %46 = vector.shape_cast %45 : vector<1x4xf32> to vector<1x1x4xf32>
    %47 = vector.broadcast %46 : vector<1x1x4xf32> to vector<16x16x4xf32>
    %48 = arith.mulf %44, %47 : vector<16x16x4xf32>
    %49 = arith.addf %42, %48 : vector<16x16x4xf32>
    %c0_35 = arith.constant 0 : index
    %c2_36 = arith.constant 2 : index
    %c1_37 = arith.constant 1 : index
    %c0_38 = arith.constant 0 : index
    %50 = vector.load %arg1[%c0_35, %c2_36, %c1_37, %c0_38] : memref<1x18x18x4xf32, #tpu.memory_space<vmem>>, vector<1x16x16x4xf32>
    %51 = vector.shape_cast %50 : vector<1x16x16x4xf32> to vector<16x16x4xf32>
    %c7 = arith.constant 7 : index
    %c0_39 = arith.constant 0 : index
    %52 = vector.load %arg2[%c7, %c0_39] : memref<9x4xf32, #tpu.memory_space<vmem>>, vector<1x4xf32>
    %53 = vector.shape_cast %52 : vector<1x4xf32> to vector<1x1x4xf32>
    %54 = vector.broadcast %53 : vector<1x1x4xf32> to vector<16x16x4xf32>
    %55 = arith.mulf %51, %54 : vector<16x16x4xf32>
    %56 = arith.addf %49, %55 : vector<16x16x4xf32>
    %c0_40 = arith.constant 0 : index
    %c2_41 = arith.constant 2 : index
    %c2_42 = arith.constant 2 : index
    %c0_43 = arith.constant 0 : index
    %57 = vector.load %arg1[%c0_40, %c2_41, %c2_42, %c0_43] : memref<1x18x18x4xf32, #tpu.memory_space<vmem>>, vector<1x16x16x4xf32>
    %58 = vector.shape_cast %57 : vector<1x16x16x4xf32> to vector<16x16x4xf32>
    %c8 = arith.constant 8 : index
    %c0_44 = arith.constant 0 : index
    %59 = vector.load %arg2[%c8, %c0_44] : memref<9x4xf32, #tpu.memory_space<vmem>>, vector<1x4xf32>
    %60 = vector.shape_cast %59 : vector<1x4xf32> to vector<1x1x4xf32>
    %61 = vector.broadcast %60 : vector<1x1x4xf32> to vector<16x16x4xf32>
    %62 = arith.mulf %58, %61 : vector<16x16x4xf32>
    %63 = arith.addf %56, %62 : vector<16x16x4xf32>
    %c0_45 = arith.constant 0 : index
    %c0_46 = arith.constant 0 : index
    %64 = vector.load %arg3[%c0_45, %c0_46] : memref<1x4xf32, #tpu.memory_space<vmem>>, vector<1x4xf32>
    %65 = vector.shape_cast %64 : vector<1x4xf32> to vector<1x1x4xf32>
    %66 = vector.broadcast %65 : vector<1x1x4xf32> to vector<16x16x4xf32>
    %67 = arith.addf %63, %66 : vector<16x16x4xf32>
    %c0_47 = arith.constant 0 : index
    %c0_48 = arith.constant 0 : index
    %c0_49 = arith.constant 0 : index
    %c0_50 = arith.constant 0 : index
    %68 = vector.load %arg4[%c0_47, %c0_48, %c0_49, %c0_50] : memref<1x16x16x4xf32, #tpu.memory_space<vmem>>, vector<1x16x16x4xf32>
    %69 = vector.shape_cast %68 : vector<1x16x16x4xf32> to vector<16x16x4xf32>
    %70 = vector.shape_cast %67 : vector<16x16x4xf32> to vector<1x16x16x4xf32>
    tpu.vector_store %arg4[%c0_47, %c0_48, %c0_49, %c0_50], %70 {strides = array<i32>} : memref<1x16x16x4xf32, #tpu.memory_space<vmem>>, vector<1x16x16x4xf32>,
    return
  }
  func.func @transform_0(%arg0: i32) -> (i32, i32, i32, i32) {
    %c0_i32 = arith.constant 0 : i32
    %c0_i32_0 = arith.constant 0 : i32
    %c0_i32_1 = arith.constant 0 : i32
    %c0_i32_2 = arith.constant 0 : i32
    return %arg0, %c0_i32, %c0_i32_0, %c0_i32_1 : i32, i32, i32, i32
  }
  func.func @transform_1(%arg0: i32) -> (i32, i32) {
    %c0_i32 = arith.constant 0 : i32
    %c0_i32_0 = arith.constant 0 : i32
    %c0_i32_1 = arith.constant 0 : i32
    return %c0_i32, %c0_i32_0 : i32, i32
  }
  func.func @transform_2(%arg0: i32) -> (i32, i32) {
    %c0_i32 = arith.constant 0 : i32
    %c0_i32_0 = arith.constant 0 : i32
    %c0_i32_1 = arith.constant 0 : i32
    return %c0_i32, %c0_i32_0 : i32, i32
  }
  func.func @transform_3(%arg0: i32) -> (i32, i32, i32, i32) {
    %c0_i32 = arith.constant 0 : i32
    %c0_i32_0 = arith.constant 0 : i32
    %c0_i32_1 = arith.constant 0 : i32
    %c0_i32_2 = arith.constant 0 : i32
    return %arg0, %c0_i32, %c0_i32_0, %c0_i32_1 : i32, i32, i32, i32
  }
}

module attributes {stable_mosaic.version = 11 : i64} {
  func.func @_depthwise3x3_kernel(%arg0: i32, %arg1: memref<1x18x18x8xf32, #tpu.memory_space<vmem>>, %arg2: memref<9x8xf32, #tpu.memory_space<vmem>>, %arg3: memref<1x8xf32, #tpu.memory_space<vmem>>, %arg4: memref<1x16x16x8xf32, #tpu.memory_space<vmem>>) attributes {dimension_semantics = [#tpu.dimension_semantics<parallel>], iteration_bounds = array<i64: 2>, scalar_prefetch = 0 : i64, scratch_operands = 0 : i64, tpu.core_type = #tpu.core_type<tc>, window_params = [{transform_indices = @transform_0, window_bounds = array<i64: 1, 18, 18, 8>}, {pipeline_mode = #tpu.pipeline_mode<synchronous>, transform_indices = @transform_1, window_bounds = array<i64: 9, 8>}, {pipeline_mode = #tpu.pipeline_mode<synchronous>, transform_indices = @transform_2, window_bounds = array<i64: 1, 8>}, {transform_indices = @transform_3, window_bounds = array<i64: 1, 16, 16, 8>}]} {
    %cst = arith.constant 0.000000e+00 : f32
    %0 = vector.broadcast %cst : f32 to vector<16x16x8xf32>
    %c0 = arith.constant 0 : index
    %c0_0 = arith.constant 0 : index
    %c0_1 = arith.constant 0 : index
    %c0_2 = arith.constant 0 : index
    %1 = vector.load %arg1[%c0, %c0_0, %c0_1, %c0_2] : memref<1x18x18x8xf32, #tpu.memory_space<vmem>>, vector<1x16x16x8xf32>
    %2 = vector.shape_cast %1 : vector<1x16x16x8xf32> to vector<16x16x8xf32>
    %c0_3 = arith.constant 0 : index
    %c0_4 = arith.constant 0 : index
    %3 = vector.load %arg2[%c0_3, %c0_4] : memref<9x8xf32, #tpu.memory_space<vmem>>, vector<1x8xf32>
    %4 = vector.shape_cast %3 : vector<1x8xf32> to vector<1x1x8xf32>
    %5 = vector.broadcast %4 : vector<1x1x8xf32> to vector<16x16x8xf32>
    %6 = arith.mulf %2, %5 : vector<16x16x8xf32>
    %7 = arith.addf %0, %6 : vector<16x16x8xf32>
    %c0_5 = arith.constant 0 : index
    %c0_6 = arith.constant 0 : index
    %c1 = arith.constant 1 : index
    %c0_7 = arith.constant 0 : index
    %8 = vector.load %arg1[%c0_5, %c0_6, %c1, %c0_7] : memref<1x18x18x8xf32, #tpu.memory_space<vmem>>, vector<1x16x16x8xf32>
    %9 = vector.shape_cast %8 : vector<1x16x16x8xf32> to vector<16x16x8xf32>
    %c1_8 = arith.constant 1 : index
    %c0_9 = arith.constant 0 : index
    %10 = vector.load %arg2[%c1_8, %c0_9] : memref<9x8xf32, #tpu.memory_space<vmem>>, vector<1x8xf32>
    %11 = vector.shape_cast %10 : vector<1x8xf32> to vector<1x1x8xf32>
    %12 = vector.broadcast %11 : vector<1x1x8xf32> to vector<16x16x8xf32>
    %13 = arith.mulf %9, %12 : vector<16x16x8xf32>
    %14 = arith.addf %7, %13 : vector<16x16x8xf32>
    %c0_10 = arith.constant 0 : index
    %c0_11 = arith.constant 0 : index
    %c2 = arith.constant 2 : index
    %c0_12 = arith.constant 0 : index
    %15 = vector.load %arg1[%c0_10, %c0_11, %c2, %c0_12] : memref<1x18x18x8xf32, #tpu.memory_space<vmem>>, vector<1x16x16x8xf32>
    %16 = vector.shape_cast %15 : vector<1x16x16x8xf32> to vector<16x16x8xf32>
    %c2_13 = arith.constant 2 : index
    %c0_14 = arith.constant 0 : index
    %17 = vector.load %arg2[%c2_13, %c0_14] : memref<9x8xf32, #tpu.memory_space<vmem>>, vector<1x8xf32>
    %18 = vector.shape_cast %17 : vector<1x8xf32> to vector<1x1x8xf32>
    %19 = vector.broadcast %18 : vector<1x1x8xf32> to vector<16x16x8xf32>
    %20 = arith.mulf %16, %19 : vector<16x16x8xf32>
    %21 = arith.addf %14, %20 : vector<16x16x8xf32>
    %c0_15 = arith.constant 0 : index
    %c1_16 = arith.constant 1 : index
    %c0_17 = arith.constant 0 : index
    %c0_18 = arith.constant 0 : index
    %22 = vector.load %arg1[%c0_15, %c1_16, %c0_17, %c0_18] : memref<1x18x18x8xf32, #tpu.memory_space<vmem>>, vector<1x16x16x8xf32>
    %23 = vector.shape_cast %22 : vector<1x16x16x8xf32> to vector<16x16x8xf32>
    %c3 = arith.constant 3 : index
    %c0_19 = arith.constant 0 : index
    %24 = vector.load %arg2[%c3, %c0_19] : memref<9x8xf32, #tpu.memory_space<vmem>>, vector<1x8xf32>
    %25 = vector.shape_cast %24 : vector<1x8xf32> to vector<1x1x8xf32>
    %26 = vector.broadcast %25 : vector<1x1x8xf32> to vector<16x16x8xf32>
    %27 = arith.mulf %23, %26 : vector<16x16x8xf32>
    %28 = arith.addf %21, %27 : vector<16x16x8xf32>
    %c0_20 = arith.constant 0 : index
    %c1_21 = arith.constant 1 : index
    %c1_22 = arith.constant 1 : index
    %c0_23 = arith.constant 0 : index
    %29 = vector.load %arg1[%c0_20, %c1_21, %c1_22, %c0_23] : memref<1x18x18x8xf32, #tpu.memory_space<vmem>>, vector<1x16x16x8xf32>
    %30 = vector.shape_cast %29 : vector<1x16x16x8xf32> to vector<16x16x8xf32>
    %c4 = arith.constant 4 : index
    %c0_24 = arith.constant 0 : index
    %31 = vector.load %arg2[%c4, %c0_24] : memref<9x8xf32, #tpu.memory_space<vmem>>, vector<1x8xf32>
    %32 = vector.shape_cast %31 : vector<1x8xf32> to vector<1x1x8xf32>
    %33 = vector.broadcast %32 : vector<1x1x8xf32> to vector<16x16x8xf32>
    %34 = arith.mulf %30, %33 : vector<16x16x8xf32>
    %35 = arith.addf %28, %34 : vector<16x16x8xf32>
    %c0_25 = arith.constant 0 : index
    %c1_26 = arith.constant 1 : index
    %c2_27 = arith.constant 2 : index
    %c0_28 = arith.constant 0 : index
    %36 = vector.load %arg1[%c0_25, %c1_26, %c2_27, %c0_28] : memref<1x18x18x8xf32, #tpu.memory_space<vmem>>, vector<1x16x16x8xf32>
    %37 = vector.shape_cast %36 : vector<1x16x16x8xf32> to vector<16x16x8xf32>
    %c5 = arith.constant 5 : index
    %c0_29 = arith.constant 0 : index
    %38 = vector.load %arg2[%c5, %c0_29] : memref<9x8xf32, #tpu.memory_space<vmem>>, vector<1x8xf32>
    %39 = vector.shape_cast %38 : vector<1x8xf32> to vector<1x1x8xf32>
    %40 = vector.broadcast %39 : vector<1x1x8xf32> to vector<16x16x8xf32>
    %41 = arith.mulf %37, %40 : vector<16x16x8xf32>
    %42 = arith.addf %35, %41 : vector<16x16x8xf32>
    %c0_30 = arith.constant 0 : index
    %c2_31 = arith.constant 2 : index
    %c0_32 = arith.constant 0 : index
    %c0_33 = arith.constant 0 : index
    %43 = vector.load %arg1[%c0_30, %c2_31, %c0_32, %c0_33] : memref<1x18x18x8xf32, #tpu.memory_space<vmem>>, vector<1x16x16x8xf32>
    %44 = vector.shape_cast %43 : vector<1x16x16x8xf32> to vector<16x16x8xf32>
    %c6 = arith.constant 6 : index
    %c0_34 = arith.constant 0 : index
    %45 = vector.load %arg2[%c6, %c0_34] : memref<9x8xf32, #tpu.memory_space<vmem>>, vector<1x8xf32>
    %46 = vector.shape_cast %45 : vector<1x8xf32> to vector<1x1x8xf32>
    %47 = vector.broadcast %46 : vector<1x1x8xf32> to vector<16x16x8xf32>
    %48 = arith.mulf %44, %47 : vector<16x16x8xf32>
    %49 = arith.addf %42, %48 : vector<16x16x8xf32>
    %c0_35 = arith.constant 0 : index
    %c2_36 = arith.constant 2 : index
    %c1_37 = arith.constant 1 : index
    %c0_38 = arith.constant 0 : index
    %50 = vector.load %arg1[%c0_35, %c2_36, %c1_37, %c0_38] : memref<1x18x18x8xf32, #tpu.memory_space<vmem>>, vector<1x16x16x8xf32>
    %51 = vector.shape_cast %50 : vector<1x16x16x8xf32> to vector<16x16x8xf32>
    %c7 = arith.constant 7 : index
    %c0_39 = arith.constant 0 : index
    %52 = vector.load %arg2[%c7, %c0_39] : memref<9x8xf32, #tpu.memory_space<vmem>>, vector<1x8xf32>
    %53 = vector.shape_cast %52 : vector<1x8xf32> to vector<1x1x8xf32>
    %54 = vector.broadcast %53 : vector<1x1x8xf32> to vector<16x16x8xf32>
    %55 = arith.mulf %51, %54 : vector<16x16x8xf32>
    %56 = arith.addf %49, %55 : vector<16x16x8xf32>
    %c0_40 = arith.constant 0 : index
    %c2_41 = arith.constant 2 : index
    %c2_42 = arith.constant 2 : index
    %c0_43 = arith.constant 0 : index
    %57 = vector.load %arg1[%c0_40, %c2_41, %c2_42, %c0_43] : memref<1x18x18x8xf32, #tpu.memory_space<vmem>>, vector<1x16x16x8xf32>
    %58 = vector.shape_cast %57 : vector<1x16x16x8xf32> to vector<16x16x8xf32>
    %c8 = arith.constant 8 : index
    %c0_44 = arith.constant 0 : index
    %59 = vector.load %arg2[%c8, %c0_44] : memref<9x8xf32, #tpu.memory_space<vmem>>, vector<1x8xf32>
    %60 = vector.shape_cast %59 : vector<1x8xf32> to vector<1x1x8xf32>
    %61 = vector.broadcast %60 : vector<1x1x8xf32> to vector<16x16x8xf32>
    %62 = arith.mulf %58, %61 : vector<16x16x8xf32>
    %63 = arith.addf %56, %62 : vector<16x16x8xf32>
    %c0_45 = arith.constant 0 : index
    %c0_46 = arith.constant 0 : index
    %64 = vector.load %arg3[%c0_45, %c0_46] : memref<1x8xf32, #tpu.memory_space<vmem>>, vector<1x8xf32>
    %65 = vector.shape_cast %64 : vector<1x8xf32> to vector<1x1x8xf32>
    %66 = vector.broadcast %65 : vector<1x1x8xf32> to vector<16x16x8xf32>
    %67 = arith.addf %63, %66 : vector<16x16x8xf32>
    %c0_47 = arith.constant 0 : index
    %c0_48 = arith.constant 0 : index
    %c0_49 = arith.constant 0 : index
    %c0_50 = arith.constant 0 : index
    %68 = vector.load %arg4[%c0_47, %c0_48, %c0_49, %c0_50] : memref<1x16x16x8xf32, #tpu.memory_space<vmem>>, vector<1x16x16x8xf32>
    %69 = vector.shape_cast %68 : vector<1x16x16x8xf32> to vector<16x16x8xf32>
    %70 = vector.shape_cast %67 : vector<16x16x8xf32> to vector<1x16x16x8xf32>
    tpu.vector_store %arg4[%c0_47, %c0_48, %c0_49, %c0_50], %70 {strides = array<i32>} : memref<1x16x16x8xf32, #tpu.memory_space<vmem>>, vector<1x16x16x8xf32>,
    return
  }
  func.func @transform_0(%arg0: i32) -> (i32, i32, i32, i32) {
    %c0_i32 = arith.constant 0 : i32
    %c0_i32_0 = arith.constant 0 : i32
    %c0_i32_1 = arith.constant 0 : i32
    %c0_i32_2 = arith.constant 0 : i32
    return %arg0, %c0_i32, %c0_i32_0, %c0_i32_1 : i32, i32, i32, i32
  }
  func.func @transform_1(%arg0: i32) -> (i32, i32) {
    %c0_i32 = arith.constant 0 : i32
    %c0_i32_0 = arith.constant 0 : i32
    %c0_i32_1 = arith.constant 0 : i32
    return %c0_i32, %c0_i32_0 : i32, i32
  }
  func.func @transform_2(%arg0: i32) -> (i32, i32) {
    %c0_i32 = arith.constant 0 : i32
    %c0_i32_0 = arith.constant 0 : i32
    %c0_i32_1 = arith.constant 0 : i32
    return %c0_i32, %c0_i32_0 : i32, i32
  }
  func.func @transform_3(%arg0: i32) -> (i32, i32, i32, i32) {
    %c0_i32 = arith.constant 0 : i32
    %c0_i32_0 = arith.constant 0 : i32
    %c0_i32_1 = arith.constant 0 : i32
    %c0_i32_2 = arith.constant 0 : i32
    return %arg0, %c0_i32, %c0_i32_0, %c0_i32_1 : i32, i32, i32, i32
  }
}

module attributes {stable_mosaic.version = 11 : i64} {
  func.func @_pointwise_lrelu_residual_kernel(%arg0: i32, %arg1: memref<256x8xf32, #tpu.memory_space<vmem>>, %arg2: memref<256x4xf32, #tpu.memory_space<vmem>>, %arg3: memref<8x8xf32, #tpu.memory_space<vmem>>, %arg4: memref<1x8xf32, #tpu.memory_space<vmem>>, %arg5: memref<4x8xf32, #tpu.memory_space<vmem>>, %arg6: memref<1x8xf32, #tpu.memory_space<vmem>>, %arg7: memref<256x8xf32, #tpu.memory_space<vmem>>) attributes {dimension_semantics = [#tpu.dimension_semantics<parallel>], iteration_bounds = array<i64: 2>, scalar_prefetch = 0 : i64, scratch_operands = 0 : i64, tpu.core_type = #tpu.core_type<tc>, window_params = [{transform_indices = @transform_0, window_bounds = array<i64: 256, 8>}, {transform_indices = @transform_1, window_bounds = array<i64: 256, 4>}, {pipeline_mode = #tpu.pipeline_mode<synchronous>, transform_indices = @transform_2, window_bounds = array<i64: 8, 8>}, {pipeline_mode = #tpu.pipeline_mode<synchronous>, transform_indices = @transform_3, window_bounds = array<i64: 1, 8>}, {pipeline_mode = #tpu.pipeline_mode<synchronous>, transform_indices = @transform_4, window_bounds = array<i64: 4, 8>}, {pipeline_mode = #tpu.pipeline_mode<synchronous>, transform_indices = @transform_5, window_bounds = array<i64: 1, 8>}, {transform_indices = @transform_6, window_bounds = array<i64: 256, 8>}]} {
    %c0 = arith.constant 0 : index
    %c0_0 = arith.constant 0 : index
    %0 = vector.load %arg1[%c0, %c0_0] : memref<256x8xf32, #tpu.memory_space<vmem>>, vector<256x8xf32>
    %c0_1 = arith.constant 0 : index
    %c0_2 = arith.constant 0 : index
    %1 = vector.load %arg3[%c0_1, %c0_2] : memref<8x8xf32, #tpu.memory_space<vmem>>, vector<8x8xf32>
    %cst = arith.constant dense<0.000000e+00> : vector<256x8xf32>
    %2 = tpu.matmul %0, %1, %cst {dimension_numbers = #tpu.dot_dimension_numbers<[1], [0], [0], [1], [0, 0, 1, 1], [], []>} : vector<256x8xf32>, vector<8x8xf32>, vector<256x8xf32> -> vector<256x8xf32>
    %c0_3 = arith.constant 0 : index
    %c0_4 = arith.constant 0 : index
    %3 = vector.load %arg4[%c0_3, %c0_4] : memref<1x8xf32, #tpu.memory_space<vmem>>, vector<1x8xf32>
    %4 = vector.broadcast %3 : vector<1x8xf32> to vector<256x8xf32>
    %5 = arith.addf %2, %4 : vector<256x8xf32>
    %cst_5 = arith.constant 0.000000e+00 : f32
    %6 = vector.broadcast %cst_5 : f32 to vector<256x8xf32>
    %7 = arith.cmpf oge, %5, %6 : vector<256x8xf32>
    %cst_6 = arith.constant 2.000000e-01 : f32
    %8 = vector.broadcast %cst_6 : f32 to vector<256x8xf32>
    %9 = arith.mulf %5, %8 : vector<256x8xf32>
    %10 = arith.select %7, %5, %9 : vector<256x8xi1>, vector<256x8xf32>
    %c0_7 = arith.constant 0 : index
    %c0_8 = arith.constant 0 : index
    %11 = vector.load %arg2[%c0_7, %c0_8] : memref<256x4xf32, #tpu.memory_space<vmem>>, vector<256x4xf32>
    %c0_9 = arith.constant 0 : index
    %c0_10 = arith.constant 0 : index
    %12 = vector.load %arg5[%c0_9, %c0_10] : memref<4x8xf32, #tpu.memory_space<vmem>>, vector<4x8xf32>
    %cst_11 = arith.constant dense<0.000000e+00> : vector<256x8xf32>
    %13 = tpu.matmul %11, %12, %cst_11 {dimension_numbers = #tpu.dot_dimension_numbers<[1], [0], [0], [1], [0, 0, 1, 1], [], []>} : vector<256x4xf32>, vector<4x8xf32>, vector<256x8xf32> -> vector<256x8xf32>
    %c0_12 = arith.constant 0 : index
    %c0_13 = arith.constant 0 : index
    %14 = vector.load %arg6[%c0_12, %c0_13] : memref<1x8xf32, #tpu.memory_space<vmem>>, vector<1x8xf32>
    %15 = vector.broadcast %14 : vector<1x8xf32> to vector<256x8xf32>
    %16 = arith.addf %13, %15 : vector<256x8xf32>
    %17 = arith.addf %10, %16 : vector<256x8xf32>
    %c0_14 = arith.constant 0 : index
    %c0_15 = arith.constant 0 : index
    %18 = vector.load %arg7[%c0_14, %c0_15] : memref<256x8xf32, #tpu.memory_space<vmem>>, vector<256x8xf32>
    tpu.vector_store %arg7[%c0_14, %c0_15], %17 {strides = array<i32>} : memref<256x8xf32, #tpu.memory_space<vmem>>, vector<256x8xf32>,
    return
  }
  func.func @transform_0(%arg0: i32) -> (i32, i32) {
    %c0_i32 = arith.constant 0 : i32
    %c0_i32_0 = arith.constant 0 : i32
    return %arg0, %c0_i32 : i32, i32
  }
  func.func @transform_1(%arg0: i32) -> (i32, i32) {
    %c0_i32 = arith.constant 0 : i32
    %c0_i32_0 = arith.constant 0 : i32
    return %arg0, %c0_i32 : i32, i32
  }
  func.func @transform_2(%arg0: i32) -> (i32, i32) {
    %c0_i32 = arith.constant 0 : i32
    %c0_i32_0 = arith.constant 0 : i32
    %c0_i32_1 = arith.constant 0 : i32
    return %c0_i32, %c0_i32_0 : i32, i32
  }
  func.func @transform_3(%arg0: i32) -> (i32, i32) {
    %c0_i32 = arith.constant 0 : i32
    %c0_i32_0 = arith.constant 0 : i32
    %c0_i32_1 = arith.constant 0 : i32
    return %c0_i32, %c0_i32_0 : i32, i32
  }
  func.func @transform_4(%arg0: i32) -> (i32, i32) {
    %c0_i32 = arith.constant 0 : i32
    %c0_i32_0 = arith.constant 0 : i32
    %c0_i32_1 = arith.constant 0 : i32
    return %c0_i32, %c0_i32_0 : i32, i32
  }
  func.func @transform_5(%arg0: i32) -> (i32, i32) {
    %c0_i32 = arith.constant 0 : i32
    %c0_i32_0 = arith.constant 0 : i32
    %c0_i32_1 = arith.constant 0 : i32
    return %c0_i32, %c0_i32_0 : i32, i32
  }
  func.func @transform_6(%arg0: i32) -> (i32, i32) {
    %c0_i32 = arith.constant 0 : i32
    %c0_i32_0 = arith.constant 0 : i32
    return %arg0, %c0_i32 : i32, i32
  }
}

</mosaic_0001>

<bundles_post_ra>
// kernel: discriminator_block_forward.5
= control target key start
LH: loop header
LB: loop body
LE: loop exit
PB: predicated region body
PF: predicated region fallthrough
CT: control target
= control target key end

     0   :  { %s891_s12 = smov 0   ;;  %s1087_s0 = inlined_call_operand.vmem [shape: f32[512,4], index: 0, kind: input, shape index: {}]   ;;  %s1088_s1 = inlined_call_operand.vmem [shape: f32[4,8], index: 1, kind: input, shape index: {}]   ;;  %s1089_s2 = inlined_call_operand.vmem [shape: f32[1,8], index: 2, kind: input, shape index: {}]   ;;  %s1090_s3 = inlined_call_operand.vmem [shape: f32[512,8], index: 3, kind: output, shape index: {}]  }
   0x1 LB: > { %s725_s13 = sadd.s32 4294967295, %s869_s12   ;;  %p729_p0 = scmp.ge.s32.totalorder %s869_s12, 1  ;;  %s869_s12 = sphi %s891_s12, %s13_s12  }
   0x2   : > { %p138_p1 = scmp.lt.s32.totalorder %s869_s12, 3 }
   0x4   : > { %p139_p2 = pnand %p729_p0, %p138_p1 }
   0x5   : > { %v206_v0 = vld [vmem:[%s1088_s1] sm:$0xf] (!%p139_p2)  ;;  %vm311_vm0 = vcmask (!%p139_p2), 1043456   ;;  %s730_s16 = sshll.u32 (!%p139_p2), %s725_s13, 5  ;;  %vm214_vm1 = vcmask (!%p139_p2), 31744   ;;  %vm636_vm2 = vcmask (!%p139_p2), 64512  }
   0x6   : > { %142 = sbr.rel (%p139_p2) target bundleno = 268 (0x10c), region = 32  ;;  %803 = vmatprep.subr.msk.mxu0 (!%p139_p2), %vm311_vm0, %v206_v0  ;;  %853 = vmatprep.subr.msk.mxu1 (!%p139_p2), %vm311_vm0, %v206_v0  ;;  %p163_p3 = scmp.lt.s32.totalorder (!%p139_p2), %s730_s16, 63  ;;  %v979_v33 = vld [vmem:[%s1089_s2] ss:$0 sm:$0xff] (!%p139_p2) }
   0x7   : > { %804 = vmatpush3.msk.msra.mxu0 (!%p139_p2), %vm311_vm0, %v206_v0  ;;  %854 = vmatpush3.msk.msra.mxu1 (!%p139_p2), %vm311_vm0, %v206_v0 }
   0xd   : > { %s1092_s16 = smov (!%p163_p3, %s730_s16), 63 }
   0xe   : > { %s731_s17 = sshll.u32 %s1092_s16, 3 }
   0xf   : > { %s910_s20 = scalar_lea.vmem %s1087_s0, %s731_s17  ;;  %s990_s25 = scalar_lea.vmem %s1090_s3, %s731_s17 }
  0x10   : > { %v174_v1 = vld [vmem:[%s910_s20] sm:$0xff]  ;;  %v175_v3 = vld [vmem:[%s910_s20 + $0x8] sm:$0xff]  ;;  %v176_v5 = vld [vmem:[%s910_s20 + $0x10] sm:$0xff] }
  0x11   : > { %v190_v2 = vld [vmem:[%s910_s20 + $0x80] sm:$0xff]  ;;  %805 = vmatprep.mubr.msk.f32.mxu0 %vm214_vm1, %v174_v1  ;;  %v191_v4 = vld [vmem:[%s910_s20 + $0x88] sm:$0xff]  ;;  %v192_v6 = vld [vmem:[%s910_s20 + $0x90] sm:$0xff] }
  0x12   : > { %829 = vmatprep.mubr.msk.f32.mxu1 %vm214_vm1, %v190_v2  ;;  %806 = vmatmul.mubr.msk.f32.vlgmr.msra.gmra.mrb[0].mxu0 %vm214_vm1, %v175_v3  ;;  %v177_v7 = vld [vmem:[%s910_s20 + $0x18] sm:$0xff]  ;;  %v178_v9 = vld [vmem:[%s910_s20 + $0x20] sm:$0xff]  ;;  %v179_v11 = vld [vmem:[%s910_s20 + $0x28] sm:$0xff] }
  0x13   : > { %830 = vmatmul.mubr.msk.f32.vlgmr.msra.gmra.mrb[0].mxu1 %vm214_vm1, %v191_v4  ;;  %808 = vmatprep.mubr.msk.f32.mxu0 %vm214_vm1, %v176_v5  ;;  %v193_v8 = vld [vmem:[%s910_s20 + $0x98] sm:$0xff]  ;;  %v194_v10 = vld [vmem:[%s910_s20 + $0xa0] sm:$0xff]  ;;  %v195_v12 = vld [vmem:[%s910_s20 + $0xa8] sm:$0xff] }
  0x14   : > { %832 = vmatprep.mubr.msk.f32.mxu1 %vm214_vm1, %v192_v6  ;;  %v180_v13 = vld [vmem:[%s910_s20 + $0x30] sm:$0xff]  ;;  %v181_v15 = vld [vmem:[%s910_s20 + $0x38] sm:$0xff]  ;;  %v182_v17 = vld [vmem:[%s910_s20 + $0x40] sm:$0xff] }
  0x15   : > { %v196_v14 = vld [vmem:[%s910_s20 + $0xb0] sm:$0xff]  ;;  %v197_v16 = vld [vmem:[%s910_s20 + $0xb8] sm:$0xff]  ;;  %v198_v18 = vld [vmem:[%s910_s20 + $0xc0] sm:$0xff] }
  0x16   : > { %809 = vmatmul.mubr.msk.f32.gmra.mrb[2].mxu0 %vm214_vm1, %v177_v7  ;;  %v183_v19 = vld [vmem:[%s910_s20 + $0x48] sm:$0xff]  ;;  %v184_v21 = vld [vmem:[%s910_s20 + $0x50] sm:$0xff]  ;;  %v185_v23 = vld [vmem:[%s910_s20 + $0x58] sm:$0xff] }
  0x17   : > { %833 = vmatmul.mubr.msk.f32.gmra.mrb[2].mxu1 %vm214_vm1, %v193_v8  ;;  %811 = vmatprep.mubr.msk.f32.mxu0 %vm214_vm1, %v178_v9  ;;  %v199_v20 = vld [vmem:[%s910_s20 + $0xc8] sm:$0xff]  ;;  %v200_v22 = vld [vmem:[%s910_s20 + $0xd0] sm:$0xff]  ;;  %v201_v24 = vld [vmem:[%s910_s20 + $0xd8] sm:$0xff] }
  0x18   : > { %835 = vmatprep.mubr.msk.f32.mxu1 %vm214_vm1, %v194_v10  ;;  %v186_v25 = vld [vmem:[%s910_s20 + $0x60] sm:$0xff]  ;;  %v187_v27 = vld [vmem:[%s910_s20 + $0x68] sm:$0xff]  ;;  %v188_v29 = vld [vmem:[%s910_s20 + $0x70] sm:$0xff] }
  0x19   : > { %v202_v26 = vld [vmem:[%s910_s20 + $0xe0] sm:$0xff]  ;;  %v203_v28 = vld [vmem:[%s910_s20 + $0xe8] sm:$0xff]  ;;  %v204_v30 = vld [vmem:[%s910_s20 + $0xf0] sm:$0xff] }
  0x1a   : > { %812 = vmatmul.mubr.msk.f32.gmra.mrb[4].mxu0 %vm214_vm1, %v179_v11  ;;  %v189_v31 = vld [vmem:[%s910_s20 + $0x78] sm:$0xff] }
  0x1b   : > { %836 = vmatmul.mubr.msk.f32.gmra.mrb[4].mxu1 %vm214_vm1, %v195_v12  ;;  %814 = vmatprep.mubr.msk.f32.mxu0 %vm214_vm1, %v180_v13  ;;  %v205_v32 = vld [vmem:[%s910_s20 + $0xf8] sm:$0xff] }
  0x1c   : > { %838 = vmatprep.mubr.msk.f32.mxu1 %vm214_vm1, %v196_v14 }
  0x1e   : > { %815 = vmatmul.mubr.msk.f32.gmra.mrb[6].mxu0 %vm214_vm1, %v181_v15 }
  0x1f   : > { %839 = vmatmul.mubr.msk.f32.gmra.mrb[6].mxu1 %vm214_vm1, %v197_v16  ;;  %817 = vmatprep.mubr.msk.f32.mxu0 %vm214_vm1, %v182_v17 }
  0x20   : > { %841 = vmatprep.mubr.msk.f32.mxu1 %vm214_vm1, %v198_v18 }
  0x22   : > { %818 = vmatmul.mubr.msk.f32.gmra.mrb[8].mxu0 %vm214_vm1, %v183_v19 }
  0x23   : > { %842 = vmatmul.mubr.msk.f32.gmra.mrb[8].mxu1 %vm214_vm1, %v199_v20  ;;  %820 = vmatprep.mubr.msk.f32.mxu0 %vm214_vm1, %v184_v21 }
  0x24   : > { %844 = vmatprep.mubr.msk.f32.mxu1 %vm214_vm1, %v200_v22 }
  0x26   : > { %821 = vmatmul.mubr.msk.f32.gmra.mrb[10].mxu0 %vm214_vm1, %v185_v23 }
  0x27   : > { %845 = vmatmul.mubr.msk.f32.gmra.mrb[10].mxu1 %vm214_vm1, %v201_v24  ;;  %823 = vmatprep.mubr.msk.f32.mxu0 %vm214_vm1, %v186_v25 }
  0x28   : > { %847 = vmatprep.mubr.msk.f32.mxu1 %vm214_vm1, %v202_v26 }
  0x2a   : > { %824 = vmatmul.mubr.msk.f32.gmra.mrb[12].mxu0 %vm214_vm1, %v187_v27 }
  0x2b   : > { %848 = vmatmul.mubr.msk.f32.gmra.mrb[12].mxu1 %vm214_vm1, %v203_v28  ;;  %826 = vmatprep.mubr.msk.f32.mxu0 %vm214_vm1, %v188_v29 }
  0x2c   : > { %850 = vmatprep.mubr.msk.f32.mxu1 %vm214_vm1, %v204_v30 }
  0x2e   : > { %827 = vmatmul.mubr.msk.f32.gmra.mrb[14].mxu0 %vm214_vm1, %v189_v31 }
  0x2f   : > { %851 = vmatmul.mubr.msk.f32.gmra.mrb[14].mxu1 %vm214_vm1, %v205_v32 }
  0xe5   : > { %v807_v34 = vpop.f32.mrb[0].mxu0 }
  0xe6   : > { %v831_v35 = vpop.f32.mrb[0].mxu1  ;;  %v387_v36 = vadd.f32 %v807_v34, %v979_v33  ;;  %v381_v38 = vpop.f32.mrb[1].mxu0 }
  0xe7   : > { %v467_v37 = vadd.f32 %v831_v35, %v979_v33  ;;  %v461_v39 = vpop.f32.mrb[1].mxu1  ;;  %v382_v40 = vadd.f32 %v979_v33, %v381_v38 }
  0xe8   : > { %v462_v41 = vadd.f32 %v979_v33, %v461_v39  ;;  %vm541_vm3 = vcmp.ge.f32.partialorder %v387_v36, 0.0  ;;  %v573_v42 = vmul.f32 0.2, %v387_v36 }
  0xe9   : > { %vm557_vm4 = vcmp.ge.f32.partialorder %v467_v37, 0.0  ;;  %v589_v43 = vmul.f32 0.2, %v467_v37  ;;  %vm540_vm5 = vcmp.ge.f32.partialorder %v382_v40, 0.0  ;;  %v572_v44 = vmul.f32 0.2, %v382_v40 }
  0xea   : > { %vm556_vm6 = vcmp.ge.f32.partialorder %v462_v41, 0.0  ;;  %v588_v45 = vmul.f32 0.2, %v462_v41  ;;  %v605_v46 = vsel %vm541_vm3, %v387_v36, %v573_v42  ;;  %v810_v48 = vpop.f32.mrb[2].mxu0  ;;  %v834_v49 = vpop.f32.mrb[2].mxu1 }
  0xeb   : > { %v621_v47 = vsel %vm557_vm4, %v467_v37, %v589_v43  ;;  %638 = vst.msk [vmem:[%s990_s25 + $0x8] sm:$0xff] %vm636_vm2, %v605_v46  ;;  %v604_v50 = vsel %vm540_vm5, %v382_v40, %v572_v44  ;;  %v397_v52 = vadd.f32 %v810_v48, %v979_v33  ;;  %v477_v53 = vadd.f32 %v834_v49, %v979_v33  ;;  %v391_v54 = vpop.f32.mrb[3].mxu0  ;;  %v471_v55 = vpop.f32.mrb[3].mxu1 }
  0xec   : > { %654 = vst.msk [vmem:[%s990_s25 + $0x88] sm:$0xff] %vm636_vm2, %v621_v47  ;;  %v620_v51 = vsel %vm556_vm6, %v462_v41, %v588_v45  ;;  %637 = vst.msk [vmem:[%s990_s25] sm:$0xff] %vm636_vm2, %v604_v50  ;;  %v392_v56 = vadd.f32 %v979_v33, %v391_v54  ;;  %v472_v57 = vadd.f32 %v979_v33, %v471_v55 }
  0xed   : > { %653 = vst.msk [vmem:[%s990_s25 + $0x80] sm:$0xff] %vm636_vm2, %v620_v51  ;;  %vm543_vm7 = vcmp.ge.f32.partialorder %v397_v52, 0.0  ;;  %v575_v58 = vmul.f32 0.2, %v397_v52  ;;  %vm559_vm8 = vcmp.ge.f32.partialorder %v477_v53, 0.0  ;;  %v813_v0 = vpop.f32.mrb[4].mxu0 }
  0xee   : > { %v591_v59 = vmul.f32 0.2, %v477_v53  ;;  %vm542_vm9 = vcmp.ge.f32.partialorder %v392_v56, 0.0  ;;  %v574_v60 = vmul.f32 0.2, %v392_v56  ;;  %vm558_vm10 = vcmp.ge.f32.partialorder %v472_v57, 0.0 }
  0xef   : > { %v590_v61 = vmul.f32 0.2, %v472_v57  ;;  %v607_v62 = vsel %vm543_vm7, %v397_v52, %v575_v58  ;;  %v837_v1 = vpop.f32.mrb[4].mxu1  ;;  %v407_v4 = vadd.f32 %v813_v0, %v979_v33  ;;  %v401_v6 = vpop.f32.mrb[5].mxu0 }
  0xf0   : > { %v623_v63 = vsel %vm559_vm8, %v477_v53, %v591_v59  ;;  %640 = vst.msk [vmem:[%s990_s25 + $0x18] sm:$0xff] %vm636_vm2, %v607_v62  ;;  %v606_v2 = vsel %vm542_vm9, %v392_v56, %v574_v60  ;;  %v487_v5 = vadd.f32 %v837_v1, %v979_v33  ;;  %v481_v7 = vpop.f32.mrb[5].mxu1  ;;  %v402_v8 = vadd.f32 %v979_v33, %v401_v6 }
  0xf1   : > { %656 = vst.msk [vmem:[%s990_s25 + $0x98] sm:$0xff] %vm636_vm2, %v623_v63  ;;  %v622_v3 = vsel %vm558_vm10, %v472_v57, %v590_v61  ;;  %639 = vst.msk [vmem:[%s990_s25 + $0x10] sm:$0xff] %vm636_vm2, %v606_v2  ;;  %v482_v9 = vadd.f32 %v979_v33, %v481_v7  ;;  %v816_v10 = vpop.f32.mrb[6].mxu0  ;;  %vm545_vm11 = vcmp.ge.f32.partialorder %v407_v4, 0.0  ;;  %v577_v12 = vmul.f32 0.2, %v407_v4 }
  0xf2   : > { %655 = vst.msk [vmem:[%s990_s25 + $0x90] sm:$0xff] %vm636_vm2, %v622_v3  ;;  %v840_v11 = vpop.f32.mrb[6].mxu1  ;;  %vm561_vm12 = vcmp.ge.f32.partialorder %v487_v5, 0.0  ;;  %v593_v13 = vmul.f32 0.2, %v487_v5  ;;  %vm544_vm13 = vcmp.ge.f32.partialorder %v402_v8, 0.0  ;;  %v417_v18 = vadd.f32 %v816_v10, %v979_v33 }
  0xf3   : > { %v576_v14 = vmul.f32 0.2, %v402_v8  ;;  %vm560_vm14 = vcmp.ge.f32.partialorder %v482_v9, 0.0  ;;  %v592_v15 = vmul.f32 0.2, %v482_v9  ;;  %v609_v16 = vsel %vm545_vm11, %v407_v4, %v577_v12  ;;  %v411_v20 = vpop.f32.mrb[7].mxu0 }
  0xf4   : > { %v625_v17 = vsel %vm561_vm12, %v487_v5, %v593_v13  ;;  %v497_v19 = vadd.f32 %v840_v11, %v979_v33  ;;  %v491_v21 = vpop.f32.mrb[7].mxu1  ;;  %642 = vst.msk [vmem:[%s990_s25 + $0x28] sm:$0xff] %vm636_vm2, %v609_v16  ;;  %v412_v24 = vadd.f32 %v979_v33, %v411_v20  ;;  %vm547_vm15 = vcmp.ge.f32.partialorder %v417_v18, 0.0 }
  0xf5   : > { %658 = vst.msk [vmem:[%s990_s25 + $0xa8] sm:$0xff] %vm636_vm2, %v625_v17  ;;  %v608_v22 = vsel %vm544_vm13, %v402_v8, %v576_v14  ;;  %v624_v23 = vsel %vm560_vm14, %v482_v9, %v592_v15  ;;  %v492_v25 = vadd.f32 %v979_v33, %v491_v21  ;;  %v819_v26 = vpop.f32.mrb[8].mxu0  ;;  %v579_v28 = vmul.f32 0.2, %v417_v18 }
  0xf6   : > { %v843_v27 = vpop.f32.mrb[8].mxu1  ;;  %641 = vst.msk [vmem:[%s990_s25 + $0x20] sm:$0xff] %vm636_vm2, %v608_v22  ;;  %657 = vst.msk [vmem:[%s990_s25 + $0xa0] sm:$0xff] %vm636_vm2, %v624_v23  ;;  %vm563_vm0 = vcmp.ge.f32.partialorder %v497_v19, 0.0  ;;  %v595_v29 = vmul.f32 0.2, %v497_v19  ;;  %v427_v35 = vadd.f32 %v819_v26, %v979_v33 }
  0xf7   : > { %vm546_vm1 = vcmp.ge.f32.partialorder %v412_v24, 0.0  ;;  %v578_v30 = vmul.f32 0.2, %v412_v24  ;;  %vm562_vm3 = vcmp.ge.f32.partialorder %v492_v25, 0.0  ;;  %v594_v31 = vmul.f32 0.2, %v492_v25 }
  0xf8   : > { %v611_v32 = vsel %vm547_vm15, %v417_v18, %v579_v28  ;;  %v627_v34 = vsel %vm563_vm0, %v497_v19, %v595_v29  ;;  %v507_v36 = vadd.f32 %v843_v27, %v979_v33  ;;  %v421_v37 = vpop.f32.mrb[9].mxu0  ;;  %v501_v38 = vpop.f32.mrb[9].mxu1  ;;  %vm549_vm4 = vcmp.ge.f32.partialorder %v427_v35, 0.0 }
  0xf9   : > { %644 = vst.msk [vmem:[%s990_s25 + $0x38] sm:$0xff] %vm636_vm2, %v611_v32  ;;  %660 = vst.msk [vmem:[%s990_s25 + $0xb8] sm:$0xff] %vm636_vm2, %v627_v34  ;;  %v610_v39 = vsel %vm546_vm1, %v412_v24, %v578_v30  ;;  %v626_v40 = vsel %vm562_vm3, %v492_v25, %v594_v31  ;;  %v422_v41 = vadd.f32 %v979_v33, %v421_v37  ;;  %v822_v43 = vpop.f32.mrb[10].mxu0  ;;  %v581_v45 = vmul.f32 0.2, %v427_v35 }
  0xfa   : > { %v502_v42 = vadd.f32 %v979_v33, %v501_v38  ;;  %v846_v44 = vpop.f32.mrb[10].mxu1  ;;  %643 = vst.msk [vmem:[%s990_s25 + $0x30] sm:$0xff] %vm636_vm2, %v610_v39  ;;  %659 = vst.msk [vmem:[%s990_s25 + $0xb0] sm:$0xff] %vm636_vm2, %v626_v40  ;;  %vm565_vm5 = vcmp.ge.f32.partialorder %v507_v36, 0.0  ;;  %v597_v46 = vmul.f32 0.2, %v507_v36  ;;  %v437_v51 = vadd.f32 %v822_v43, %v979_v33 }
  0xfb   : > { %vm548_vm6 = vcmp.ge.f32.partialorder %v422_v41, 0.0  ;;  %v580_v47 = vmul.f32 0.2, %v422_v41  ;;  %v613_v49 = vsel %vm549_vm4, %v427_v35, %v581_v45  ;;  %v517_v52 = vadd.f32 %v846_v44, %v979_v33  ;;  %v431_v53 = vpop.f32.mrb[11].mxu0  ;;  %v511_v54 = vpop.f32.mrb[11].mxu1 }
  0xfc   : > { %vm564_vm7 = vcmp.ge.f32.partialorder %v502_v42, 0.0  ;;  %v596_v48 = vmul.f32 0.2, %v502_v42  ;;  %v629_v50 = vsel %vm565_vm5, %v507_v36, %v597_v46  ;;  %646 = vst.msk [vmem:[%s990_s25 + $0x48] sm:$0xff] %vm636_vm2, %v613_v49  ;;  %v432_v57 = vadd.f32 %v979_v33, %v431_v53 }
  0xfd   : > { %662 = vst.msk [vmem:[%s990_s25 + $0xc8] sm:$0xff] %vm636_vm2, %v629_v50  ;;  %v612_v55 = vsel %vm548_vm6, %v422_v41, %v580_v47  ;;  %v512_v58 = vadd.f32 %v979_v33, %v511_v54  ;;  %v825_v59 = vpop.f32.mrb[12].mxu0  ;;  %vm551_vm8 = vcmp.ge.f32.partialorder %v437_v51, 0.0  ;;  %v583_v61 = vmul.f32 0.2, %v437_v51 }
  0xfe   : > { %v628_v56 = vsel %vm564_vm7, %v502_v42, %v596_v48  ;;  %v849_v60 = vpop.f32.mrb[12].mxu1  ;;  %645 = vst.msk [vmem:[%s990_s25 + $0x40] sm:$0xff] %vm636_vm2, %v612_v55  ;;  %vm567_vm9 = vcmp.ge.f32.partialorder %v517_v52, 0.0  ;;  %v599_v62 = vmul.f32 0.2, %v517_v52  ;;  %vm550_vm10 = vcmp.ge.f32.partialorder %v432_v57, 0.0 }
  0xff   : > { %661 = vst.msk [vmem:[%s990_s25 + $0xc0] sm:$0xff] %vm636_vm2, %v628_v56  ;;  %v582_v63 = vmul.f32 0.2, %v432_v57  ;;  %vm566_vm11 = vcmp.ge.f32.partialorder %v512_v58, 0.0  ;;  %v598_v0 = vmul.f32 0.2, %v512_v58  ;;  %v615_v1 = vsel %vm551_vm8, %v437_v51, %v583_v61 }
 0x100   : > { %v631_v2 = vsel %vm567_vm9, %v517_v52, %v599_v62  ;;  %v447_v3 = vadd.f32 %v825_v59, %v979_v33  ;;  %v527_v4 = vadd.f32 %v849_v60, %v979_v33  ;;  %v441_v5 = vpop.f32.mrb[13].mxu0  ;;  %v521_v6 = vpop.f32.mrb[13].mxu1  ;;  %648 = vst.msk [vmem:[%s990_s25 + $0x58] sm:$0xff] %vm636_vm2, %v615_v1 }
 0x101   : > { %664 = vst.msk [vmem:[%s990_s25 + $0xd8] sm:$0xff] %vm636_vm2, %v631_v2  ;;  %v614_v7 = vsel %vm550_vm10, %v432_v57, %v582_v63  ;;  %v630_v8 = vsel %vm566_vm11, %v512_v58, %v598_v0  ;;  %v442_v9 = vadd.f32 %v979_v33, %v441_v5  ;;  %v522_v10 = vadd.f32 %v979_v33, %v521_v6  ;;  %v828_v11 = vpop.f32.mrb[14].mxu0 }
 0x102   : > { %v852_v12 = vpop.f32.mrb[14].mxu1  ;;  %647 = vst.msk [vmem:[%s990_s25 + $0x50] sm:$0xff] %vm636_vm2, %v614_v7  ;;  %663 = vst.msk [vmem:[%s990_s25 + $0xd0] sm:$0xff] %vm636_vm2, %v630_v8  ;;  %vm553_vm12 = vcmp.ge.f32.partialorder %v447_v3, 0.0  ;;  %v585_v13 = vmul.f32 0.2, %v447_v3  ;;  %v457_v19 = vadd.f32 %v828_v11, %v979_v33 }
 0x103   : > { %vm569_vm13 = vcmp.ge.f32.partialorder %v527_v4, 0.0  ;;  %v601_v14 = vmul.f32 0.2, %v527_v4  ;;  %vm552_vm14 = vcmp.ge.f32.partialorder %v442_v9, 0.0  ;;  %v584_v15 = vmul.f32 0.2, %v442_v9 }
 0x104   : > { %vm568_vm15 = vcmp.ge.f32.partialorder %v522_v10, 0.0  ;;  %v600_v16 = vmul.f32 0.2, %v522_v10  ;;  %v617_v17 = vsel %vm553_vm12, %v447_v3, %v585_v13  ;;  %v537_v20 = vadd.f32 %v852_v12, %v979_v33  ;;  %v451_v21 = vpop.f32.mrb[15].mxu0  ;;  %v531_v22 = vpop.f32.mrb[15].mxu1 }
 0x105   : > { %v633_v18 = vsel %vm569_vm13, %v527_v4, %v601_v14  ;;  %650 = vst.msk [vmem:[%s990_s25 + $0x68] sm:$0xff] %vm636_vm2, %v617_v17  ;;  %v616_v23 = vsel %vm552_vm14, %v442_v9, %v584_v15  ;;  %v452_v25 = vadd.f32 %v979_v33, %v451_v21  ;;  %v532_v26 = vadd.f32 %v979_v33, %v531_v22 }
 0x106   : > { %666 = vst.msk [vmem:[%s990_s25 + $0xe8] sm:$0xff] %vm636_vm2, %v633_v18  ;;  %v632_v24 = vsel %vm568_vm15, %v522_v10, %v600_v16  ;;  %649 = vst.msk [vmem:[%s990_s25 + $0x60] sm:$0xff] %vm636_vm2, %v616_v23  ;;  %vm555_vm0 = vcmp.ge.f32.partialorder %v457_v19, 0.0  ;;  %v587_v27 = vmul.f32 0.2, %v457_v19  ;;  %vm571_vm1 = vcmp.ge.f32.partialorder %v537_v20, 0.0 }
 0x107   : > { %665 = vst.msk [vmem:[%s990_s25 + $0xe0] sm:$0xff] %vm636_vm2, %v632_v24  ;;  %v603_v28 = vmul.f32 0.2, %v537_v20  ;;  %vm554_vm3 = vcmp.ge.f32.partialorder %v452_v25, 0.0  ;;  %v586_v29 = vmul.f32 0.2, %v452_v25 }
 0x108   : > { %vm570_vm4 = vcmp.ge.f32.partialorder %v532_v26, 0.0  ;;  %v602_v30 = vmul.f32 0.2, %v532_v26  ;;  %v619_v31 = vsel %vm555_vm0, %v457_v19, %v587_v27 }
 0x109   : > { %v635_v32 = vsel %vm571_vm1, %v537_v20, %v603_v28  ;;  %652 = vst.msk [vmem:[%s990_s25 + $0x78] sm:$0xff] %vm636_vm2, %v619_v31  ;;  %v618_v33 = vsel %vm554_vm3, %v452_v25, %v586_v29 }
 0x10a   : > { %668 = vst.msk [vmem:[%s990_s25 + $0xf8] sm:$0xff] %vm636_vm2, %v635_v32  ;;  %v634_v34 = vsel %vm570_vm4, %v532_v26, %v602_v30  ;;  %651 = vst.msk [vmem:[%s990_s25 + $0x70] sm:$0xff] %vm636_vm2, %v618_v33 }
 0x10b   : > { %667 = vst.msk [vmem:[%s990_s25 + $0xf0] sm:$0xff] %vm636_vm2, %v634_v34 }
 0x10c PF: > { %s13_s12 = sadd.s32 1, %s869_s12  }
 0x10d   : > { %p10_p4 = scmp.ge.s32.totalorder %s13_s12, 4  }
 0x10f   :  { %12 = sbr.rel (!%p10_p4) target bundleno = 1 (0x1), region = 62 }

// kernel: discriminator_block_forward.4
= control target key start
LH: loop header
LB: loop body
LE: loop exit
PB: predicated region body
PF: predicated region fallthrough
CT: control target
= control target key end

     0   :  { %s1469_s12 = smov 0   ;;  %s2126_s0 = inlined_call_operand.vmem [shape: f32[2,18,18,4], index: 0, kind: input, shape index: {}]   ;;  %s2127_s1 = inlined_call_operand.vmem [shape: f32[9,4], index: 1, kind: input, shape index: {}]   ;;  %s2128_s2 = inlined_call_operand.vmem [shape: f32[1,4], index: 2, kind: input, shape index: {}]   ;;  %s2129_s3 = inlined_call_operand.vmem [shape: f32[2,16,16,4], index: 3, kind: output, shape index: {}]  }
   0x1 LB: > { %s1209_s13 = sadd.s32 4294967295, %s1447_s12   ;;  %p1213_p0 = scmp.ge.s32.totalorder %s1447_s12, 1  ;;  %s1447_s12 = sphi %s1469_s12, %s13_s12  }
   0x2   : > { %p137_p1 = scmp.lt.s32.totalorder %s1447_s12, 3 }
   0x4   : > { %p138_p2 = pnand %p1213_p0, %p137_p1 }
   0x5   : > { %p161_p3 = scmp.lt.s32.totalorder (!%p138_p2), %s1209_s13, 1  ;;  %v1483_v0 = vld [vmem:[%s2127_s1] ss:$0 sm:$0xff] (!%p138_p2)  ;;  %v1488_v1 = vld [vmem:[%s2127_s1 + $0x1] ss:$0 sm:$0xff] (!%p138_p2)  ;;  %vm1121_vm0 = vcmask (!%p138_p2), 31744  }
   0x6   : > { %141 = sbr.rel (%p138_p2) target bundleno = 173 (0xad), region = 32  ;;  %v1493_v2 = vld [vmem:[%s2127_s1 + $0x2] ss:$0 sm:$0xff] (!%p138_p2)  ;;  %v1503_v3 = vld [vmem:[%s2127_s1 + $0x3] ss:$0 sm:$0xff] (!%p138_p2) }
   0x7   : > { %v1508_v4 = vld [vmem:[%s2127_s1 + $0x4] ss:$0 sm:$0xff] (!%p138_p2)  ;;  %v1513_v5 = vld [vmem:[%s2127_s1 + $0x5] ss:$0 sm:$0xff] (!%p138_p2)  ;;  %v1526_v14 = vld [vmem:[%s2127_s1 + $0x6] ss:$0 sm:$0xff] (!%p138_p2) }
   0x8   : > { %v1533_v17 = vld [vmem:[%s2127_s1 + $0x7] ss:$0 sm:$0xff] (!%p138_p2)  ;;  %v1538_v18 = vld [vmem:[%s2127_s1 + $0x8] ss:$0 sm:$0xff] (!%p138_p2) }
   0xd   : > { %s2131_s13 = smov (!%p161_p3, %s1209_s13), 1 }
   0xe   : > { %s1422_s14 = smul.u32 432, %s2131_s13  ;;  %s1421_s9 = sshll.u32 %s2131_s13, 8 }
   0xf   : > { %s1628_s15 = scalar_lea.vmem %s2129_s3, %s1421_s9 }
  0x10   : > { %s1498_s23 = scalar_lea.vmem %s2126_s0, %s1422_s14 }
  0x11   : > { %v171_v6 = vld [vmem:[%s1498_s23] sm:$0xff]  ;;  %v1220_v12 = vld [vmem:[%s1498_s23 + $0x18] sm:$0xff]  ;;  %v172_v22 = vld [vmem:[%s1498_s23 + $0x8] sm:$0xff] }
  0x12   : > { %v272_v7 = vld [vmem:[%s1498_s23 + $0x1] sm:$0xff]  ;;  %v208_v9 = vmul.f32 %v1483_v0, %v171_v6  ;;  %v1253_v13 = vld [vmem:[%s1498_s23 + $0x19] sm:$0xff]  ;;  %v512_v15 = vmul.f32 %v1503_v3, %v1220_v12  ;;  %v273_v23 = vld [vmem:[%s1498_s23 + $0x9] sm:$0xff]  ;;  %v210_v25 = vmul.f32 %v1220_v12, %v1483_v0  ;;  %v209_v29 = vmul.f32 %v1483_v0, %v172_v22 }
  0x13   : > { %v373_v8 = vld [vmem:[%s1498_s23 + $0x2] sm:$0xff]  ;;  %v309_v10 = vmul.f32 %v1488_v1, %v272_v7  ;;  %v1286_v16 = vld [vmem:[%s1498_s23 + $0x1a] sm:$0xff]  ;;  %v613_v20 = vmul.f32 %v1508_v4, %v1253_v13  ;;  %v374_v24 = vld [vmem:[%s1498_s23 + $0xa] sm:$0xff]  ;;  %v310_v30 = vmul.f32 %v1488_v1, %v273_v23  ;;  %v311_v32 = vmul.f32 %v1253_v13, %v1488_v1 }
  0x14   : > { %v410_v11 = vmul.f32 %v1493_v2, %v373_v8  ;;  %v714_v21 = vmul.f32 %v1513_v5, %v1286_v16  ;;  %v1319_v26 = vld [vmem:[%s1498_s23 + $0x30] sm:$0xff]  ;;  %v411_v31 = vmul.f32 %v1493_v2, %v374_v24  ;;  %v1221_v37 = vld [vmem:[%s1498_s23 + $0x20] sm:$0xff]  ;;  %v1563_v45 = vld [vmem:[%s1498_s23 + $0x38] sm:$0xff]  ;;  %v412_v49 = vmul.f32 %v1286_v16, %v1493_v2 }
  0x15   : > { %v341_v19 = vadd.f32 %v309_v10, %v208_v9  ;;  %v1352_v27 = vld [vmem:[%s1498_s23 + $0x31] sm:$0xff]  ;;  %v816_v34 = vmul.f32 %v1526_v14, %v1319_v26  ;;  %v1254_v38 = vld [vmem:[%s1498_s23 + $0x21] sm:$0xff]  ;;  %v342_v40 = vadd.f32 %v310_v30, %v209_v29  ;;  %v513_v41 = vmul.f32 %v1503_v3, %v1221_v37  ;;  %v1566_v46 = vld [vmem:[%s1498_s23 + $0x39] sm:$0xff] }
  0x16   : > { %v1385_v28 = vld [vmem:[%s1498_s23 + $0x32] sm:$0xff]  ;;  %v917_v35 = vmul.f32 %v1533_v17, %v1352_v27  ;;  %v1287_v39 = vld [vmem:[%s1498_s23 + $0x22] sm:$0xff]  ;;  %v614_v42 = vmul.f32 %v1508_v4, %v1254_v38  ;;  %v1569_v47 = vld [vmem:[%s1498_s23 + $0x3a] sm:$0xff]  ;;  %v343_v48 = vadd.f32 %v311_v32, %v210_v25  ;;  %v514_v50 = vmul.f32 %v1319_v26, %v1503_v3 }
  0x17   : > { %v442_v33 = vadd.f32 %v410_v11, %v341_v19  ;;  %v1018_v36 = vmul.f32 %v1538_v18, %v1385_v28  ;;  %v715_v43 = vmul.f32 %v1513_v5, %v1287_v39  ;;  %v443_v51 = vadd.f32 %v411_v31, %v342_v40  ;;  %v1582_v60 = vld [vmem:[%s1498_s23 + $0x48] sm:$0xff]  ;;  %v1606_v25 = vld [vmem:[%s1498_s23 + $0x50] sm:$0xff] }
  0x18   : > { %v817_v52 = vmul.f32 %v1526_v14, %v1563_v45  ;;  %v918_v53 = vmul.f32 %v1533_v17, %v1566_v46  ;;  %v1019_v54 = vmul.f32 %v1538_v18, %v1569_v47  ;;  %v444_v56 = vadd.f32 %v412_v49, %v343_v48  ;;  %v1585_v61 = vld [vmem:[%s1498_s23 + $0x49] sm:$0xff]  ;;  %v1355_v40 = vld [vmem:[%s1498_s23 + $0x51] sm:$0xff] }
  0x19   : > { %v544_v44 = vadd.f32 %v512_v15, %v442_v33  ;;  %v615_v57 = vmul.f32 %v1352_v27, %v1508_v4  ;;  %v716_v58 = vmul.f32 %v1385_v28, %v1513_v5  ;;  %v545_v59 = vadd.f32 %v513_v41, %v443_v51  ;;  %v1595_v11 = vld [vmem:[%s1498_s23 + $0x4a] sm:$0xff]  ;;  %v1388_v41 = vld [vmem:[%s1498_s23 + $0x52] sm:$0xff] }
  0x1a   : > { %v211_v62 = vmul.f32 %v1221_v37, %v1483_v0  ;;  %v312_v63 = vmul.f32 %v1254_v38, %v1488_v1  ;;  %v413_v6 = vmul.f32 %v1287_v39, %v1493_v2  ;;  %v546_v8 = vadd.f32 %v514_v50, %v444_v56  ;;  %v1617_v37 = vld [vmem:[%s2128_s2] ss:$0 sm:$0xff] }
  0x1b   : > { %v645_v55 = vadd.f32 %v613_v20, %v544_v44  ;;  %v818_v9 = vmul.f32 %v1526_v14, %v1582_v60  ;;  %v919_v10 = vmul.f32 %v1533_v17, %v1585_v61  ;;  %v646_v12 = vadd.f32 %v614_v42, %v545_v59 }
  0x1c   : > { %v1020_v13 = vmul.f32 %v1538_v18, %v1595_v11  ;;  %v344_v15 = vadd.f32 %v312_v63, %v211_v62  ;;  %v515_v16 = vmul.f32 %v1563_v45, %v1503_v3  ;;  %v647_v20 = vadd.f32 %v615_v57, %v546_v8 }
  0x1d   : > { %v746_v7 = vadd.f32 %v714_v21, %v645_v55  ;;  %v616_v21 = vmul.f32 %v1566_v46, %v1508_v4  ;;  %v717_v22 = vmul.f32 %v1569_v47, %v1513_v5  ;;  %v747_v23 = vadd.f32 %v715_v43, %v646_v12 }
  0x1e   : > { %v445_v24 = vadd.f32 %v413_v6, %v344_v15  ;;  %v212_v29 = vmul.f32 %v1319_v26, %v1483_v0  ;;  %v313_v30 = vmul.f32 %v1352_v27, %v1488_v1  ;;  %v748_v32 = vadd.f32 %v716_v58, %v647_v20 }
  0x1f   : > { %v848_v19 = vadd.f32 %v816_v34, %v746_v7  ;;  %v819_v33 = vmul.f32 %v1526_v14, %v1606_v25  ;;  %v414_v34 = vmul.f32 %v1385_v28, %v1493_v2  ;;  %v849_v38 = vadd.f32 %v817_v52, %v747_v23 }
  0x20   : > { %v547_v39 = vadd.f32 %v515_v16, %v445_v24  ;;  %v345_v26 = vadd.f32 %v313_v30, %v212_v29  ;;  %v516_v27 = vmul.f32 %v1582_v60, %v1503_v3  ;;  %v850_v42 = vadd.f32 %v818_v9, %v748_v32  ;;  %v1356_v9 = vld [vmem:[%s1498_s23 + $0x61] sm:$0xff] }
  0x21   : > { %v949_v31 = vadd.f32 %v917_v35, %v848_v19  ;;  %v920_v43 = vmul.f32 %v1533_v17, %v1355_v40  ;;  %v1021_v28 = vmul.f32 %v1538_v18, %v1388_v41  ;;  %v950_v44 = vadd.f32 %v918_v53, %v849_v38  ;;  %v1323_v53 = vld [vmem:[%s1498_s23 + $0x60] sm:$0xff]  ;;  %v1324_v32 = vld [vmem:[%s1498_s23 + $0x68] sm:$0xff] }
  0x22   : > { %v648_v48 = vadd.f32 %v616_v21, %v547_v39  ;;  %v446_v49 = vadd.f32 %v414_v34, %v345_v26  ;;  %v617_v50 = vmul.f32 %v1585_v61, %v1508_v4  ;;  %v951_v51 = vadd.f32 %v919_v10, %v850_v42  ;;  %v1389_v16 = vld [vmem:[%s1498_s23 + $0x62] sm:$0xff] }
  0x23   : > { %v1050_v35 = vadd.f32 %v1018_v36, %v949_v31  ;;  %v718_v52 = vmul.f32 %v1595_v11, %v1513_v5  ;;  %v213_v55 = vmul.f32 %v1563_v45, %v1483_v0  ;;  %v1051_v56 = vadd.f32 %v1019_v54, %v950_v44 }
  0x24   : > { %v749_v57 = vadd.f32 %v717_v22, %v648_v48  ;;  %v548_v58 = vadd.f32 %v516_v27, %v446_v49  ;;  %v314_v59 = vmul.f32 %v1566_v46, %v1488_v1  ;;  %v1052_v62 = vadd.f32 %v1020_v13, %v951_v51  ;;  %v1390_v27 = vld [vmem:[%s1498_s23 + $0x6a] sm:$0xff] }
  0x25   : > { %v1089_v36 = vadd.f32 %v1617_v37, %v1050_v35  ;;  %v820_v63 = vmul.f32 %v1526_v14, %v1323_v53  ;;  %v415_v6 = vmul.f32 %v1569_v47, %v1493_v2  ;;  %v517_v45 = vmul.f32 %v1606_v25, %v1503_v3 }
  0x26   : > { %v1090_v54 = vadd.f32 %v1617_v37, %v1051_v56  ;;  %v851_v7 = vadd.f32 %v819_v33, %v749_v57  ;;  %v649_v8 = vadd.f32 %v617_v50, %v548_v58  ;;  %v346_v10 = vadd.f32 %v314_v59, %v213_v55  ;;  %v1358_v59 = vld [vmem:[%s1498_s23 + $0x79] sm:$0xff] }
  0x27   : > { %1122 = vst.msk [vmem:[%s1628_s15] sm:$0xff] %vm1121_vm0, %v1089_v36  ;;  %v1091_v46 = vadd.f32 %v1617_v37, %v1052_v62  ;;  %v921_v12 = vmul.f32 %v1533_v17, %v1356_v9  ;;  %v618_v19 = vmul.f32 %v1355_v40, %v1508_v4  ;;  %v1022_v20 = vmul.f32 %v1538_v18, %v1389_v16 }
  0x28   : > { %1123 = vst.msk [vmem:[%s1628_s15 + $0x8] sm:$0xff] %vm1121_vm0, %v1090_v54  ;;  %v952_v13 = vadd.f32 %v920_v43, %v851_v7  ;;  %v750_v15 = vadd.f32 %v718_v52, %v649_v8  ;;  %v447_v47 = vadd.f32 %v415_v6, %v346_v10  ;;  %v214_v21 = vmul.f32 %v1582_v60, %v1483_v0  ;;  %v1325_v52 = vld [vmem:[%s1498_s23 + $0x78] sm:$0xff] }
  0x29   : > { %1124 = vst.msk [vmem:[%s1628_s15 + $0x10] sm:$0xff] %vm1121_vm0, %v1091_v46  ;;  %v315_v22 = vmul.f32 %v1585_v61, %v1488_v1  ;;  %v416_v23 = vmul.f32 %v1595_v11, %v1493_v2  ;;  %v719_v31 = vmul.f32 %v1388_v41, %v1513_v5  ;;  %v821_v33 = vmul.f32 %v1526_v14, %v1324_v32  ;;  %v1357_v11 = vld [vmem:[%s1498_s23 + $0x69] sm:$0xff]  ;;  %v1391_v46 = vld [vmem:[%s1498_s23 + $0x7a] sm:$0xff] }
  0x2a   : > { %v1053_v24 = vadd.f32 %v1021_v28, %v952_v13  ;;  %v852_v29 = vadd.f32 %v820_v63, %v750_v15  ;;  %v549_v30 = vadd.f32 %v517_v45, %v447_v47  ;;  %v518_v38 = vmul.f32 %v1323_v53, %v1503_v3  ;;  %v1326_v13 = vld [vmem:[%s1498_s23 + $0x80] sm:$0xff] }
  0x2b   : > { %v347_v34 = vadd.f32 %v315_v22, %v214_v21  ;;  %v619_v26 = vmul.f32 %v1356_v9, %v1508_v4  ;;  %v215_v42 = vmul.f32 %v1606_v25, %v1483_v0  ;;  %v316_v43 = vmul.f32 %v1355_v40, %v1488_v1 }
  0x2c   : > { %v1092_v60 = vadd.f32 %v1617_v37, %v1053_v24  ;;  %v953_v39 = vadd.f32 %v921_v12, %v852_v29  ;;  %v650_v61 = vadd.f32 %v618_v19, %v549_v30  ;;  %v417_v28 = vmul.f32 %v1388_v41, %v1493_v2 }
  0x2d   : > { %v448_v35 = vadd.f32 %v416_v23, %v347_v34  ;;  %v922_v49 = vmul.f32 %v1533_v17, %v1357_v11  ;;  %v1023_v50 = vmul.f32 %v1538_v18, %v1390_v27  ;;  %v720_v51 = vmul.f32 %v1389_v16, %v1513_v5 }
  0x2e   : > { %1125 = vst.msk [vmem:[%s1628_s15 + $0x18] sm:$0xff] %vm1121_vm0, %v1092_v60  ;;  %v1054_v44 = vadd.f32 %v1022_v20, %v953_v39  ;;  %v751_v48 = vadd.f32 %v719_v31, %v650_v61  ;;  %v348_v55 = vadd.f32 %v316_v43, %v215_v42  ;;  %v519_v25 = vmul.f32 %v1324_v32, %v1503_v3  ;;  %v1392_v60 = vld [vmem:[%s1498_s23 + $0x82] sm:$0xff] }
  0x2f   : > { %v550_v36 = vadd.f32 %v518_v38, %v448_v35  ;;  %v822_v56 = vmul.f32 %v1526_v14, %v1325_v52  ;;  %v620_v57 = vmul.f32 %v1357_v11, %v1508_v4  ;;  %v216_v63 = vmul.f32 %v1323_v53, %v1483_v0 }
  0x30   : > { %v1093_v40 = vadd.f32 %v1617_v37, %v1054_v44  ;;  %v853_v41 = vadd.f32 %v821_v33, %v751_v48  ;;  %v449_v62 = vadd.f32 %v417_v28, %v348_v55  ;;  %v317_v6 = vmul.f32 %v1356_v9, %v1488_v1  ;;  %v1360_v48 = vld [vmem:[%s1498_s23 + $0x91] sm:$0xff] }
  0x31   : > { %v651_v58 = vadd.f32 %v619_v26, %v550_v36  ;;  %v923_v54 = vmul.f32 %v1533_v17, %v1358_v59  ;;  %v721_v7 = vmul.f32 %v1390_v27, %v1513_v5  ;;  %v418_v8 = vmul.f32 %v1389_v16, %v1493_v2  ;;  %v1359_v16 = vld [vmem:[%s1498_s23 + $0x81] sm:$0xff]  ;;  %v1327_v26 = vld [vmem:[%s1498_s23 + $0x90] sm:$0xff] }
  0x32   : > { %1126 = vst.msk [vmem:[%s1628_s15 + $0x20] sm:$0xff] %vm1121_vm0, %v1093_v40  ;;  %v954_v45 = vadd.f32 %v922_v49, %v853_v41  ;;  %v551_v12 = vadd.f32 %v519_v25, %v449_v62  ;;  %v349_v15 = vadd.f32 %v317_v6, %v216_v63  ;;  %v520_v47 = vmul.f32 %v1325_v52, %v1503_v3  ;;  %v1328_v62 = vld [vmem:[%s1498_s23 + $0x98] sm:$0xff] }
  0x33   : > { %v752_v10 = vadd.f32 %v720_v51, %v651_v58  ;;  %v1024_v9 = vmul.f32 %v1538_v18, %v1391_v46  ;;  %v823_v19 = vmul.f32 %v1526_v14, %v1326_v13  ;;  %v621_v20 = vmul.f32 %v1358_v59, %v1508_v4 }
  0x34   : > { %v1055_v53 = vadd.f32 %v1023_v50, %v954_v45  ;;  %v652_v22 = vadd.f32 %v620_v57, %v551_v12  ;;  %v450_v23 = vadd.f32 %v418_v8, %v349_v15  ;;  %v217_v24 = vmul.f32 %v1324_v32, %v1483_v0 }
  0x35   : > { %v854_v21 = vadd.f32 %v822_v56, %v752_v10  ;;  %v924_v30 = vmul.f32 %v1533_v17, %v1359_v16  ;;  %v318_v31 = vmul.f32 %v1357_v11, %v1488_v1  ;;  %v419_v33 = vmul.f32 %v1390_v27, %v1493_v2  ;;  %v1393_v56 = vld [vmem:[%s1498_s23 + $0x92] sm:$0xff] }
  0x36   : > { %v1094_v29 = vadd.f32 %v1617_v37, %v1055_v53  ;;  %v753_v38 = vadd.f32 %v721_v7, %v652_v22  ;;  %v552_v39 = vadd.f32 %v520_v47, %v450_v23  ;;  %v722_v61 = vmul.f32 %v1391_v46, %v1513_v5  ;;  %v1361_v47 = vld [vmem:[%s1498_s23 + $0x99] sm:$0xff] }
  0x37   : > { %v955_v34 = vadd.f32 %v923_v54, %v854_v21  ;;  %v1025_v32 = vmul.f32 %v1538_v18, %v1392_v60  ;;  %v824_v35 = vmul.f32 %v1526_v14, %v1327_v26  ;;  %v350_v42 = vadd.f32 %v318_v31, %v217_v24  ;;  %v1394_v21 = vld [vmem:[%s1498_s23 + $0x9a] sm:$0xff] }
  0x38   : > { %1127 = vst.msk [vmem:[%s1628_s15 + $0x28] sm:$0xff] %vm1121_vm0, %v1094_v29  ;;  %v521_v11 = vmul.f32 %v1326_v13, %v1503_v3  ;;  %v855_v27 = vadd.f32 %v823_v19, %v753_v38  ;;  %v653_v28 = vadd.f32 %v621_v20, %v552_v39  ;;  %v622_v44 = vmul.f32 %v1359_v16, %v1508_v4  ;;  %v1329_v29 = vld [vmem:[%s1498_s23 + $0xa8] sm:$0xff] }
  0x39   : > { %v1056_v43 = vadd.f32 %v1024_v9, %v955_v34  ;;  %v451_v49 = vadd.f32 %v419_v33, %v350_v42  ;;  %v218_v50 = vmul.f32 %v1325_v52, %v1483_v0  ;;  %v319_v36 = vmul.f32 %v1358_v59, %v1488_v1  ;;  %v1362_v39 = vld [vmem:[%s1498_s23 + $0xa9] sm:$0xff] }
  0x3a   : > { %v420_v51 = vmul.f32 %v1391_v46, %v1493_v2  ;;  %v956_v25 = vadd.f32 %v924_v30, %v855_v27  ;;  %v754_v40 = vadd.f32 %v722_v61, %v653_v28  ;;  %v925_v41 = vmul.f32 %v1533_v17, %v1360_v48  ;;  %v1395_v28 = vld [vmem:[%s1498_s23 + $0xaa] sm:$0xff] }
  0x3b   : > { %v1095_v55 = vadd.f32 %v1617_v37, %v1056_v43  ;;  %v553_v57 = vadd.f32 %v521_v11, %v451_v49  ;;  %v723_v58 = vmul.f32 %v1392_v60, %v1513_v5  ;;  %v351_v63 = vadd.f32 %v319_v36, %v218_v50  ;;  %v1330_v50 = vld [vmem:[%s1498_s23 + $0xb0] sm:$0xff] }
  0x3c   : > { %v522_v6 = vmul.f32 %v1327_v26, %v1503_v3  ;;  %v1057_v52 = vadd.f32 %v1025_v32, %v956_v25  ;;  %v856_v59 = vadd.f32 %v824_v35, %v754_v40  ;;  %v1026_v45 = vmul.f32 %v1538_v18, %v1393_v56 }
  0x3d   : > { %1128 = vst.msk [vmem:[%s1628_s15 + $0x30] sm:$0xff] %vm1121_vm0, %v1095_v55  ;;  %v825_v54 = vmul.f32 %v1526_v14, %v1328_v62  ;;  %v654_v7 = vadd.f32 %v622_v44, %v553_v57  ;;  %v452_v8 = vadd.f32 %v420_v51, %v351_v63  ;;  %v623_v10 = vmul.f32 %v1360_v48, %v1508_v4 }
  0x3e   : > { %v219_v46 = vmul.f32 %v1326_v13, %v1483_v0  ;;  %v1096_v12 = vadd.f32 %v1617_v37, %v1057_v52  ;;  %v957_v15 = vadd.f32 %v925_v41, %v856_v59  ;;  %v320_v53 = vmul.f32 %v1359_v16, %v1488_v1 }
  0x3f   : > { %v421_v9 = vmul.f32 %v1392_v60, %v1493_v2  ;;  %v755_v19 = vadd.f32 %v723_v58, %v654_v7  ;;  %v926_v20 = vmul.f32 %v1533_v17, %v1361_v47  ;;  %v554_v22 = vadd.f32 %v522_v6, %v452_v8  ;;  %v1363_v6 = vld [vmem:[%s1498_s23 + $0xb1] sm:$0xff] }
  0x40   : > { %v724_v23 = vmul.f32 %v1393_v56, %v1513_v5  ;;  %1129 = vst.msk [vmem:[%s1628_s15 + $0x38] sm:$0xff] %vm1121_vm0, %v1096_v12  ;;  %v1058_v24 = vadd.f32 %v1026_v45, %v957_v15  ;;  %v1027_v13 = vmul.f32 %v1538_v18, %v1394_v21  ;;  %v352_v30 = vadd.f32 %v320_v53, %v219_v46  ;;  %v1396_v7 = vld [vmem:[%s1498_s23 + $0xb2] sm:$0xff]  ;;  %v1331_v12 = vld [vmem:[%s1498_s23 + $0xc0] sm:$0xff] }
  0x41   : > { %v523_v16 = vmul.f32 %v1328_v62, %v1503_v3  ;;  %v857_v31 = vadd.f32 %v825_v54, %v755_v19  ;;  %v655_v33 = vadd.f32 %v623_v10, %v554_v22  ;;  %v826_v34 = vmul.f32 %v1526_v14, %v1329_v29  ;;  %v1364_v22 = vld [vmem:[%s1498_s23 + $0xc1] sm:$0xff] }
  0x42   : > { %v624_v38 = vmul.f32 %v1361_v47, %v1508_v4  ;;  %v1097_v60 = vadd.f32 %v1617_v37, %v1058_v24  ;;  %v453_v61 = vadd.f32 %v421_v9, %v352_v30  ;;  %v220_v32 = vmul.f32 %v1327_v26, %v1483_v0 }
  0x43   : > { %v321_v35 = vmul.f32 %v1360_v48, %v1488_v1  ;;  %v958_v42 = vadd.f32 %v926_v20, %v857_v31  ;;  %v756_v11 = vadd.f32 %v724_v23, %v655_v33  ;;  %v927_v43 = vmul.f32 %v1533_v17, %v1362_v39 }
  0x44   : > { %v422_v27 = vmul.f32 %v1393_v56, %v1493_v2  ;;  %1130 = vst.msk [vmem:[%s1628_s15 + $0x40] sm:$0xff] %vm1121_vm0, %v1097_v60  ;;  %v555_v44 = vadd.f32 %v523_v16, %v453_v61  ;;  %v725_v49 = vmul.f32 %v1394_v21, %v1513_v5  ;;  %v524_v51 = vmul.f32 %v1329_v29, %v1503_v3  ;;  %v1332_v61 = vld [vmem:[%s1498_s23 + $0xc8] sm:$0xff] }
  0x45   : > { %v353_v36 = vadd.f32 %v321_v35, %v220_v32  ;;  %v1059_v26 = vadd.f32 %v1027_v13, %v958_v42  ;;  %v858_v48 = vadd.f32 %v826_v34, %v756_v11  ;;  %v1028_v55 = vmul.f32 %v1538_v18, %v1395_v28  ;;  %v1397_v34 = vld [vmem:[%s1498_s23 + $0xc2] sm:$0xff] }
  0x46   : > { %v827_v25 = vmul.f32 %v1526_v14, %v1330_v50  ;;  %v656_v40 = vadd.f32 %v624_v38, %v555_v44  ;;  %v625_v56 = vmul.f32 %v1362_v39, %v1508_v4  ;;  %v221_v57 = vmul.f32 %v1328_v62, %v1483_v0 }
  0x47   : > { %v454_v41 = vadd.f32 %v422_v27, %v353_v36  ;;  %v1098_v58 = vadd.f32 %v1617_v37, %v1059_v26  ;;  %v959_v63 = vadd.f32 %v927_v43, %v858_v48  ;;  %v322_v52 = vmul.f32 %v1361_v47, %v1488_v1 }
  0x48   : > { %v423_v59 = vmul.f32 %v1394_v21, %v1493_v2  ;;  %v757_v45 = vadd.f32 %v725_v49, %v656_v40  ;;  %v928_v54 = vmul.f32 %v1533_v17, %v1363_v6  ;;  %v726_v10 = vmul.f32 %v1395_v28, %v1513_v5  ;;  %v1398_v40 = vld [vmem:[%s1498_s23 + $0xca] sm:$0xff] }
  0x49   : > { %v556_v8 = vadd.f32 %v524_v51, %v454_v41  ;;  %1131 = vst.msk [vmem:[%s1628_s15 + $0x48] sm:$0xff] %vm1121_vm0, %v1098_v58  ;;  %v1060_v46 = vadd.f32 %v1028_v55, %v959_v63  ;;  %v1029_v62 = vmul.f32 %v1538_v18, %v1396_v7  ;;  %v354_v15 = vadd.f32 %v322_v52, %v221_v57  ;;  %v1365_v51 = vld [vmem:[%s1498_s23 + $0xc9] sm:$0xff]  ;;  %v1333_v58 = vld [vmem:[%s1498_s23 + $0xd8] sm:$0xff] }
  0x4a   : > { %v525_v47 = vmul.f32 %v1330_v50, %v1503_v3  ;;  %v859_v53 = vadd.f32 %v827_v25, %v757_v45  ;;  %v828_v19 = vmul.f32 %v1526_v14, %v1331_v12  ;;  %v626_v20 = vmul.f32 %v1363_v6, %v1508_v4 }
  0x4b   : > { %v657_v9 = vadd.f32 %v625_v56, %v556_v8  ;;  %v1099_v21 = vadd.f32 %v1617_v37, %v1060_v46  ;;  %v455_v23 = vadd.f32 %v423_v59, %v354_v15  ;;  %v222_v24 = vmul.f32 %v1329_v29, %v1483_v0  ;;  %v1366_v8 = vld [vmem:[%s1498_s23 + $0xd9] sm:$0xff] }
  0x4c   : > { %v323_v13 = vmul.f32 %v1362_v39, %v1488_v1  ;;  %v960_v30 = vadd.f32 %v928_v54, %v859_v53  ;;  %v929_v31 = vmul.f32 %v1533_v17, %v1364_v22  ;;  %v424_v33 = vmul.f32 %v1395_v28, %v1493_v2 }
  0x4d   : > { %v758_v16 = vadd.f32 %v726_v10, %v657_v9  ;;  %1132 = vst.msk [vmem:[%s1628_s15 + $0x50] sm:$0xff] %vm1121_vm0, %v1099_v21  ;;  %v557_v38 = vadd.f32 %v525_v47, %v455_v23  ;;  %v727_v60 = vmul.f32 %v1396_v7, %v1513_v5  ;;  %v526_v35 = vmul.f32 %v1331_v12, %v1503_v3  ;;  %v1334_v23 = vld [vmem:[%s1498_s23 + $0xe0] sm:$0xff] }
  0x4e   : > { %v355_v32 = vadd.f32 %v323_v13, %v222_v24  ;;  %v1061_v29 = vadd.f32 %v1029_v62, %v960_v30  ;;  %v1030_v42 = vmul.f32 %v1538_v18, %v1397_v34  ;;  %v829_v11 = vmul.f32 %v1526_v14, %v1332_v61 }
  0x4f   : > { %v860_v39 = vadd.f32 %v828_v19, %v758_v16  ;;  %v658_v43 = vadd.f32 %v626_v20, %v557_v38  ;;  %v627_v28 = vmul.f32 %v1364_v22, %v1508_v4  ;;  %v223_v44 = vmul.f32 %v1330_v50, %v1483_v0  ;;  %v1399_v19 = vld [vmem:[%s1498_s23 + $0xda] sm:$0xff] }
  0x50   : > { %v456_v27 = vadd.f32 %v424_v33, %v355_v32  ;;  %v1100_v49 = vadd.f32 %v1617_v37, %v1061_v29  ;;  %v324_v26 = vmul.f32 %v1363_v6, %v1488_v1  ;;  %v425_v48 = vmul.f32 %v1396_v7, %v1493_v2 }
  0x51   : > { %v961_v36 = vadd.f32 %v929_v31, %v860_v39  ;;  %v759_v55 = vadd.f32 %v727_v60, %v658_v43  ;;  %v930_v25 = vmul.f32 %v1533_v17, %v1365_v51  ;;  %v728_v56 = vmul.f32 %v1397_v34, %v1513_v5  ;;  %v1400_v43 = vld [vmem:[%s1498_s23 + $0xe2] sm:$0xff] }
  0x52   : > { %v558_v41 = vadd.f32 %v526_v35, %v456_v27  ;;  %1133 = vst.msk [vmem:[%s1628_s15 + $0x58] sm:$0xff] %vm1121_vm0, %v1100_v49  ;;  %v1031_v50 = vmul.f32 %v1538_v18, %v1398_v40  ;;  %v356_v63 = vadd.f32 %v324_v26, %v223_v44  ;;  %v527_v6 = vmul.f32 %v1332_v61, %v1503_v3  ;;  %v1367_v35 = vld [vmem:[%s1498_s23 + $0xe1] sm:$0xff]  ;;  %v1335_v49 = vld [vmem:[%s1498_s23 + $0xf0] sm:$0xff] }
  0x53   : > { %v1062_v57 = vadd.f32 %v1030_v42, %v961_v36  ;;  %v861_v52 = vadd.f32 %v829_v11, %v759_v55  ;;  %v830_v45 = vmul.f32 %v1526_v14, %v1333_v58  ;;  %v628_v54 = vmul.f32 %v1365_v51, %v1508_v4 }
  0x54   : > { %v659_v59 = vadd.f32 %v627_v28, %v558_v41  ;;  %v457_v10 = vadd.f32 %v425_v48, %v356_v63  ;;  %v224_v46 = vmul.f32 %v1331_v12, %v1483_v0  ;;  %v325_v62 = vmul.f32 %v1364_v22, %v1488_v1  ;;  %v1368_v41 = vld [vmem:[%s1498_s23 + $0xf1] sm:$0xff] }
  0x55   : > { %v1101_v7 = vadd.f32 %v1617_v37, %v1062_v57  ;;  %v962_v15 = vadd.f32 %v930_v25, %v861_v52  ;;  %v931_v53 = vmul.f32 %v1533_v17, %v1366_v8  ;;  %v426_v9 = vmul.f32 %v1397_v34, %v1493_v2 }
  0x56   : > { %v760_v47 = vadd.f32 %v728_v56, %v659_v59  ;;  %v559_v20 = vadd.f32 %v527_v6, %v457_v10  ;;  %v729_v21 = vmul.f32 %v1398_v40, %v1513_v5  ;;  %v357_v24 = vadd.f32 %v325_v62, %v224_v46  ;;  %v1336_v10 = vld [vmem:[%s1498_s23 + $0xf8] sm:$0xff] }
  0x57   : > { %1134 = vst.msk [vmem:[%s1628_s15 + $0x60] sm:$0xff] %vm1121_vm0, %v1101_v7  ;;  %v528_v13 = vmul.f32 %v1333_v58, %v1503_v3  ;;  %v1063_v12 = vadd.f32 %v1031_v50, %v962_v15  ;;  %v1032_v30 = vmul.f32 %v1538_v18, %v1399_v19  ;;  %v831_v16 = vmul.f32 %v1526_v14, %v1334_v23 }
  0x58   : > { %v862_v22 = vadd.f32 %v830_v45, %v760_v47  ;;  %v660_v31 = vadd.f32 %v628_v54, %v559_v20  ;;  %v458_v33 = vadd.f32 %v426_v9, %v357_v24  ;;  %v629_v34 = vmul.f32 %v1366_v8, %v1508_v4  ;;  %v1401_v45 = vld [vmem:[%s1498_s23 + $0xf2] sm:$0xff] }
  0x59   : > { %v225_v38 = vmul.f32 %v1332_v61, %v1483_v0  ;;  %v1102_v60 = vadd.f32 %v1617_v37, %v1063_v12  ;;  %v326_v29 = vmul.f32 %v1365_v51, %v1488_v1  ;;  %v427_v39 = vmul.f32 %v1398_v40, %v1493_v2 }
  0x5a   : > { %v963_v32 = vadd.f32 %v931_v53, %v862_v22  ;;  %v761_v42 = vadd.f32 %v729_v21, %v660_v31  ;;  %v932_v11 = vmul.f32 %v1533_v17, %v1367_v35  ;;  %v560_v27 = vadd.f32 %v528_v13, %v458_v33  ;;  %v1369_v13 = vld [vmem:[%s1498_s23 + $0xf9] sm:$0xff] }
  0x5b   : > { %v730_v28 = vmul.f32 %v1399_v19, %v1513_v5  ;;  %1135 = vst.msk [vmem:[%s1628_s15 + $0x68] sm:$0xff] %vm1121_vm0, %v1102_v60  ;;  %v1033_v61 = vmul.f32 %v1538_v18, %v1400_v43  ;;  %v358_v36 = vadd.f32 %v326_v29, %v225_v38  ;;  %v529_v51 = vmul.f32 %v1334_v23, %v1503_v3  ;;  %v1402_v31 = vld [vmem:[%s1498_s23 + $0xfa] sm:$0xff]  ;;  %v1337_v60 = vld [vmem:[%s1498_s23 + $0x108] sm:$0xff] }
  0x5c   : > { %v1064_v44 = vadd.f32 %v1032_v30, %v963_v32  ;;  %v863_v26 = vadd.f32 %v831_v16, %v761_v42  ;;  %v661_v48 = vadd.f32 %v629_v34, %v560_v27  ;;  %v832_v55 = vmul.f32 %v1526_v14, %v1335_v49  ;;  %v1370_v27 = vld [vmem:[%s1498_s23 + $0x109] sm:$0xff] }
  0x5d   : > { %v630_v25 = vmul.f32 %v1367_v35, %v1508_v4  ;;  %v459_v56 = vadd.f32 %v427_v39, %v358_v36  ;;  %v226_v57 = vmul.f32 %v1333_v58, %v1483_v0  ;;  %v327_v50 = vmul.f32 %v1366_v8, %v1488_v1 }
  0x5e   : > { %v1103_v40 = vadd.f32 %v1617_v37, %v1064_v44  ;;  %v964_v63 = vadd.f32 %v932_v11, %v863_v26  ;;  %v762_v6 = vadd.f32 %v730_v28, %v661_v48  ;;  %v933_v52 = vmul.f32 %v1533_v17, %v1368_v41 }
  0x5f   : > { %v428_v59 = vmul.f32 %v1399_v19, %v1493_v2  ;;  %v561_v54 = vadd.f32 %v529_v51, %v459_v56  ;;  %v731_v7 = vmul.f32 %v1400_v43, %v1513_v5  ;;  %v359_v46 = vadd.f32 %v327_v50, %v226_v57  ;;  %v1338_v56 = vld [vmem:[%s1498_s23 + $0x110] sm:$0xff] }
  0x60   : > { %1136 = vst.msk [vmem:[%s1628_s15 + $0x70] sm:$0xff] %vm1121_vm0, %v1103_v40  ;;  %v530_v62 = vmul.f32 %v1335_v49, %v1503_v3  ;;  %v1065_v58 = vadd.f32 %v1033_v61, %v964_v63  ;;  %v864_v8 = vadd.f32 %v832_v55, %v762_v6  ;;  %v1034_v15 = vmul.f32 %v1538_v18, %v1401_v45  ;;  %v1403_v55 = vld [vmem:[%s1498_s23 + $0x10a] sm:$0xff] }
  0x61   : > { %v833_v47 = vmul.f32 %v1526_v14, %v1336_v10  ;;  %v662_v53 = vadd.f32 %v630_v25, %v561_v54  ;;  %v460_v9 = vadd.f32 %v428_v59, %v359_v46  ;;  %v631_v19 = vmul.f32 %v1368_v41, %v1508_v4 }
  0x62   : > { %v227_v20 = vmul.f32 %v1334_v23, %v1483_v0  ;;  %v1104_v21 = vadd.f32 %v1617_v37, %v1065_v58  ;;  %v965_v24 = vadd.f32 %v933_v52, %v864_v8  ;;  %v328_v12 = vmul.f32 %v1367_v35, %v1488_v1 }
  0x63   : > { %v429_v22 = vmul.f32 %v1400_v43, %v1493_v2  ;;  %v763_v30 = vadd.f32 %v731_v7, %v662_v53  ;;  %v934_v16 = vmul.f32 %v1533_v17, %v1369_v13  ;;  %v562_v33 = vadd.f32 %v530_v62, %v460_v9  ;;  %v1371_v62 = vld [vmem:[%s1498_s23 + $0x111] sm:$0xff] }
  0x64   : > { %v732_v34 = vmul.f32 %v1401_v45, %v1513_v5  ;;  %1137 = vst.msk [vmem:[%s1628_s15 + $0x78] sm:$0xff] %vm1121_vm0, %v1104_v21  ;;  %v1066_v38 = vadd.f32 %v1034_v15, %v965_v24  ;;  %v1035_v23 = vmul.f32 %v1538_v18, %v1402_v31  ;;  %v360_v32 = vadd.f32 %v328_v12, %v227_v20  ;;  %v1404_v53 = vld [vmem:[%s1498_s23 + $0x112] sm:$0xff]  ;;  %v1339_v21 = vld [vmem:[%s1498_s23 + $0x120] sm:$0xff] }
  0x65   : > { %v531_v35 = vmul.f32 %v1336_v10, %v1503_v3  ;;  %v865_v29 = vadd.f32 %v833_v47, %v763_v30  ;;  %v663_v39 = vadd.f32 %v631_v19, %v562_v33  ;;  %v834_v42 = vmul.f32 %v1526_v14, %v1337_v60  ;;  %v1372_v33 = vld [vmem:[%s1498_s23 + $0x121] sm:$0xff] }
  0x66   : > { %v632_v11 = vmul.f32 %v1369_v13, %v1508_v4  ;;  %v1105_v43 = vadd.f32 %v1617_v37, %v1066_v38  ;;  %v461_v28 = vadd.f32 %v429_v22, %v360_v32  ;;  %v228_v44 = vmul.f32 %v1335_v49, %v1483_v0 }
  0x67   : > { %v329_v61 = vmul.f32 %v1368_v41, %v1488_v1  ;;  %v966_v36 = vadd.f32 %v934_v16, %v865_v29  ;;  %v764_v51 = vadd.f32 %v732_v34, %v663_v39  ;;  %v935_v26 = vmul.f32 %v1533_v17, %v1370_v27 }
  0x68   : > { %v430_v48 = vmul.f32 %v1401_v45, %v1493_v2  ;;  %1138 = vst.msk [vmem:[%s1628_s15 + $0x80] sm:$0xff] %vm1121_vm0, %v1105_v43  ;;  %v563_v25 = vadd.f32 %v531_v35, %v461_v28  ;;  %v733_v40 = vmul.f32 %v1402_v31, %v1513_v5  ;;  %v532_v50 = vmul.f32 %v1337_v60, %v1503_v3  ;;  %v1340_v28 = vld [vmem:[%s1498_s23 + $0x128] sm:$0xff] }
  0x69   : > { %v361_v57 = vadd.f32 %v329_v61, %v228_v44  ;;  %v1067_v49 = vadd.f32 %v1035_v23, %v966_v36  ;;  %v866_v41 = vadd.f32 %v834_v42, %v764_v51  ;;  %v1036_v63 = vmul.f32 %v1538_v18, %v1403_v55  ;;  %v1405_v42 = vld [vmem:[%s1498_s23 + $0x122] sm:$0xff] }
  0x6a   : > { %v835_v6 = vmul.f32 %v1526_v14, %v1338_v56  ;;  %v664_v52 = vadd.f32 %v632_v11, %v563_v25  ;;  %v633_v45 = vmul.f32 %v1370_v27, %v1508_v4  ;;  %v229_v54 = vmul.f32 %v1336_v10, %v1483_v0 }
  0x6b   : > { %v462_v59 = vadd.f32 %v430_v48, %v361_v57  ;;  %v1106_v7 = vadd.f32 %v1617_v37, %v1067_v49  ;;  %v967_v46 = vadd.f32 %v935_v26, %v866_v41  ;;  %v330_v58 = vmul.f32 %v1369_v13, %v1488_v1 }
  0x6c   : > { %v431_v8 = vmul.f32 %v1402_v31, %v1493_v2  ;;  %v765_v15 = vadd.f32 %v733_v40, %v664_v52  ;;  %v936_v47 = vmul.f32 %v1533_v17, %v1371_v62  ;;  %v734_v19 = vmul.f32 %v1403_v55, %v1513_v5 }
  0x6d   : > { %v564_v9 = vadd.f32 %v532_v50, %v462_v59  ;;  %1139 = vst.msk [vmem:[%s1628_s15 + $0x88] sm:$0xff] %vm1121_vm0, %v1106_v7  ;;  %v1068_v20 = vadd.f32 %v1036_v63, %v967_v46  ;;  %v1037_v10 = vmul.f32 %v1538_v18, %v1404_v53  ;;  %v362_v24 = vadd.f32 %v330_v58, %v229_v54  ;;  %v1373_v50 = vld [vmem:[%s1498_s23 + $0x129] sm:$0xff]  ;;  %v1374_v58 = vld [vmem:[%s1498_s23 + $0x139] sm:$0xff] }
  0x6e   : > { %v533_v13 = vmul.f32 %v1338_v56, %v1503_v3  ;;  %v867_v12 = vadd.f32 %v835_v6, %v765_v15  ;;  %v836_v30 = vmul.f32 %v1526_v14, %v1339_v21  ;;  %v634_v16 = vmul.f32 %v1371_v62, %v1508_v4  ;;  %v1406_v6 = vld [vmem:[%s1498_s23 + $0x12a] sm:$0xff]  ;;  %v1943_v15 = vld [vmem:[%s2127_s1] ss:$0 sm:$0xff] }
  0x6f   : > { %v665_v22 = vadd.f32 %v633_v45, %v564_v9  ;;  %v1107_v31 = vadd.f32 %v1617_v37, %v1068_v20  ;;  %v463_v34 = vadd.f32 %v431_v8, %v362_v24  ;;  %v230_v38 = vmul.f32 %v1337_v60, %v1483_v0 }
  0x70   : > { %v331_v23 = vmul.f32 %v1370_v27, %v1488_v1  ;;  %v968_v32 = vadd.f32 %v936_v47, %v867_v12  ;;  %v937_v29 = vmul.f32 %v1533_v17, %v1372_v33  ;;  %v432_v39 = vmul.f32 %v1403_v55, %v1493_v2  ;;  %v1949_v47 = vld [vmem:[%s2127_s1 + $0x1] ss:$0 sm:$0xff]  ;;  %v1965_v12 = vld [vmem:[%s2127_s1 + $0x5] ss:$0 sm:$0xff] }
  0x71   : > { %v766_v35 = vadd.f32 %v734_v19, %v665_v22  ;;  %1140 = vst.msk [vmem:[%s1628_s15 + $0x90] sm:$0xff] %vm1121_vm0, %v1107_v31  ;;  %v565_v11 = vadd.f32 %v533_v13, %v463_v34  ;;  %v735_v43 = vmul.f32 %v1404_v53, %v1513_v5  ;;  %v534_v61 = vmul.f32 %v1339_v21, %v1503_v3  ;;  %v1974_v34 = vld [vmem:[%s2127_s1 + $0x8] ss:$0 sm:$0xff] }
  0x72   : > { %v363_v44 = vadd.f32 %v331_v23, %v230_v38  ;;  %v1069_v60 = vadd.f32 %v1037_v10, %v968_v32  ;;  %v1038_v36 = vmul.f32 %v1538_v18, %v1405_v42  ;;  %v837_v51 = vmul.f32 %v1526_v14, %v1340_v28  ;;  %v1956_v10 = vld [vmem:[%s2127_s1 + $0x2] ss:$0 sm:$0xff]  ;;  %v1980_v23 = vld [vmem:[%s2127_s1 + $0x6] ss:$0 sm:$0xff] }
  0x73   : > { %v868_v27 = vadd.f32 %v836_v30, %v766_v35  ;;  %v666_v26 = vadd.f32 %v634_v16, %v565_v11  ;;  %v635_v55 = vmul.f32 %v1372_v33, %v1508_v4  ;;  %v231_v25 = vmul.f32 %v1338_v56, %v1483_v0  ;;  %v1922_v56 = vld [vmem:[%s1498_s23 + $0x138] sm:$0xff] }
  0x74   : > { %v464_v48 = vadd.f32 %v432_v39, %v363_v44  ;;  %v1108_v40 = vadd.f32 %v1617_v37, %v1069_v60  ;;  %v332_v3 = vmul.f32 %v1371_v62, %v1488_v1  ;;  %v433_v49 = vmul.f32 %v1404_v53, %v1493_v2  ;;  %v1927_v1 = vld [vmem:[%s2127_s1 + $0x3] ss:$0 sm:$0xff] }
  0x75   : > { %v969_v57 = vadd.f32 %v937_v29, %v868_v27  ;;  %v767_v41 = vadd.f32 %v735_v43, %v666_v26  ;;  %v938_v63 = vmul.f32 %v1533_v17, %v1373_v50  ;;  %v736_v59 = vmul.f32 %v1405_v42, %v1513_v5  ;;  %v1375_v44 = vld [vmem:[%s1498_s23 + $0x141] sm:$0xff] }
  0x76   : > { %v566_v52 = vadd.f32 %v534_v61, %v464_v48  ;;  %1141 = vst.msk [vmem:[%s1628_s15 + $0x98] sm:$0xff] %vm1121_vm0, %v1108_v40  ;;  %v1039_v0 = vmul.f32 %v1538_v18, %v1406_v6  ;;  %v364_v45 = vadd.f32 %v332_v3, %v231_v25  ;;  %v535_v2 = vmul.f32 %v1927_v1, %v1340_v28  ;;  %v1935_v18 = vld [vmem:[%s2127_s1 + $0x4] ss:$0 sm:$0xff]  ;;  %v1343_v40 = vld [vmem:[%s1498_s23 + $0x150] sm:$0xff] }
  0x77   : > { %v1070_v4 = vadd.f32 %v1038_v36, %v969_v57  ;;  %v869_v54 = vadd.f32 %v837_v51, %v767_v41  ;;  %v838_v5 = vmul.f32 %v1526_v14, %v1922_v56  ;;  %v636_v46 = vmul.f32 %v1935_v18, %v1373_v50  ;;  %v1992_v36 = vld [vmem:[%s2127_s1 + $0x7] ss:$0 sm:$0xff] }
  0x78   : > { %v667_v7 = vadd.f32 %v635_v55, %v566_v52  ;;  %v465_v8 = vadd.f32 %v433_v49, %v364_v45  ;;  %v232_v14 = vmul.f32 %v1943_v15, %v1339_v21  ;;  %v333_v53 = vmul.f32 %v1949_v47, %v1372_v33  ;;  %v1407_v21 = vld [vmem:[%s1498_s23 + $0x13a] sm:$0xff]  ;;  %v1408_v26 = vld [vmem:[%s1498_s23 + $0x142] sm:$0xff]  ;;  %v1376_v52 = vld [vmem:[%s1498_s23 + $0x151] sm:$0xff] }
  0x79   : > { %v1109_v62 = vadd.f32 %v1617_v37, %v1070_v4  ;;  %v970_v9 = vadd.f32 %v938_v63, %v869_v54  ;;  %v939_v20 = vmul.f32 %v1533_v17, %v1374_v58  ;;  %v434_v24 = vmul.f32 %v1956_v10, %v1405_v42  ;;  %v1342_v17 = vld [vmem:[%s1498_s23 + $0x140] sm:$0xff] }
  0x7a   : > { %v768_v19 = vadd.f32 %v736_v59, %v667_v7  ;;  %v567_v13 = vadd.f32 %v535_v2, %v465_v8  ;;  %v737_v22 = vmul.f32 %v1965_v12, %v1406_v6  ;;  %v365_v30 = vadd.f32 %v333_v53, %v232_v14  ;;  %v1344_v8 = vld [vmem:[%s1498_s23 + $0x158] sm:$0xff] }
  0x7b   : > { %1142 = vst.msk [vmem:[%s1628_s15 + $0xa0] sm:$0xff] %vm1121_vm0, %v1109_v62  ;;  %v536_v16 = vmul.f32 %v1927_v1, %v1922_v56  ;;  %v1071_v31 = vadd.f32 %v1039_v0, %v970_v9  ;;  %v1040_v38 = vmul.f32 %v1974_v34, %v1407_v21  ;;  %v839_v32 = vmul.f32 %v1980_v23, %v1342_v17 }
  0x7c   : > { %v870_v33 = vadd.f32 %v838_v5, %v768_v19  ;;  %v668_v35 = vadd.f32 %v636_v46, %v567_v13  ;;  %v466_v29 = vadd.f32 %v434_v24, %v365_v30  ;;  %v637_v39 = vmul.f32 %v1935_v18, %v1374_v58  ;;  %v1409_v5 = vld [vmem:[%s1498_s23 + $0x152] sm:$0xff] }
  0x7d   : > { %v233_v42 = vmul.f32 %v1943_v15, %v1340_v28  ;;  %v1110_v11 = vadd.f32 %v1617_v37, %v1071_v31  ;;  %v334_v61 = vmul.f32 %v1949_v47, %v1373_v50  ;;  %v435_v60 = vmul.f32 %v1956_v10, %v1406_v6 }
  0x7e   : > { %v971_v43 = vadd.f32 %v939_v20, %v870_v33  ;;  %v769_v27 = vadd.f32 %v737_v22, %v668_v35  ;;  %v940_v51 = vmul.f32 %v1992_v36, %v1375_v44  ;;  %v568_v48 = vadd.f32 %v536_v16, %v466_v29  ;;  %v1377_v16 = vld [vmem:[%s1498_s23 + $0x159] sm:$0xff] }
  0x7f   : > { %v738_v28 = vmul.f32 %v1965_v12, %v1407_v21  ;;  %1143 = vst.msk [vmem:[%s1628_s15 + $0xa8] sm:$0xff] %vm1121_vm0, %v1110_v11  ;;  %v1041_v25 = vmul.f32 %v1974_v34, %v1408_v26  ;;  %v366_v57 = vadd.f32 %v334_v61, %v233_v42  ;;  %v537_v50 = vmul.f32 %v1927_v1, %v1342_v17  ;;  %v1410_v35 = vld [vmem:[%s1498_s23 + $0x15a] sm:$0xff] }
  0x80   : > { %v1072_v55 = vadd.f32 %v1040_v38, %v971_v43  ;;  %v871_v3 = vadd.f32 %v839_v32, %v769_v27  ;;  %v669_v49 = vadd.f32 %v637_v39, %v568_v48  ;;  %v840_v41 = vmul.f32 %v1980_v23, %v1343_v40  ;;  %v1378_v48 = vld [vmem:[%s1498_s23 + $0x169] sm:$0xff] }
  0x81   : > { %v638_v63 = vmul.f32 %v1935_v18, %v1375_v44  ;;  %v467_v59 = vadd.f32 %v435_v60, %v366_v57  ;;  %v234_v4 = vmul.f32 %v1943_v15, %v1922_v56  ;;  %v335_v0 = vmul.f32 %v1949_v47, %v1374_v58 }
  0x82   : > { %v1111_v6 = vadd.f32 %v1617_v37, %v1072_v55  ;;  %v972_v45 = vadd.f32 %v940_v51, %v871_v3  ;;  %v770_v2 = vadd.f32 %v738_v28, %v669_v49  ;;  %v941_v54 = vmul.f32 %v1992_v36, %v1376_v52  ;;  %v2038_v51 = vld [vmem:[%s2128_s2] ss:$0 sm:$0xff] }
  0x83   : > { %v436_v7 = vmul.f32 %v1956_v10, %v1407_v21  ;;  %v569_v46 = vadd.f32 %v537_v50, %v467_v59  ;;  %v739_v62 = vmul.f32 %v1965_v12, %v1408_v26  ;;  %v367_v14 = vadd.f32 %v335_v0, %v234_v4  ;;  %v1346_v59 = vld [vmem:[%s1498_s23 + $0x170] sm:$0xff] }
  0x84   : > { %1144 = vst.msk [vmem:[%s1628_s15 + $0xb0] sm:$0xff] %vm1121_vm0, %v1111_v6  ;;  %v538_v53 = vmul.f32 %v1927_v1, %v1343_v40  ;;  %v1073_v56 = vadd.f32 %v1041_v25, %v972_v45  ;;  %v872_v58 = vadd.f32 %v840_v41, %v770_v2  ;;  %v1042_v9 = vmul.f32 %v1974_v34, %v1409_v5  ;;  %v1411_v41 = vld [vmem:[%s1498_s23 + $0x16a] sm:$0xff] }
  0x85   : > { %v841_v19 = vmul.f32 %v1980_v23, %v1344_v8  ;;  %v670_v20 = vadd.f32 %v638_v63, %v569_v46  ;;  %v468_v24 = vadd.f32 %v436_v7, %v367_v14  ;;  %v639_v21 = vmul.f32 %v1935_v18, %v1376_v52 }
  0x86   : > { %v235_v13 = vmul.f32 %v1943_v15, %v1342_v17  ;;  %v1112_v22 = vadd.f32 %v1617_v37, %v1073_v56  ;;  %v973_v30 = vadd.f32 %v941_v54, %v872_v58  ;;  %v336_v31 = vmul.f32 %v1949_v47, %v1375_v44  ;;  %v1345_v37 = vld [vmem:[%s1498_s23 + $0x168] sm:$0xff] }
  0x87   : > { %v437_v33 = vmul.f32 %v1956_v10, %v1408_v26  ;;  %v771_v38 = vadd.f32 %v739_v62, %v670_v20  ;;  %v942_v32 = vmul.f32 %v1992_v36, %v1377_v16  ;;  %v570_v29 = vadd.f32 %v538_v53, %v468_v24  ;;  %v1379_v53 = vld [vmem:[%s1498_s23 + $0x171] sm:$0xff] }
  0x88   : > { %v740_v39 = vmul.f32 %v1965_v12, %v1409_v5  ;;  %1145 = vst.msk [vmem:[%s1628_s15 + $0xb8] sm:$0xff] %vm1121_vm0, %v1112_v22  ;;  %v1074_v42 = vadd.f32 %v1042_v9, %v973_v30  ;;  %v1043_v17 = vmul.f32 %v1974_v34, %v1410_v35  ;;  %v368_v11 = vadd.f32 %v336_v31, %v235_v13  ;;  %v1412_v20 = vld [vmem:[%s1498_s23 + $0x172] sm:$0xff]  ;;  %v1347_v22 = vld [vmem:[%s1498_s23 + $0x180] sm:$0xff] }
  0x89   : > { %v539_v43 = vmul.f32 %v1927_v1, %v1344_v8  ;;  %v873_v44 = vadd.f32 %v841_v19, %v771_v38  ;;  %v671_v61 = vadd.f32 %v639_v21, %v570_v29  ;;  %v842_v60 = vmul.f32 %v1980_v23, %v1345_v37  ;;  %v1380_v29 = vld [vmem:[%s1498_s23 + $0x181] sm:$0xff] }
  0x8a   : > { %v640_v27 = vmul.f32 %v1935_v18, %v1377_v16  ;;  %v1113_v26 = vadd.f32 %v2038_v51, %v1074_v42  ;;  %v469_v28 = vadd.f32 %v437_v33, %v368_v11  ;;  %v236_v55 = vmul.f32 %v1943_v15, %v1343_v40 }
  0x8b   : > { %v337_v25 = vmul.f32 %v1949_v47, %v1376_v52  ;;  %v974_v57 = vadd.f32 %v942_v32, %v873_v44  ;;  %v772_v50 = vadd.f32 %v740_v39, %v671_v61  ;;  %v943_v3 = vmul.f32 %v1992_v36, %v1378_v48 }
  0x8c   : > { %v438_v49 = vmul.f32 %v1956_v10, %v1409_v5  ;;  %1146 = vst.msk [vmem:[%s1628_s15 + $0xc0] sm:$0xff] %vm1121_vm0, %v1113_v26  ;;  %v571_v63 = vadd.f32 %v539_v43, %v469_v28  ;;  %v741_v6 = vmul.f32 %v1965_v12, %v1410_v35  ;;  %v540_v0 = vmul.f32 %v1927_v1, %v1345_v37  ;;  %v1348_v28 = vld [vmem:[%s1498_s23 + $0x188] sm:$0xff] }
  0x8d   : > { %v369_v4 = vadd.f32 %v337_v25, %v236_v55  ;;  %v1075_v40 = vadd.f32 %v1043_v17, %v974_v57  ;;  %v874_v52 = vadd.f32 %v842_v60, %v772_v50  ;;  %v1044_v45 = vmul.f32 %v1974_v34, %v1411_v41  ;;  %v1413_v60 = vld [vmem:[%s1498_s23 + $0x182] sm:$0xff] }
  0x8e   : > { %v843_v2 = vmul.f32 %v1980_v23, %v1346_v59  ;;  %v672_v54 = vadd.f32 %v640_v27, %v571_v63  ;;  %v641_v5 = vmul.f32 %v1935_v18, %v1378_v48  ;;  %v237_v46 = vmul.f32 %v1943_v15, %v1344_v8 }
  0x8f   : > { %v470_v7 = vadd.f32 %v438_v49, %v369_v4  ;;  %v1114_v62 = vadd.f32 %v2038_v51, %v1075_v40  ;;  %v975_v14 = vadd.f32 %v943_v3, %v874_v52  ;;  %v338_v56 = vmul.f32 %v1949_v47, %v1377_v16  ;;  %v1349_v40 = vld [vmem:[%s1498_s23 + $0x198] sm:$0xff] }
  0x90   : > { %v439_v58 = vmul.f32 %v1956_v10, %v1410_v35  ;;  %v773_v9 = vadd.f32 %v741_v6, %v672_v54  ;;  %v944_v19 = vmul.f32 %v1992_v36, %v1379_v53  ;;  %v742_v21 = vmul.f32 %v1965_v12, %v1411_v41 }
  0x91   : > { %v572_v24 = vadd.f32 %v540_v0, %v470_v7  ;;  %1147 = vst.msk [vmem:[%s1628_s15 + $0xc8] sm:$0xff] %vm1121_vm0, %v1114_v62  ;;  %v1076_v13 = vadd.f32 %v1044_v45, %v975_v14  ;;  %v1045_v8 = vmul.f32 %v1974_v34, %v1412_v20  ;;  %v370_v30 = vadd.f32 %v338_v56, %v237_v46  ;;  %v1381_v0 = vld [vmem:[%s1498_s23 + $0x189] sm:$0xff] }
  0x92   : > { %v541_v16 = vmul.f32 %v1927_v1, %v1346_v59  ;;  %v875_v31 = vadd.f32 %v843_v2, %v773_v9  ;;  %v844_v38 = vmul.f32 %v1980_v23, %v1347_v22  ;;  %v642_v32 = vmul.f32 %v1935_v18, %v1379_v53  ;;  %v1415_v9 = vld [vmem:[%s1498_s23 + $0x19a] sm:$0xff] }
  0x93   : > { %v673_v33 = vadd.f32 %v641_v5, %v572_v24  ;;  %v1115_v35 = vadd.f32 %v2038_v51, %v1076_v13  ;;  %v471_v39 = vadd.f32 %v439_v58, %v370_v30  ;;  %v238_v42 = vmul.f32 %v1943_v15, %v1345_v37 }
  0x94   : > { %v339_v17 = vmul.f32 %v1949_v47, %v1378_v48  ;;  %v976_v11 = vadd.f32 %v944_v19, %v875_v31  ;;  %v945_v44 = vmul.f32 %v1992_v36, %v1380_v29  ;;  %v440_v61 = vmul.f32 %v1956_v10, %v1411_v41 }
  0x95   : > { %v774_v43 = vadd.f32 %v742_v21, %v673_v33  ;;  %1148 = vst.msk [vmem:[%s1628_s15 + $0xd0] sm:$0xff] %vm1121_vm0, %v1115_v35  ;;  %v573_v27 = vadd.f32 %v541_v16, %v471_v39  ;;  %v743_v26 = vmul.f32 %v1965_v12, %v1412_v20  ;;  %v542_v37 = vmul.f32 %v1927_v1, %v1347_v22  ;;  %v1383_v33 = vld [vmem:[%s1498_s23 + $0x1a1] sm:$0xff] }
  0x96   : > { %v371_v55 = vadd.f32 %v339_v17, %v238_v42  ;;  %v1077_v25 = vadd.f32 %v1045_v8, %v976_v11  ;;  %v1046_v57 = vmul.f32 %v1974_v34, %v1413_v60  ;;  %v845_v50 = vmul.f32 %v1980_v23, %v1348_v28 }
  0x97   : > { %v876_v48 = vadd.f32 %v844_v38, %v774_v43  ;;  %v674_v3 = vadd.f32 %v642_v32, %v573_v27  ;;  %v643_v41 = vmul.f32 %v1935_v18, %v1380_v29  ;;  %v239_v63 = vmul.f32 %v1943_v15, %v1346_v59  ;;  %v1414_v15 = vld [vmem:[%s1498_s23 + $0x18a] sm:$0xff]  ;;  %v1382_v59 = vld [vmem:[%s1498_s23 + $0x199] sm:$0xff]  ;;  %v1416_v29 = vld [vmem:[%s1498_s23 + $0x1a2] sm:$0xff] }
  0x98   : > { %v472_v49 = vadd.f32 %v440_v61, %v371_v55  ;;  %v1116_v6 = vadd.f32 %v2038_v51, %v1077_v25  ;;  %v340_v52 = vmul.f32 %v1949_v47, %v1379_v53  ;;  %v441_v45 = vmul.f32 %v1956_v10, %v1412_v20 }
  0x99   : > { %v977_v4 = vadd.f32 %v945_v44, %v876_v48  ;;  %v775_v2 = vadd.f32 %v743_v26, %v674_v3  ;;  %v946_v54 = vmul.f32 %v1992_v36, %v1381_v0  ;;  %v744_v5 = vmul.f32 %v1965_v12, %v1413_v60 }
  0x9a   : > { %v574_v7 = vadd.f32 %v542_v37, %v472_v49  ;;  %1149 = vst.msk [vmem:[%s1628_s15 + $0xd8] sm:$0xff] %vm1121_vm0, %v1116_v6  ;;  %v372_v62 = vadd.f32 %v340_v52, %v239_v63  ;;  %v543_v14 = vmul.f32 %v1927_v1, %v1348_v28  ;;  %v1047_v10 = vmul.f32 %v1974_v34, %v1414_v15  ;;  %v1350_v1 = vld [vmem:[%s1498_s23 + $0x1a0] sm:$0xff] }
  0x9b   : > { %v1078_v46 = vadd.f32 %v1046_v57, %v977_v4  ;;  %v877_v47 = vadd.f32 %v845_v50, %v775_v2  ;;  %v846_v56 = vmul.f32 %v1980_v23, %v1349_v40  ;;  %v644_v20 = vmul.f32 %v1935_v18, %v1381_v0 }
  0x9c   : > { %v675_v53 = vadd.f32 %v643_v41, %v574_v7  ;;  %v473_v19 = vadd.f32 %v441_v45, %v372_v62  ;;  %v947_v13 = vmul.f32 %v1992_v36, %v1382_v59  ;;  %v745_v22 = vmul.f32 %v1965_v12, %v1414_v15 }
  0x9d   : > { %v1117_v58 = vadd.f32 %v2038_v51, %v1078_v46  ;;  %v978_v24 = vadd.f32 %v946_v54, %v877_v47  ;;  %v1048_v31 = vmul.f32 %v1974_v34, %v1415_v9  ;;  %v847_v18 = vmul.f32 %v1980_v23, %v1350_v1 }
  0x9e   : > { %v776_v21 = vadd.f32 %v744_v5, %v675_v53  ;;  %v575_v8 = vadd.f32 %v543_v14, %v473_v19  ;;  %v948_v42 = vmul.f32 %v1992_v36, %v1383_v33  ;;  %v1049_v11 = vmul.f32 %v1974_v34, %v1416_v29 }
  0x9f   : > { %1150 = vst.msk [vmem:[%s1628_s15 + $0xe0] sm:$0xff] %vm1121_vm0, %v1117_v58  ;;  %v1079_v30 = vadd.f32 %v1047_v10, %v978_v24 }
  0xa0   : > { %v878_v16 = vadd.f32 %v846_v56, %v776_v21  ;;  %v676_v38 = vadd.f32 %v644_v20, %v575_v8 }
  0xa1   : > { %v1118_v32 = vadd.f32 %v2038_v51, %v1079_v30 }
  0xa2   : > { %v979_v35 = vadd.f32 %v947_v13, %v878_v16  ;;  %v777_v39 = vadd.f32 %v745_v22, %v676_v38 }
  0xa3   : > { %1151 = vst.msk [vmem:[%s1628_s15 + $0xe8] sm:$0xff] %vm1121_vm0, %v1118_v32 }
  0xa4   : > { %v1080_v12 = vadd.f32 %v1048_v31, %v979_v35  ;;  %v879_v17 = vadd.f32 %v847_v18, %v777_v39 }
  0xa6   : > { %v1119_v43 = vadd.f32 %v2038_v51, %v1080_v12  ;;  %v980_v44 = vadd.f32 %v948_v42, %v879_v17 }
  0xa8   : > { %1152 = vst.msk [vmem:[%s1628_s15 + $0xf0] sm:$0xff] %vm1121_vm0, %v1119_v43  ;;  %v1081_v61 = vadd.f32 %v1049_v11, %v980_v44 }
  0xaa   : > { %v1120_v23 = vadd.f32 %v2038_v51, %v1081_v61 }
  0xac   : > { %1153 = vst.msk [vmem:[%s1628_s15 + $0xf8] sm:$0xff] %vm1121_vm0, %v1120_v23 }
  0xad PF: > { %s13_s12 = sadd.s32 1, %s1447_s12  }
  0xae   : > { %p10_p4 = scmp.ge.s32.totalorder %s13_s12, 4  }
  0xb0   :  { %12 = sbr.rel (!%p10_p4) target bundleno = 1 (0x1), region = 64 }

// kernel: discriminator_block_forward.6
= control target key start
LH: loop header
LB: loop body
LE: loop exit
PB: predicated region body
PF: predicated region fallthrough
CT: control target
= control target key end

     0   :  { %s1469_s12 = smov 0   ;;  %s2126_s0 = inlined_call_operand.vmem [shape: f32[2,18,18,8], index: 0, kind: input, shape index: {}]   ;;  %s2127_s1 = inlined_call_operand.vmem [shape: f32[9,8], index: 1, kind: input, shape index: {}]   ;;  %s2128_s2 = inlined_call_operand.vmem [shape: f32[1,8], index: 2, kind: input, shape index: {}]   ;;  %s2129_s3 = inlined_call_operand.vmem [shape: f32[2,16,16,8], index: 3, kind: output, shape index: {}]  }
   0x1 LB: > { %s1209_s13 = sadd.s32 4294967295, %s1447_s12   ;;  %p1213_p0 = scmp.ge.s32.totalorder %s1447_s12, 1  ;;  %s1447_s12 = sphi %s1469_s12, %s13_s12  }
   0x2   : > { %p137_p1 = scmp.lt.s32.totalorder %s1447_s12, 3 }
   0x4   : > { %p138_p2 = pnand %p1213_p0, %p137_p1 }
   0x5   : > { %p161_p3 = scmp.lt.s32.totalorder (!%p138_p2), %s1209_s13, 1  ;;  %v1483_v0 = vld [vmem:[%s2127_s1] ss:$0 sm:$0xff] (!%p138_p2)  ;;  %v1488_v1 = vld [vmem:[%s2127_s1 + $0x1] ss:$0 sm:$0xff] (!%p138_p2)  ;;  %vm1121_vm0 = vcmask (!%p138_p2), 64512  }
   0x6   : > { %141 = sbr.rel (%p138_p2) target bundleno = 173 (0xad), region = 32  ;;  %v1493_v2 = vld [vmem:[%s2127_s1 + $0x2] ss:$0 sm:$0xff] (!%p138_p2)  ;;  %v1503_v3 = vld [vmem:[%s2127_s1 + $0x3] ss:$0 sm:$0xff] (!%p138_p2) }
   0x7   : > { %v1508_v4 = vld [vmem:[%s2127_s1 + $0x4] ss:$0 sm:$0xff] (!%p138_p2)  ;;  %v1513_v5 = vld [vmem:[%s2127_s1 + $0x5] ss:$0 sm:$0xff] (!%p138_p2)  ;;  %v1526_v14 = vld [vmem:[%s2127_s1 + $0x6] ss:$0 sm:$0xff] (!%p138_p2) }
   0x8   : > { %v1533_v17 = vld [vmem:[%s2127_s1 + $0x7] ss:$0 sm:$0xff] (!%p138_p2)  ;;  %v1538_v18 = vld [vmem:[%s2127_s1 + $0x8] ss:$0 sm:$0xff] (!%p138_p2) }
   0xd   : > { %s2131_s13 = smov (!%p161_p3, %s1209_s13), 1 }
   0xe   : > { %s1422_s14 = smul.u32 432, %s2131_s13  ;;  %s1421_s9 = sshll.u32 %s2131_s13, 8 }
   0xf   : > { %s1628_s15 = scalar_lea.vmem %s2129_s3, %s1421_s9 }
  0x10   : > { %s1498_s23 = scalar_lea.vmem %s2126_s0, %s1422_s14 }
  0x11   : > { %v171_v6 = vld [vmem:[%s1498_s23] sm:$0xff]  ;;  %v1220_v12 = vld [vmem:[%s1498_s23 + $0x18] sm:$0xff]  ;;  %v172_v22 = vld [vmem:[%s1498_s23 + $0x8] sm:$0xff] }
  0x12   : > { %v272_v7 = vld [vmem:[%s1498_s23 + $0x1] sm:$0xff]  ;;  %v208_v9 = vmul.f32 %v1483_v0, %v171_v6  ;;  %v1253_v13 = vld [vmem:[%s1498_s23 + $0x19] sm:$0xff]  ;;  %v512_v15 = vmul.f32 %v1503_v3, %v1220_v12  ;;  %v273_v23 = vld [vmem:[%s1498_s23 + $0x9] sm:$0xff]  ;;  %v210_v25 = vmul.f32 %v1220_v12, %v1483_v0  ;;  %v209_v29 = vmul.f32 %v1483_v0, %v172_v22 }
  0x13   : > { %v373_v8 = vld [vmem:[%s1498_s23 + $0x2] sm:$0xff]  ;;  %v309_v10 = vmul.f32 %v1488_v1, %v272_v7  ;;  %v1286_v16 = vld [vmem:[%s1498_s23 + $0x1a] sm:$0xff]  ;;  %v613_v20 = vmul.f32 %v1508_v4, %v1253_v13  ;;  %v374_v24 = vld [vmem:[%s1498_s23 + $0xa] sm:$0xff]  ;;  %v310_v30 = vmul.f32 %v1488_v1, %v273_v23  ;;  %v311_v32 = vmul.f32 %v1253_v13, %v1488_v1 }
  0x14   : > { %v410_v11 = vmul.f32 %v1493_v2, %v373_v8  ;;  %v714_v21 = vmul.f32 %v1513_v5, %v1286_v16  ;;  %v1319_v26 = vld [vmem:[%s1498_s23 + $0x30] sm:$0xff]  ;;  %v411_v31 = vmul.f32 %v1493_v2, %v374_v24  ;;  %v1221_v37 = vld [vmem:[%s1498_s23 + $0x20] sm:$0xff]  ;;  %v1563_v45 = vld [vmem:[%s1498_s23 + $0x38] sm:$0xff]  ;;  %v412_v49 = vmul.f32 %v1286_v16, %v1493_v2 }
  0x15   : > { %v341_v19 = vadd.f32 %v309_v10, %v208_v9  ;;  %v1352_v27 = vld [vmem:[%s1498_s23 + $0x31] sm:$0xff]  ;;  %v816_v34 = vmul.f32 %v1526_v14, %v1319_v26  ;;  %v1254_v38 = vld [vmem:[%s1498_s23 + $0x21] sm:$0xff]  ;;  %v342_v40 = vadd.f32 %v310_v30, %v209_v29  ;;  %v513_v41 = vmul.f32 %v1503_v3, %v1221_v37  ;;  %v1566_v46 = vld [vmem:[%s1498_s23 + $0x39] sm:$0xff] }
  0x16   : > { %v1385_v28 = vld [vmem:[%s1498_s23 + $0x32] sm:$0xff]  ;;  %v917_v35 = vmul.f32 %v1533_v17, %v1352_v27  ;;  %v1287_v39 = vld [vmem:[%s1498_s23 + $0x22] sm:$0xff]  ;;  %v614_v42 = vmul.f32 %v1508_v4, %v1254_v38  ;;  %v1569_v47 = vld [vmem:[%s1498_s23 + $0x3a] sm:$0xff]  ;;  %v343_v48 = vadd.f32 %v311_v32, %v210_v25  ;;  %v514_v50 = vmul.f32 %v1319_v26, %v1503_v3 }
  0x17   : > { %v442_v33 = vadd.f32 %v410_v11, %v341_v19  ;;  %v1018_v36 = vmul.f32 %v1538_v18, %v1385_v28  ;;  %v715_v43 = vmul.f32 %v1513_v5, %v1287_v39  ;;  %v443_v51 = vadd.f32 %v411_v31, %v342_v40  ;;  %v1582_v60 = vld [vmem:[%s1498_s23 + $0x48] sm:$0xff]  ;;  %v1606_v25 = vld [vmem:[%s1498_s23 + $0x50] sm:$0xff] }
  0x18   : > { %v817_v52 = vmul.f32 %v1526_v14, %v1563_v45  ;;  %v918_v53 = vmul.f32 %v1533_v17, %v1566_v46  ;;  %v1019_v54 = vmul.f32 %v1538_v18, %v1569_v47  ;;  %v444_v56 = vadd.f32 %v412_v49, %v343_v48  ;;  %v1585_v61 = vld [vmem:[%s1498_s23 + $0x49] sm:$0xff]  ;;  %v1355_v40 = vld [vmem:[%s1498_s23 + $0x51] sm:$0xff] }
  0x19   : > { %v544_v44 = vadd.f32 %v512_v15, %v442_v33  ;;  %v615_v57 = vmul.f32 %v1352_v27, %v1508_v4  ;;  %v716_v58 = vmul.f32 %v1385_v28, %v1513_v5  ;;  %v545_v59 = vadd.f32 %v513_v41, %v443_v51  ;;  %v1595_v11 = vld [vmem:[%s1498_s23 + $0x4a] sm:$0xff]  ;;  %v1388_v41 = vld [vmem:[%s1498_s23 + $0x52] sm:$0xff] }
  0x1a   : > { %v211_v62 = vmul.f32 %v1221_v37, %v1483_v0  ;;  %v312_v63 = vmul.f32 %v1254_v38, %v1488_v1  ;;  %v413_v6 = vmul.f32 %v1287_v39, %v1493_v2  ;;  %v546_v8 = vadd.f32 %v514_v50, %v444_v56  ;;  %v1617_v37 = vld [vmem:[%s2128_s2] ss:$0 sm:$0xff] }
  0x1b   : > { %v645_v55 = vadd.f32 %v613_v20, %v544_v44  ;;  %v818_v9 = vmul.f32 %v1526_v14, %v1582_v60  ;;  %v919_v10 = vmul.f32 %v1533_v17, %v1585_v61  ;;  %v646_v12 = vadd.f32 %v614_v42, %v545_v59 }
  0x1c   : > { %v1020_v13 = vmul.f32 %v1538_v18, %v1595_v11  ;;  %v344_v15 = vadd.f32 %v312_v63, %v211_v62  ;;  %v515_v16 = vmul.f32 %v1563_v45, %v1503_v3  ;;  %v647_v20 = vadd.f32 %v615_v57, %v546_v8 }
  0x1d   : > { %v746_v7 = vadd.f32 %v714_v21, %v645_v55  ;;  %v616_v21 = vmul.f32 %v1566_v46, %v1508_v4  ;;  %v717_v22 = vmul.f32 %v1569_v47, %v1513_v5  ;;  %v747_v23 = vadd.f32 %v715_v43, %v646_v12 }
  0x1e   : > { %v445_v24 = vadd.f32 %v413_v6, %v344_v15  ;;  %v212_v29 = vmul.f32 %v1319_v26, %v1483_v0  ;;  %v313_v30 = vmul.f32 %v1352_v27, %v1488_v1  ;;  %v748_v32 = vadd.f32 %v716_v58, %v647_v20 }
  0x1f   : > { %v848_v19 = vadd.f32 %v816_v34, %v746_v7  ;;  %v819_v33 = vmul.f32 %v1526_v14, %v1606_v25  ;;  %v414_v34 = vmul.f32 %v1385_v28, %v1493_v2  ;;  %v849_v38 = vadd.f32 %v817_v52, %v747_v23 }
  0x20   : > { %v547_v39 = vadd.f32 %v515_v16, %v445_v24  ;;  %v345_v26 = vadd.f32 %v313_v30, %v212_v29  ;;  %v516_v27 = vmul.f32 %v1582_v60, %v1503_v3  ;;  %v850_v42 = vadd.f32 %v818_v9, %v748_v32  ;;  %v1356_v9 = vld [vmem:[%s1498_s23 + $0x61] sm:$0xff] }
  0x21   : > { %v949_v31 = vadd.f32 %v917_v35, %v848_v19  ;;  %v920_v43 = vmul.f32 %v1533_v17, %v1355_v40  ;;  %v1021_v28 = vmul.f32 %v1538_v18, %v1388_v41  ;;  %v950_v44 = vadd.f32 %v918_v53, %v849_v38  ;;  %v1323_v53 = vld [vmem:[%s1498_s23 + $0x60] sm:$0xff]  ;;  %v1324_v32 = vld [vmem:[%s1498_s23 + $0x68] sm:$0xff] }
  0x22   : > { %v648_v48 = vadd.f32 %v616_v21, %v547_v39  ;;  %v446_v49 = vadd.f32 %v414_v34, %v345_v26  ;;  %v617_v50 = vmul.f32 %v1585_v61, %v1508_v4  ;;  %v951_v51 = vadd.f32 %v919_v10, %v850_v42  ;;  %v1389_v16 = vld [vmem:[%s1498_s23 + $0x62] sm:$0xff] }
  0x23   : > { %v1050_v35 = vadd.f32 %v1018_v36, %v949_v31  ;;  %v718_v52 = vmul.f32 %v1595_v11, %v1513_v5  ;;  %v213_v55 = vmul.f32 %v1563_v45, %v1483_v0  ;;  %v1051_v56 = vadd.f32 %v1019_v54, %v950_v44 }
  0x24   : > { %v749_v57 = vadd.f32 %v717_v22, %v648_v48  ;;  %v548_v58 = vadd.f32 %v516_v27, %v446_v49  ;;  %v314_v59 = vmul.f32 %v1566_v46, %v1488_v1  ;;  %v1052_v62 = vadd.f32 %v1020_v13, %v951_v51  ;;  %v1390_v27 = vld [vmem:[%s1498_s23 + $0x6a] sm:$0xff] }
  0x25   : > { %v1089_v36 = vadd.f32 %v1617_v37, %v1050_v35  ;;  %v820_v63 = vmul.f32 %v1526_v14, %v1323_v53  ;;  %v415_v6 = vmul.f32 %v1569_v47, %v1493_v2  ;;  %v517_v45 = vmul.f32 %v1606_v25, %v1503_v3 }
  0x26   : > { %v1090_v54 = vadd.f32 %v1617_v37, %v1051_v56  ;;  %v851_v7 = vadd.f32 %v819_v33, %v749_v57  ;;  %v649_v8 = vadd.f32 %v617_v50, %v548_v58  ;;  %v346_v10 = vadd.f32 %v314_v59, %v213_v55  ;;  %v1358_v59 = vld [vmem:[%s1498_s23 + $0x79] sm:$0xff] }
  0x27   : > { %1122 = vst.msk [vmem:[%s1628_s15] sm:$0xff] %vm1121_vm0, %v1089_v36  ;;  %v1091_v46 = vadd.f32 %v1617_v37, %v1052_v62  ;;  %v921_v12 = vmul.f32 %v1533_v17, %v1356_v9  ;;  %v618_v19 = vmul.f32 %v1355_v40, %v1508_v4  ;;  %v1022_v20 = vmul.f32 %v1538_v18, %v1389_v16 }
  0x28   : > { %1123 = vst.msk [vmem:[%s1628_s15 + $0x8] sm:$0xff] %vm1121_vm0, %v1090_v54  ;;  %v952_v13 = vadd.f32 %v920_v43, %v851_v7  ;;  %v750_v15 = vadd.f32 %v718_v52, %v649_v8  ;;  %v447_v47 = vadd.f32 %v415_v6, %v346_v10  ;;  %v214_v21 = vmul.f32 %v1582_v60, %v1483_v0  ;;  %v1325_v52 = vld [vmem:[%s1498_s23 + $0x78] sm:$0xff] }
  0x29   : > { %1124 = vst.msk [vmem:[%s1628_s15 + $0x10] sm:$0xff] %vm1121_vm0, %v1091_v46  ;;  %v315_v22 = vmul.f32 %v1585_v61, %v1488_v1  ;;  %v416_v23 = vmul.f32 %v1595_v11, %v1493_v2  ;;  %v719_v31 = vmul.f32 %v1388_v41, %v1513_v5  ;;  %v821_v33 = vmul.f32 %v1526_v14, %v1324_v32  ;;  %v1357_v11 = vld [vmem:[%s1498_s23 + $0x69] sm:$0xff]  ;;  %v1391_v46 = vld [vmem:[%s1498_s23 + $0x7a] sm:$0xff] }
  0x2a   : > { %v1053_v24 = vadd.f32 %v1021_v28, %v952_v13  ;;  %v852_v29 = vadd.f32 %v820_v63, %v750_v15  ;;  %v549_v30 = vadd.f32 %v517_v45, %v447_v47  ;;  %v518_v38 = vmul.f32 %v1323_v53, %v1503_v3  ;;  %v1326_v13 = vld [vmem:[%s1498_s23 + $0x80] sm:$0xff] }
  0x2b   : > { %v347_v34 = vadd.f32 %v315_v22, %v214_v21  ;;  %v619_v26 = vmul.f32 %v1356_v9, %v1508_v4  ;;  %v215_v42 = vmul.f32 %v1606_v25, %v1483_v0  ;;  %v316_v43 = vmul.f32 %v1355_v40, %v1488_v1 }
  0x2c   : > { %v1092_v60 = vadd.f32 %v1617_v37, %v1053_v24  ;;  %v953_v39 = vadd.f32 %v921_v12, %v852_v29  ;;  %v650_v61 = vadd.f32 %v618_v19, %v549_v30  ;;  %v417_v28 = vmul.f32 %v1388_v41, %v1493_v2 }
  0x2d   : > { %v448_v35 = vadd.f32 %v416_v23, %v347_v34  ;;  %v922_v49 = vmul.f32 %v1533_v17, %v1357_v11  ;;  %v1023_v50 = vmul.f32 %v1538_v18, %v1390_v27  ;;  %v720_v51 = vmul.f32 %v1389_v16, %v1513_v5 }
  0x2e   : > { %1125 = vst.msk [vmem:[%s1628_s15 + $0x18] sm:$0xff] %vm1121_vm0, %v1092_v60  ;;  %v1054_v44 = vadd.f32 %v1022_v20, %v953_v39  ;;  %v751_v48 = vadd.f32 %v719_v31, %v650_v61  ;;  %v348_v55 = vadd.f32 %v316_v43, %v215_v42  ;;  %v519_v25 = vmul.f32 %v1324_v32, %v1503_v3  ;;  %v1392_v60 = vld [vmem:[%s1498_s23 + $0x82] sm:$0xff] }
  0x2f   : > { %v550_v36 = vadd.f32 %v518_v38, %v448_v35  ;;  %v822_v56 = vmul.f32 %v1526_v14, %v1325_v52  ;;  %v620_v57 = vmul.f32 %v1357_v11, %v1508_v4  ;;  %v216_v63 = vmul.f32 %v1323_v53, %v1483_v0 }
  0x30   : > { %v1093_v40 = vadd.f32 %v1617_v37, %v1054_v44  ;;  %v853_v41 = vadd.f32 %v821_v33, %v751_v48  ;;  %v449_v62 = vadd.f32 %v417_v28, %v348_v55  ;;  %v317_v6 = vmul.f32 %v1356_v9, %v1488_v1  ;;  %v1360_v48 = vld [vmem:[%s1498_s23 + $0x91] sm:$0xff] }
  0x31   : > { %v651_v58 = vadd.f32 %v619_v26, %v550_v36  ;;  %v923_v54 = vmul.f32 %v1533_v17, %v1358_v59  ;;  %v721_v7 = vmul.f32 %v1390_v27, %v1513_v5  ;;  %v418_v8 = vmul.f32 %v1389_v16, %v1493_v2  ;;  %v1359_v16 = vld [vmem:[%s1498_s23 + $0x81] sm:$0xff]  ;;  %v1327_v26 = vld [vmem:[%s1498_s23 + $0x90] sm:$0xff] }
  0x32   : > { %1126 = vst.msk [vmem:[%s1628_s15 + $0x20] sm:$0xff] %vm1121_vm0, %v1093_v40  ;;  %v954_v45 = vadd.f32 %v922_v49, %v853_v41  ;;  %v551_v12 = vadd.f32 %v519_v25, %v449_v62  ;;  %v349_v15 = vadd.f32 %v317_v6, %v216_v63  ;;  %v520_v47 = vmul.f32 %v1325_v52, %v1503_v3  ;;  %v1328_v62 = vld [vmem:[%s1498_s23 + $0x98] sm:$0xff] }
  0x33   : > { %v752_v10 = vadd.f32 %v720_v51, %v651_v58  ;;  %v1024_v9 = vmul.f32 %v1538_v18, %v1391_v46  ;;  %v823_v19 = vmul.f32 %v1526_v14, %v1326_v13  ;;  %v621_v20 = vmul.f32 %v1358_v59, %v1508_v4 }
  0x34   : > { %v1055_v53 = vadd.f32 %v1023_v50, %v954_v45  ;;  %v652_v22 = vadd.f32 %v620_v57, %v551_v12  ;;  %v450_v23 = vadd.f32 %v418_v8, %v349_v15  ;;  %v217_v24 = vmul.f32 %v1324_v32, %v1483_v0 }
  0x35   : > { %v854_v21 = vadd.f32 %v822_v56, %v752_v10  ;;  %v924_v30 = vmul.f32 %v1533_v17, %v1359_v16  ;;  %v318_v31 = vmul.f32 %v1357_v11, %v1488_v1  ;;  %v419_v33 = vmul.f32 %v1390_v27, %v1493_v2  ;;  %v1393_v56 = vld [vmem:[%s1498_s23 + $0x92] sm:$0xff] }
  0x36   : > { %v1094_v29 = vadd.f32 %v1617_v37, %v1055_v53  ;;  %v753_v38 = vadd.f32 %v721_v7, %v652_v22  ;;  %v552_v39 = vadd.f32 %v520_v47, %v450_v23  ;;  %v722_v61 = vmul.f32 %v1391_v46, %v1513_v5  ;;  %v1361_v47 = vld [vmem:[%s1498_s23 + $0x99] sm:$0xff] }
  0x37   : > { %v955_v34 = vadd.f32 %v923_v54, %v854_v21  ;;  %v1025_v32 = vmul.f32 %v1538_v18, %v1392_v60  ;;  %v824_v35 = vmul.f32 %v1526_v14, %v1327_v26  ;;  %v350_v42 = vadd.f32 %v318_v31, %v217_v24  ;;  %v1394_v21 = vld [vmem:[%s1498_s23 + $0x9a] sm:$0xff] }
  0x38   : > { %1127 = vst.msk [vmem:[%s1628_s15 + $0x28] sm:$0xff] %vm1121_vm0, %v1094_v29  ;;  %v521_v11 = vmul.f32 %v1326_v13, %v1503_v3  ;;  %v855_v27 = vadd.f32 %v823_v19, %v753_v38  ;;  %v653_v28 = vadd.f32 %v621_v20, %v552_v39  ;;  %v622_v44 = vmul.f32 %v1359_v16, %v1508_v4  ;;  %v1329_v29 = vld [vmem:[%s1498_s23 + $0xa8] sm:$0xff] }
  0x39   : > { %v1056_v43 = vadd.f32 %v1024_v9, %v955_v34  ;;  %v451_v49 = vadd.f32 %v419_v33, %v350_v42  ;;  %v218_v50 = vmul.f32 %v1325_v52, %v1483_v0  ;;  %v319_v36 = vmul.f32 %v1358_v59, %v1488_v1  ;;  %v1362_v39 = vld [vmem:[%s1498_s23 + $0xa9] sm:$0xff] }
  0x3a   : > { %v420_v51 = vmul.f32 %v1391_v46, %v1493_v2  ;;  %v956_v25 = vadd.f32 %v924_v30, %v855_v27  ;;  %v754_v40 = vadd.f32 %v722_v61, %v653_v28  ;;  %v925_v41 = vmul.f32 %v1533_v17, %v1360_v48  ;;  %v1395_v28 = vld [vmem:[%s1498_s23 + $0xaa] sm:$0xff] }
  0x3b   : > { %v1095_v55 = vadd.f32 %v1617_v37, %v1056_v43  ;;  %v553_v57 = vadd.f32 %v521_v11, %v451_v49  ;;  %v723_v58 = vmul.f32 %v1392_v60, %v1513_v5  ;;  %v351_v63 = vadd.f32 %v319_v36, %v218_v50  ;;  %v1330_v50 = vld [vmem:[%s1498_s23 + $0xb0] sm:$0xff] }
  0x3c   : > { %v522_v6 = vmul.f32 %v1327_v26, %v1503_v3  ;;  %v1057_v52 = vadd.f32 %v1025_v32, %v956_v25  ;;  %v856_v59 = vadd.f32 %v824_v35, %v754_v40  ;;  %v1026_v45 = vmul.f32 %v1538_v18, %v1393_v56 }
  0x3d   : > { %1128 = vst.msk [vmem:[%s1628_s15 + $0x30] sm:$0xff] %vm1121_vm0, %v1095_v55  ;;  %v825_v54 = vmul.f32 %v1526_v14, %v1328_v62  ;;  %v654_v7 = vadd.f32 %v622_v44, %v553_v57  ;;  %v452_v8 = vadd.f32 %v420_v51, %v351_v63  ;;  %v623_v10 = vmul.f32 %v1360_v48, %v1508_v4 }
  0x3e   : > { %v219_v46 = vmul.f32 %v1326_v13, %v1483_v0  ;;  %v1096_v12 = vadd.f32 %v1617_v37, %v1057_v52  ;;  %v957_v15 = vadd.f32 %v925_v41, %v856_v59  ;;  %v320_v53 = vmul.f32 %v1359_v16, %v1488_v1 }
  0x3f   : > { %v421_v9 = vmul.f32 %v1392_v60, %v1493_v2  ;;  %v755_v19 = vadd.f32 %v723_v58, %v654_v7  ;;  %v926_v20 = vmul.f32 %v1533_v17, %v1361_v47  ;;  %v554_v22 = vadd.f32 %v522_v6, %v452_v8  ;;  %v1363_v6 = vld [vmem:[%s1498_s23 + $0xb1] sm:$0xff] }
  0x40   : > { %v724_v23 = vmul.f32 %v1393_v56, %v1513_v5  ;;  %1129 = vst.msk [vmem:[%s1628_s15 + $0x38] sm:$0xff] %vm1121_vm0, %v1096_v12  ;;  %v1058_v24 = vadd.f32 %v1026_v45, %v957_v15  ;;  %v1027_v13 = vmul.f32 %v1538_v18, %v1394_v21  ;;  %v352_v30 = vadd.f32 %v320_v53, %v219_v46  ;;  %v1396_v7 = vld [vmem:[%s1498_s23 + $0xb2] sm:$0xff]  ;;  %v1331_v12 = vld [vmem:[%s1498_s23 + $0xc0] sm:$0xff] }
  0x41   : > { %v523_v16 = vmul.f32 %v1328_v62, %v1503_v3  ;;  %v857_v31 = vadd.f32 %v825_v54, %v755_v19  ;;  %v655_v33 = vadd.f32 %v623_v10, %v554_v22  ;;  %v826_v34 = vmul.f32 %v1526_v14, %v1329_v29  ;;  %v1364_v22 = vld [vmem:[%s1498_s23 + $0xc1] sm:$0xff] }
  0x42   : > { %v624_v38 = vmul.f32 %v1361_v47, %v1508_v4  ;;  %v1097_v60 = vadd.f32 %v1617_v37, %v1058_v24  ;;  %v453_v61 = vadd.f32 %v421_v9, %v352_v30  ;;  %v220_v32 = vmul.f32 %v1327_v26, %v1483_v0 }
  0x43   : > { %v321_v35 = vmul.f32 %v1360_v48, %v1488_v1  ;;  %v958_v42 = vadd.f32 %v926_v20, %v857_v31  ;;  %v756_v11 = vadd.f32 %v724_v23, %v655_v33  ;;  %v927_v43 = vmul.f32 %v1533_v17, %v1362_v39 }
  0x44   : > { %v422_v27 = vmul.f32 %v1393_v56, %v1493_v2  ;;  %1130 = vst.msk [vmem:[%s1628_s15 + $0x40] sm:$0xff] %vm1121_vm0, %v1097_v60  ;;  %v555_v44 = vadd.f32 %v523_v16, %v453_v61  ;;  %v725_v49 = vmul.f32 %v1394_v21, %v1513_v5  ;;  %v524_v51 = vmul.f32 %v1329_v29, %v1503_v3  ;;  %v1332_v61 = vld [vmem:[%s1498_s23 + $0xc8] sm:$0xff] }
  0x45   : > { %v353_v36 = vadd.f32 %v321_v35, %v220_v32  ;;  %v1059_v26 = vadd.f32 %v1027_v13, %v958_v42  ;;  %v858_v48 = vadd.f32 %v826_v34, %v756_v11  ;;  %v1028_v55 = vmul.f32 %v1538_v18, %v1395_v28  ;;  %v1397_v34 = vld [vmem:[%s1498_s23 + $0xc2] sm:$0xff] }
  0x46   : > { %v827_v25 = vmul.f32 %v1526_v14, %v1330_v50  ;;  %v656_v40 = vadd.f32 %v624_v38, %v555_v44  ;;  %v625_v56 = vmul.f32 %v1362_v39, %v1508_v4  ;;  %v221_v57 = vmul.f32 %v1328_v62, %v1483_v0 }
  0x47   : > { %v454_v41 = vadd.f32 %v422_v27, %v353_v36  ;;  %v1098_v58 = vadd.f32 %v1617_v37, %v1059_v26  ;;  %v959_v63 = vadd.f32 %v927_v43, %v858_v48  ;;  %v322_v52 = vmul.f32 %v1361_v47, %v1488_v1 }
  0x48   : > { %v423_v59 = vmul.f32 %v1394_v21, %v1493_v2  ;;  %v757_v45 = vadd.f32 %v725_v49, %v656_v40  ;;  %v928_v54 = vmul.f32 %v1533_v17, %v1363_v6  ;;  %v726_v10 = vmul.f32 %v1395_v28, %v1513_v5  ;;  %v1398_v40 = vld [vmem:[%s1498_s23 + $0xca] sm:$0xff] }
  0x49   : > { %v556_v8 = vadd.f32 %v524_v51, %v454_v41  ;;  %1131 = vst.msk [vmem:[%s1628_s15 + $0x48] sm:$0xff] %vm1121_vm0, %v1098_v58  ;;  %v1060_v46 = vadd.f32 %v1028_v55, %v959_v63  ;;  %v1029_v62 = vmul.f32 %v1538_v18, %v1396_v7  ;;  %v354_v15 = vadd.f32 %v322_v52, %v221_v57  ;;  %v1365_v51 = vld [vmem:[%s1498_s23 + $0xc9] sm:$0xff]  ;;  %v1333_v58 = vld [vmem:[%s1498_s23 + $0xd8] sm:$0xff] }
  0x4a   : > { %v525_v47 = vmul.f32 %v1330_v50, %v1503_v3  ;;  %v859_v53 = vadd.f32 %v827_v25, %v757_v45  ;;  %v828_v19 = vmul.f32 %v1526_v14, %v1331_v12  ;;  %v626_v20 = vmul.f32 %v1363_v6, %v1508_v4 }
  0x4b   : > { %v657_v9 = vadd.f32 %v625_v56, %v556_v8  ;;  %v1099_v21 = vadd.f32 %v1617_v37, %v1060_v46  ;;  %v455_v23 = vadd.f32 %v423_v59, %v354_v15  ;;  %v222_v24 = vmul.f32 %v1329_v29, %v1483_v0  ;;  %v1366_v8 = vld [vmem:[%s1498_s23 + $0xd9] sm:$0xff] }
  0x4c   : > { %v323_v13 = vmul.f32 %v1362_v39, %v1488_v1  ;;  %v960_v30 = vadd.f32 %v928_v54, %v859_v53  ;;  %v929_v31 = vmul.f32 %v1533_v17, %v1364_v22  ;;  %v424_v33 = vmul.f32 %v1395_v28, %v1493_v2 }
  0x4d   : > { %v758_v16 = vadd.f32 %v726_v10, %v657_v9  ;;  %1132 = vst.msk [vmem:[%s1628_s15 + $0x50] sm:$0xff] %vm1121_vm0, %v1099_v21  ;;  %v557_v38 = vadd.f32 %v525_v47, %v455_v23  ;;  %v727_v60 = vmul.f32 %v1396_v7, %v1513_v5  ;;  %v526_v35 = vmul.f32 %v1331_v12, %v1503_v3  ;;  %v1334_v23 = vld [vmem:[%s1498_s23 + $0xe0] sm:$0xff] }
  0x4e   : > { %v355_v32 = vadd.f32 %v323_v13, %v222_v24  ;;  %v1061_v29 = vadd.f32 %v1029_v62, %v960_v30  ;;  %v1030_v42 = vmul.f32 %v1538_v18, %v1397_v34  ;;  %v829_v11 = vmul.f32 %v1526_v14, %v1332_v61 }
  0x4f   : > { %v860_v39 = vadd.f32 %v828_v19, %v758_v16  ;;  %v658_v43 = vadd.f32 %v626_v20, %v557_v38  ;;  %v627_v28 = vmul.f32 %v1364_v22, %v1508_v4  ;;  %v223_v44 = vmul.f32 %v1330_v50, %v1483_v0  ;;  %v1399_v19 = vld [vmem:[%s1498_s23 + $0xda] sm:$0xff] }
  0x50   : > { %v456_v27 = vadd.f32 %v424_v33, %v355_v32  ;;  %v1100_v49 = vadd.f32 %v1617_v37, %v1061_v29  ;;  %v324_v26 = vmul.f32 %v1363_v6, %v1488_v1  ;;  %v425_v48 = vmul.f32 %v1396_v7, %v1493_v2 }
  0x51   : > { %v961_v36 = vadd.f32 %v929_v31, %v860_v39  ;;  %v759_v55 = vadd.f32 %v727_v60, %v658_v43  ;;  %v930_v25 = vmul.f32 %v1533_v17, %v1365_v51  ;;  %v728_v56 = vmul.f32 %v1397_v34, %v1513_v5  ;;  %v1400_v43 = vld [vmem:[%s1498_s23 + $0xe2] sm:$0xff] }
  0x52   : > { %v558_v41 = vadd.f32 %v526_v35, %v456_v27  ;;  %1133 = vst.msk [vmem:[%s1628_s15 + $0x58] sm:$0xff] %vm1121_vm0, %v1100_v49  ;;  %v1031_v50 = vmul.f32 %v1538_v18, %v1398_v40  ;;  %v356_v63 = vadd.f32 %v324_v26, %v223_v44  ;;  %v527_v6 = vmul.f32 %v1332_v61, %v1503_v3  ;;  %v1367_v35 = vld [vmem:[%s1498_s23 + $0xe1] sm:$0xff]  ;;  %v1335_v49 = vld [vmem:[%s1498_s23 + $0xf0] sm:$0xff] }
  0x53   : > { %v1062_v57 = vadd.f32 %v1030_v42, %v961_v36  ;;  %v861_v52 = vadd.f32 %v829_v11, %v759_v55  ;;  %v830_v45 = vmul.f32 %v1526_v14, %v1333_v58  ;;  %v628_v54 = vmul.f32 %v1365_v51, %v1508_v4 }
  0x54   : > { %v659_v59 = vadd.f32 %v627_v28, %v558_v41  ;;  %v457_v10 = vadd.f32 %v425_v48, %v356_v63  ;;  %v224_v46 = vmul.f32 %v1331_v12, %v1483_v0  ;;  %v325_v62 = vmul.f32 %v1364_v22, %v1488_v1  ;;  %v1368_v41 = vld [vmem:[%s1498_s23 + $0xf1] sm:$0xff] }
  0x55   : > { %v1101_v7 = vadd.f32 %v1617_v37, %v1062_v57  ;;  %v962_v15 = vadd.f32 %v930_v25, %v861_v52  ;;  %v931_v53 = vmul.f32 %v1533_v17, %v1366_v8  ;;  %v426_v9 = vmul.f32 %v1397_v34, %v1493_v2 }
  0x56   : > { %v760_v47 = vadd.f32 %v728_v56, %v659_v59  ;;  %v559_v20 = vadd.f32 %v527_v6, %v457_v10  ;;  %v729_v21 = vmul.f32 %v1398_v40, %v1513_v5  ;;  %v357_v24 = vadd.f32 %v325_v62, %v224_v46  ;;  %v1336_v10 = vld [vmem:[%s1498_s23 + $0xf8] sm:$0xff] }
  0x57   : > { %1134 = vst.msk [vmem:[%s1628_s15 + $0x60] sm:$0xff] %vm1121_vm0, %v1101_v7  ;;  %v528_v13 = vmul.f32 %v1333_v58, %v1503_v3  ;;  %v1063_v12 = vadd.f32 %v1031_v50, %v962_v15  ;;  %v1032_v30 = vmul.f32 %v1538_v18, %v1399_v19  ;;  %v831_v16 = vmul.f32 %v1526_v14, %v1334_v23 }
  0x58   : > { %v862_v22 = vadd.f32 %v830_v45, %v760_v47  ;;  %v660_v31 = vadd.f32 %v628_v54, %v559_v20  ;;  %v458_v33 = vadd.f32 %v426_v9, %v357_v24  ;;  %v629_v34 = vmul.f32 %v1366_v8, %v1508_v4  ;;  %v1401_v45 = vld [vmem:[%s1498_s23 + $0xf2] sm:$0xff] }
  0x59   : > { %v225_v38 = vmul.f32 %v1332_v61, %v1483_v0  ;;  %v1102_v60 = vadd.f32 %v1617_v37, %v1063_v12  ;;  %v326_v29 = vmul.f32 %v1365_v51, %v1488_v1  ;;  %v427_v39 = vmul.f32 %v1398_v40, %v1493_v2 }
  0x5a   : > { %v963_v32 = vadd.f32 %v931_v53, %v862_v22  ;;  %v761_v42 = vadd.f32 %v729_v21, %v660_v31  ;;  %v932_v11 = vmul.f32 %v1533_v17, %v1367_v35  ;;  %v560_v27 = vadd.f32 %v528_v13, %v458_v33  ;;  %v1369_v13 = vld [vmem:[%s1498_s23 + $0xf9] sm:$0xff] }
  0x5b   : > { %v730_v28 = vmul.f32 %v1399_v19, %v1513_v5  ;;  %1135 = vst.msk [vmem:[%s1628_s15 + $0x68] sm:$0xff] %vm1121_vm0, %v1102_v60  ;;  %v1033_v61 = vmul.f32 %v1538_v18, %v1400_v43  ;;  %v358_v36 = vadd.f32 %v326_v29, %v225_v38  ;;  %v529_v51 = vmul.f32 %v1334_v23, %v1503_v3  ;;  %v1402_v31 = vld [vmem:[%s1498_s23 + $0xfa] sm:$0xff]  ;;  %v1337_v60 = vld [vmem:[%s1498_s23 + $0x108] sm:$0xff] }
  0x5c   : > { %v1064_v44 = vadd.f32 %v1032_v30, %v963_v32  ;;  %v863_v26 = vadd.f32 %v831_v16, %v761_v42  ;;  %v661_v48 = vadd.f32 %v629_v34, %v560_v27  ;;  %v832_v55 = vmul.f32 %v1526_v14, %v1335_v49  ;;  %v1370_v27 = vld [vmem:[%s1498_s23 + $0x109] sm:$0xff] }
  0x5d   : > { %v630_v25 = vmul.f32 %v1367_v35, %v1508_v4  ;;  %v459_v56 = vadd.f32 %v427_v39, %v358_v36  ;;  %v226_v57 = vmul.f32 %v1333_v58, %v1483_v0  ;;  %v327_v50 = vmul.f32 %v1366_v8, %v1488_v1 }
  0x5e   : > { %v1103_v40 = vadd.f32 %v1617_v37, %v1064_v44  ;;  %v964_v63 = vadd.f32 %v932_v11, %v863_v26  ;;  %v762_v6 = vadd.f32 %v730_v28, %v661_v48  ;;  %v933_v52 = vmul.f32 %v1533_v17, %v1368_v41 }
  0x5f   : > { %v428_v59 = vmul.f32 %v1399_v19, %v1493_v2  ;;  %v561_v54 = vadd.f32 %v529_v51, %v459_v56  ;;  %v731_v7 = vmul.f32 %v1400_v43, %v1513_v5  ;;  %v359_v46 = vadd.f32 %v327_v50, %v226_v57  ;;  %v1338_v56 = vld [vmem:[%s1498_s23 + $0x110] sm:$0xff] }
  0x60   : > { %1136 = vst.msk [vmem:[%s1628_s15 + $0x70] sm:$0xff] %vm1121_vm0, %v1103_v40  ;;  %v530_v62 = vmul.f32 %v1335_v49, %v1503_v3  ;;  %v1065_v58 = vadd.f32 %v1033_v61, %v964_v63  ;;  %v864_v8 = vadd.f32 %v832_v55, %v762_v6  ;;  %v1034_v15 = vmul.f32 %v1538_v18, %v1401_v45  ;;  %v1403_v55 = vld [vmem:[%s1498_s23 + $0x10a] sm:$0xff] }
  0x61   : > { %v833_v47 = vmul.f32 %v1526_v14, %v1336_v10  ;;  %v662_v53 = vadd.f32 %v630_v25, %v561_v54  ;;  %v460_v9 = vadd.f32 %v428_v59, %v359_v46  ;;  %v631_v19 = vmul.f32 %v1368_v41, %v1508_v4 }
  0x62   : > { %v227_v20 = vmul.f32 %v1334_v23, %v1483_v0  ;;  %v1104_v21 = vadd.f32 %v1617_v37, %v1065_v58  ;;  %v965_v24 = vadd.f32 %v933_v52, %v864_v8  ;;  %v328_v12 = vmul.f32 %v1367_v35, %v1488_v1 }
  0x63   : > { %v429_v22 = vmul.f32 %v1400_v43, %v1493_v2  ;;  %v763_v30 = vadd.f32 %v731_v7, %v662_v53  ;;  %v934_v16 = vmul.f32 %v1533_v17, %v1369_v13  ;;  %v562_v33 = vadd.f32 %v530_v62, %v460_v9  ;;  %v1371_v62 = vld [vmem:[%s1498_s23 + $0x111] sm:$0xff] }
  0x64   : > { %v732_v34 = vmul.f32 %v1401_v45, %v1513_v5  ;;  %1137 = vst.msk [vmem:[%s1628_s15 + $0x78] sm:$0xff] %vm1121_vm0, %v1104_v21  ;;  %v1066_v38 = vadd.f32 %v1034_v15, %v965_v24  ;;  %v1035_v23 = vmul.f32 %v1538_v18, %v1402_v31  ;;  %v360_v32 = vadd.f32 %v328_v12, %v227_v20  ;;  %v1404_v53 = vld [vmem:[%s1498_s23 + $0x112] sm:$0xff]  ;;  %v1339_v21 = vld [vmem:[%s1498_s23 + $0x120] sm:$0xff] }
  0x65   : > { %v531_v35 = vmul.f32 %v1336_v10, %v1503_v3  ;;  %v865_v29 = vadd.f32 %v833_v47, %v763_v30  ;;  %v663_v39 = vadd.f32 %v631_v19, %v562_v33  ;;  %v834_v42 = vmul.f32 %v1526_v14, %v1337_v60  ;;  %v1372_v33 = vld [vmem:[%s1498_s23 + $0x121] sm:$0xff] }
  0x66   : > { %v632_v11 = vmul.f32 %v1369_v13, %v1508_v4  ;;  %v1105_v43 = vadd.f32 %v1617_v37, %v1066_v38  ;;  %v461_v28 = vadd.f32 %v429_v22, %v360_v32  ;;  %v228_v44 = vmul.f32 %v1335_v49, %v1483_v0 }
  0x67   : > { %v329_v61 = vmul.f32 %v1368_v41, %v1488_v1  ;;  %v966_v36 = vadd.f32 %v934_v16, %v865_v29  ;;  %v764_v51 = vadd.f32 %v732_v34, %v663_v39  ;;  %v935_v26 = vmul.f32 %v1533_v17, %v1370_v27 }
  0x68   : > { %v430_v48 = vmul.f32 %v1401_v45, %v1493_v2  ;;  %1138 = vst.msk [vmem:[%s1628_s15 + $0x80] sm:$0xff] %vm1121_vm0, %v1105_v43  ;;  %v563_v25 = vadd.f32 %v531_v35, %v461_v28  ;;  %v733_v40 = vmul.f32 %v1402_v31, %v1513_v5  ;;  %v532_v50 = vmul.f32 %v1337_v60, %v1503_v3  ;;  %v1340_v28 = vld [vmem:[%s1498_s23 + $0x128] sm:$0xff] }
  0x69   : > { %v361_v57 = vadd.f32 %v329_v61, %v228_v44  ;;  %v1067_v49 = vadd.f32 %v1035_v23, %v966_v36  ;;  %v866_v41 = vadd.f32 %v834_v42, %v764_v51  ;;  %v1036_v63 = vmul.f32 %v1538_v18, %v1403_v55  ;;  %v1405_v42 = vld [vmem:[%s1498_s23 + $0x122] sm:$0xff] }
  0x6a   : > { %v835_v6 = vmul.f32 %v1526_v14, %v1338_v56  ;;  %v664_v52 = vadd.f32 %v632_v11, %v563_v25  ;;  %v633_v45 = vmul.f32 %v1370_v27, %v1508_v4  ;;  %v229_v54 = vmul.f32 %v1336_v10, %v1483_v0 }
  0x6b   : > { %v462_v59 = vadd.f32 %v430_v48, %v361_v57  ;;  %v1106_v7 = vadd.f32 %v1617_v37, %v1067_v49  ;;  %v967_v46 = vadd.f32 %v935_v26, %v866_v41  ;;  %v330_v58 = vmul.f32 %v1369_v13, %v1488_v1 }
  0x6c   : > { %v431_v8 = vmul.f32 %v1402_v31, %v1493_v2  ;;  %v765_v15 = vadd.f32 %v733_v40, %v664_v52  ;;  %v936_v47 = vmul.f32 %v1533_v17, %v1371_v62  ;;  %v734_v19 = vmul.f32 %v1403_v55, %v1513_v5 }
  0x6d   : > { %v564_v9 = vadd.f32 %v532_v50, %v462_v59  ;;  %1139 = vst.msk [vmem:[%s1628_s15 + $0x88] sm:$0xff] %vm1121_vm0, %v1106_v7  ;;  %v1068_v20 = vadd.f32 %v1036_v63, %v967_v46  ;;  %v1037_v10 = vmul.f32 %v1538_v18, %v1404_v53  ;;  %v362_v24 = vadd.f32 %v330_v58, %v229_v54  ;;  %v1373_v50 = vld [vmem:[%s1498_s23 + $0x129] sm:$0xff]  ;;  %v1374_v58 = vld [vmem:[%s1498_s23 + $0x139] sm:$0xff] }
  0x6e   : > { %v533_v13 = vmul.f32 %v1338_v56, %v1503_v3  ;;  %v867_v12 = vadd.f32 %v835_v6, %v765_v15  ;;  %v836_v30 = vmul.f32 %v1526_v14, %v1339_v21  ;;  %v634_v16 = vmul.f32 %v1371_v62, %v1508_v4  ;;  %v1406_v6 = vld [vmem:[%s1498_s23 + $0x12a] sm:$0xff]  ;;  %v1943_v15 = vld [vmem:[%s2127_s1] ss:$0 sm:$0xff] }
  0x6f   : > { %v665_v22 = vadd.f32 %v633_v45, %v564_v9  ;;  %v1107_v31 = vadd.f32 %v1617_v37, %v1068_v20  ;;  %v463_v34 = vadd.f32 %v431_v8, %v362_v24  ;;  %v230_v38 = vmul.f32 %v1337_v60, %v1483_v0 }
  0x70   : > { %v331_v23 = vmul.f32 %v1370_v27, %v1488_v1  ;;  %v968_v32 = vadd.f32 %v936_v47, %v867_v12  ;;  %v937_v29 = vmul.f32 %v1533_v17, %v1372_v33  ;;  %v432_v39 = vmul.f32 %v1403_v55, %v1493_v2  ;;  %v1949_v47 = vld [vmem:[%s2127_s1 + $0x1] ss:$0 sm:$0xff]  ;;  %v1965_v12 = vld [vmem:[%s2127_s1 + $0x5] ss:$0 sm:$0xff] }
  0x71   : > { %v766_v35 = vadd.f32 %v734_v19, %v665_v22  ;;  %1140 = vst.msk [vmem:[%s1628_s15 + $0x90] sm:$0xff] %vm1121_vm0, %v1107_v31  ;;  %v565_v11 = vadd.f32 %v533_v13, %v463_v34  ;;  %v735_v43 = vmul.f32 %v1404_v53, %v1513_v5  ;;  %v534_v61 = vmul.f32 %v1339_v21, %v1503_v3  ;;  %v1974_v34 = vld [vmem:[%s2127_s1 + $0x8] ss:$0 sm:$0xff] }
  0x72   : > { %v363_v44 = vadd.f32 %v331_v23, %v230_v38  ;;  %v1069_v60 = vadd.f32 %v1037_v10, %v968_v32  ;;  %v1038_v36 = vmul.f32 %v1538_v18, %v1405_v42  ;;  %v837_v51 = vmul.f32 %v1526_v14, %v1340_v28  ;;  %v1956_v10 = vld [vmem:[%s2127_s1 + $0x2] ss:$0 sm:$0xff]  ;;  %v1980_v23 = vld [vmem:[%s2127_s1 + $0x6] ss:$0 sm:$0xff] }
  0x73   : > { %v868_v27 = vadd.f32 %v836_v30, %v766_v35  ;;  %v666_v26 = vadd.f32 %v634_v16, %v565_v11  ;;  %v635_v55 = vmul.f32 %v1372_v33, %v1508_v4  ;;  %v231_v25 = vmul.f32 %v1338_v56, %v1483_v0  ;;  %v1922_v56 = vld [vmem:[%s1498_s23 + $0x138] sm:$0xff] }
  0x74   : > { %v464_v48 = vadd.f32 %v432_v39, %v363_v44  ;;  %v1108_v40 = vadd.f32 %v1617_v37, %v1069_v60  ;;  %v332_v3 = vmul.f32 %v1371_v62, %v1488_v1  ;;  %v433_v49 = vmul.f32 %v1404_v53, %v1493_v2  ;;  %v1927_v1 = vld [vmem:[%s2127_s1 + $0x3] ss:$0 sm:$0xff] }
  0x75   : > { %v969_v57 = vadd.f32 %v937_v29, %v868_v27  ;;  %v767_v41 = vadd.f32 %v735_v43, %v666_v26  ;;  %v938_v63 = vmul.f32 %v1533_v17, %v1373_v50  ;;  %v736_v59 = vmul.f32 %v1405_v42, %v1513_v5  ;;  %v1375_v44 = vld [vmem:[%s1498_s23 + $0x141] sm:$0xff] }
  0x76   : > { %v566_v52 = vadd.f32 %v534_v61, %v464_v48  ;;  %1141 = vst.msk [vmem:[%s1628_s15 + $0x98] sm:$0xff] %vm1121_vm0, %v1108_v40  ;;  %v1039_v0 = vmul.f32 %v1538_v18, %v1406_v6  ;;  %v364_v45 = vadd.f32 %v332_v3, %v231_v25  ;;  %v535_v2 = vmul.f32 %v1927_v1, %v1340_v28  ;;  %v1935_v18 = vld [vmem:[%s2127_s1 + $0x4] ss:$0 sm:$0xff]  ;;  %v1343_v40 = vld [vmem:[%s1498_s23 + $0x150] sm:$0xff] }
  0x77   : > { %v1070_v4 = vadd.f32 %v1038_v36, %v969_v57  ;;  %v869_v54 = vadd.f32 %v837_v51, %v767_v41  ;;  %v838_v5 = vmul.f32 %v1526_v14, %v1922_v56  ;;  %v636_v46 = vmul.f32 %v1935_v18, %v1373_v50  ;;  %v1992_v36 = vld [vmem:[%s2127_s1 + $0x7] ss:$0 sm:$0xff] }
  0x78   : > { %v667_v7 = vadd.f32 %v635_v55, %v566_v52  ;;  %v465_v8 = vadd.f32 %v433_v49, %v364_v45  ;;  %v232_v14 = vmul.f32 %v1943_v15, %v1339_v21  ;;  %v333_v53 = vmul.f32 %v1949_v47, %v1372_v33  ;;  %v1407_v21 = vld [vmem:[%s1498_s23 + $0x13a] sm:$0xff]  ;;  %v1408_v26 = vld [vmem:[%s1498_s23 + $0x142] sm:$0xff]  ;;  %v1376_v52 = vld [vmem:[%s1498_s23 + $0x151] sm:$0xff] }
  0x79   : > { %v1109_v62 = vadd.f32 %v1617_v37, %v1070_v4  ;;  %v970_v9 = vadd.f32 %v938_v63, %v869_v54  ;;  %v939_v20 = vmul.f32 %v1533_v17, %v1374_v58  ;;  %v434_v24 = vmul.f32 %v1956_v10, %v1405_v42  ;;  %v1342_v17 = vld [vmem:[%s1498_s23 + $0x140] sm:$0xff] }
  0x7a   : > { %v768_v19 = vadd.f32 %v736_v59, %v667_v7  ;;  %v567_v13 = vadd.f32 %v535_v2, %v465_v8  ;;  %v737_v22 = vmul.f32 %v1965_v12, %v1406_v6  ;;  %v365_v30 = vadd.f32 %v333_v53, %v232_v14  ;;  %v1344_v8 = vld [vmem:[%s1498_s23 + $0x158] sm:$0xff] }
  0x7b   : > { %1142 = vst.msk [vmem:[%s1628_s15 + $0xa0] sm:$0xff] %vm1121_vm0, %v1109_v62  ;;  %v536_v16 = vmul.f32 %v1927_v1, %v1922_v56  ;;  %v1071_v31 = vadd.f32 %v1039_v0, %v970_v9  ;;  %v1040_v38 = vmul.f32 %v1974_v34, %v1407_v21  ;;  %v839_v32 = vmul.f32 %v1980_v23, %v1342_v17 }
  0x7c   : > { %v870_v33 = vadd.f32 %v838_v5, %v768_v19  ;;  %v668_v35 = vadd.f32 %v636_v46, %v567_v13  ;;  %v466_v29 = vadd.f32 %v434_v24, %v365_v30  ;;  %v637_v39 = vmul.f32 %v1935_v18, %v1374_v58  ;;  %v1409_v5 = vld [vmem:[%s1498_s23 + $0x152] sm:$0xff] }
  0x7d   : > { %v233_v42 = vmul.f32 %v1943_v15, %v1340_v28  ;;  %v1110_v11 = vadd.f32 %v1617_v37, %v1071_v31  ;;  %v334_v61 = vmul.f32 %v1949_v47, %v1373_v50  ;;  %v435_v60 = vmul.f32 %v1956_v10, %v1406_v6 }
  0x7e   : > { %v971_v43 = vadd.f32 %v939_v20, %v870_v33  ;;  %v769_v27 = vadd.f32 %v737_v22, %v668_v35  ;;  %v940_v51 = vmul.f32 %v1992_v36, %v1375_v44  ;;  %v568_v48 = vadd.f32 %v536_v16, %v466_v29  ;;  %v1377_v16 = vld [vmem:[%s1498_s23 + $0x159] sm:$0xff] }
  0x7f   : > { %v738_v28 = vmul.f32 %v1965_v12, %v1407_v21  ;;  %1143 = vst.msk [vmem:[%s1628_s15 + $0xa8] sm:$0xff] %vm1121_vm0, %v1110_v11  ;;  %v1041_v25 = vmul.f32 %v1974_v34, %v1408_v26  ;;  %v366_v57 = vadd.f32 %v334_v61, %v233_v42  ;;  %v537_v50 = vmul.f32 %v1927_v1, %v1342_v17  ;;  %v1410_v35 = vld [vmem:[%s1498_s23 + $0x15a] sm:$0xff] }
  0x80   : > { %v1072_v55 = vadd.f32 %v1040_v38, %v971_v43  ;;  %v871_v3 = vadd.f32 %v839_v32, %v769_v27  ;;  %v669_v49 = vadd.f32 %v637_v39, %v568_v48  ;;  %v840_v41 = vmul.f32 %v1980_v23, %v1343_v40  ;;  %v1378_v48 = vld [vmem:[%s1498_s23 + $0x169] sm:$0xff] }
  0x81   : > { %v638_v63 = vmul.f32 %v1935_v18, %v1375_v44  ;;  %v467_v59 = vadd.f32 %v435_v60, %v366_v57  ;;  %v234_v4 = vmul.f32 %v1943_v15, %v1922_v56  ;;  %v335_v0 = vmul.f32 %v1949_v47, %v1374_v58 }
  0x82   : > { %v1111_v6 = vadd.f32 %v1617_v37, %v1072_v55  ;;  %v972_v45 = vadd.f32 %v940_v51, %v871_v3  ;;  %v770_v2 = vadd.f32 %v738_v28, %v669_v49  ;;  %v941_v54 = vmul.f32 %v1992_v36, %v1376_v52  ;;  %v2038_v51 = vld [vmem:[%s2128_s2] ss:$0 sm:$0xff] }
  0x83   : > { %v436_v7 = vmul.f32 %v1956_v10, %v1407_v21  ;;  %v569_v46 = vadd.f32 %v537_v50, %v467_v59  ;;  %v739_v62 = vmul.f32 %v1965_v12, %v1408_v26  ;;  %v367_v14 = vadd.f32 %v335_v0, %v234_v4  ;;  %v1346_v59 = vld [vmem:[%s1498_s23 + $0x170] sm:$0xff] }
  0x84   : > { %1144 = vst.msk [vmem:[%s1628_s15 + $0xb0] sm:$0xff] %vm1121_vm0, %v1111_v6  ;;  %v538_v53 = vmul.f32 %v1927_v1, %v1343_v40  ;;  %v1073_v56 = vadd.f32 %v1041_v25, %v972_v45  ;;  %v872_v58 = vadd.f32 %v840_v41, %v770_v2  ;;  %v1042_v9 = vmul.f32 %v1974_v34, %v1409_v5  ;;  %v1411_v41 = vld [vmem:[%s1498_s23 + $0x16a] sm:$0xff] }
  0x85   : > { %v841_v19 = vmul.f32 %v1980_v23, %v1344_v8  ;;  %v670_v20 = vadd.f32 %v638_v63, %v569_v46  ;;  %v468_v24 = vadd.f32 %v436_v7, %v367_v14  ;;  %v639_v21 = vmul.f32 %v1935_v18, %v1376_v52 }
  0x86   : > { %v235_v13 = vmul.f32 %v1943_v15, %v1342_v17  ;;  %v1112_v22 = vadd.f32 %v1617_v37, %v1073_v56  ;;  %v973_v30 = vadd.f32 %v941_v54, %v872_v58  ;;  %v336_v31 = vmul.f32 %v1949_v47, %v1375_v44  ;;  %v1345_v37 = vld [vmem:[%s1498_s23 + $0x168] sm:$0xff] }
  0x87   : > { %v437_v33 = vmul.f32 %v1956_v10, %v1408_v26  ;;  %v771_v38 = vadd.f32 %v739_v62, %v670_v20  ;;  %v942_v32 = vmul.f32 %v1992_v36, %v1377_v16  ;;  %v570_v29 = vadd.f32 %v538_v53, %v468_v24  ;;  %v1379_v53 = vld [vmem:[%s1498_s23 + $0x171] sm:$0xff] }
  0x88   : > { %v740_v39 = vmul.f32 %v1965_v12, %v1409_v5  ;;  %1145 = vst.msk [vmem:[%s1628_s15 + $0xb8] sm:$0xff] %vm1121_vm0, %v1112_v22  ;;  %v1074_v42 = vadd.f32 %v1042_v9, %v973_v30  ;;  %v1043_v17 = vmul.f32 %v1974_v34, %v1410_v35  ;;  %v368_v11 = vadd.f32 %v336_v31, %v235_v13  ;;  %v1412_v20 = vld [vmem:[%s1498_s23 + $0x172] sm:$0xff]  ;;  %v1347_v22 = vld [vmem:[%s1498_s23 + $0x180] sm:$0xff] }
  0x89   : > { %v539_v43 = vmul.f32 %v1927_v1, %v1344_v8  ;;  %v873_v44 = vadd.f32 %v841_v19, %v771_v38  ;;  %v671_v61 = vadd.f32 %v639_v21, %v570_v29  ;;  %v842_v60 = vmul.f32 %v1980_v23, %v1345_v37  ;;  %v1380_v29 = vld [vmem:[%s1498_s23 + $0x181] sm:$0xff] }
  0x8a   : > { %v640_v27 = vmul.f32 %v1935_v18, %v1377_v16  ;;  %v1113_v26 = vadd.f32 %v2038_v51, %v1074_v42  ;;  %v469_v28 = vadd.f32 %v437_v33, %v368_v11  ;;  %v236_v55 = vmul.f32 %v1943_v15, %v1343_v40 }
  0x8b   : > { %v337_v25 = vmul.f32 %v1949_v47, %v1376_v52  ;;  %v974_v57 = vadd.f32 %v942_v32, %v873_v44  ;;  %v772_v50 = vadd.f32 %v740_v39, %v671_v61  ;;  %v943_v3 = vmul.f32 %v1992_v36, %v1378_v48 }
  0x8c   : > { %v438_v49 = vmul.f32 %v1956_v10, %v1409_v5  ;;  %1146 = vst.msk [vmem:[%s1628_s15 + $0xc0] sm:$0xff] %vm1121_vm0, %v1113_v26  ;;  %v571_v63 = vadd.f32 %v539_v43, %v469_v28  ;;  %v741_v6 = vmul.f32 %v1965_v12, %v1410_v35  ;;  %v540_v0 = vmul.f32 %v1927_v1, %v1345_v37  ;;  %v1348_v28 = vld [vmem:[%s1498_s23 + $0x188] sm:$0xff] }
  0x8d   : > { %v369_v4 = vadd.f32 %v337_v25, %v236_v55  ;;  %v1075_v40 = vadd.f32 %v1043_v17, %v974_v57  ;;  %v874_v52 = vadd.f32 %v842_v60, %v772_v50  ;;  %v1044_v45 = vmul.f32 %v1974_v34, %v1411_v41  ;;  %v1413_v60 = vld [vmem:[%s1498_s23 + $0x182] sm:$0xff] }
  0x8e   : > { %v843_v2 = vmul.f32 %v1980_v23, %v1346_v59  ;;  %v672_v54 = vadd.f32 %v640_v27, %v571_v63  ;;  %v641_v5 = vmul.f32 %v1935_v18, %v1378_v48  ;;  %v237_v46 = vmul.f32 %v1943_v15, %v1344_v8 }
  0x8f   : > { %v470_v7 = vadd.f32 %v438_v49, %v369_v4  ;;  %v1114_v62 = vadd.f32 %v2038_v51, %v1075_v40  ;;  %v975_v14 = vadd.f32 %v943_v3, %v874_v52  ;;  %v338_v56 = vmul.f32 %v1949_v47, %v1377_v16  ;;  %v1349_v40 = vld [vmem:[%s1498_s23 + $0x198] sm:$0xff] }
  0x90   : > { %v439_v58 = vmul.f32 %v1956_v10, %v1410_v35  ;;  %v773_v9 = vadd.f32 %v741_v6, %v672_v54  ;;  %v944_v19 = vmul.f32 %v1992_v36, %v1379_v53  ;;  %v742_v21 = vmul.f32 %v1965_v12, %v1411_v41 }
  0x91   : > { %v572_v24 = vadd.f32 %v540_v0, %v470_v7  ;;  %1147 = vst.msk [vmem:[%s1628_s15 + $0xc8] sm:$0xff] %vm1121_vm0, %v1114_v62  ;;  %v1076_v13 = vadd.f32 %v1044_v45, %v975_v14  ;;  %v1045_v8 = vmul.f32 %v1974_v34, %v1412_v20  ;;  %v370_v30 = vadd.f32 %v338_v56, %v237_v46  ;;  %v1381_v0 = vld [vmem:[%s1498_s23 + $0x189] sm:$0xff] }
  0x92   : > { %v541_v16 = vmul.f32 %v1927_v1, %v1346_v59  ;;  %v875_v31 = vadd.f32 %v843_v2, %v773_v9  ;;  %v844_v38 = vmul.f32 %v1980_v23, %v1347_v22  ;;  %v642_v32 = vmul.f32 %v1935_v18, %v1379_v53  ;;  %v1415_v9 = vld [vmem:[%s1498_s23 + $0x19a] sm:$0xff] }
  0x93   : > { %v673_v33 = vadd.f32 %v641_v5, %v572_v24  ;;  %v1115_v35 = vadd.f32 %v2038_v51, %v1076_v13  ;;  %v471_v39 = vadd.f32 %v439_v58, %v370_v30  ;;  %v238_v42 = vmul.f32 %v1943_v15, %v1345_v37 }
  0x94   : > { %v339_v17 = vmul.f32 %v1949_v47, %v1378_v48  ;;  %v976_v11 = vadd.f32 %v944_v19, %v875_v31  ;;  %v945_v44 = vmul.f32 %v1992_v36, %v1380_v29  ;;  %v440_v61 = vmul.f32 %v1956_v10, %v1411_v41 }
  0x95   : > { %v774_v43 = vadd.f32 %v742_v21, %v673_v33  ;;  %1148 = vst.msk [vmem:[%s1628_s15 + $0xd0] sm:$0xff] %vm1121_vm0, %v1115_v35  ;;  %v573_v27 = vadd.f32 %v541_v16, %v471_v39  ;;  %v743_v26 = vmul.f32 %v1965_v12, %v1412_v20  ;;  %v542_v37 = vmul.f32 %v1927_v1, %v1347_v22  ;;  %v1383_v33 = vld [vmem:[%s1498_s23 + $0x1a1] sm:$0xff] }
  0x96   : > { %v371_v55 = vadd.f32 %v339_v17, %v238_v42  ;;  %v1077_v25 = vadd.f32 %v1045_v8, %v976_v11  ;;  %v1046_v57 = vmul.f32 %v1974_v34, %v1413_v60  ;;  %v845_v50 = vmul.f32 %v1980_v23, %v1348_v28 }
  0x97   : > { %v876_v48 = vadd.f32 %v844_v38, %v774_v43  ;;  %v674_v3 = vadd.f32 %v642_v32, %v573_v27  ;;  %v643_v41 = vmul.f32 %v1935_v18, %v1380_v29  ;;  %v239_v63 = vmul.f32 %v1943_v15, %v1346_v59  ;;  %v1414_v15 = vld [vmem:[%s1498_s23 + $0x18a] sm:$0xff]  ;;  %v1382_v59 = vld [vmem:[%s1498_s23 + $0x199] sm:$0xff]  ;;  %v1416_v29 = vld [vmem:[%s1498_s23 + $0x1a2] sm:$0xff] }
  0x98   : > { %v472_v49 = vadd.f32 %v440_v61, %v371_v55  ;;  %v1116_v6 = vadd.f32 %v2038_v51, %v1077_v25  ;;  %v340_v52 = vmul.f32 %v1949_v47, %v1379_v53  ;;  %v441_v45 = vmul.f32 %v1956_v10, %v1412_v20 }
  0x99   : > { %v977_v4 = vadd.f32 %v945_v44, %v876_v48  ;;  %v775_v2 = vadd.f32 %v743_v26, %v674_v3  ;;  %v946_v54 = vmul.f32 %v1992_v36, %v1381_v0  ;;  %v744_v5 = vmul.f32 %v1965_v12, %v1413_v60 }
  0x9a   : > { %v574_v7 = vadd.f32 %v542_v37, %v472_v49  ;;  %1149 = vst.msk [vmem:[%s1628_s15 + $0xd8] sm:$0xff] %vm1121_vm0, %v1116_v6  ;;  %v372_v62 = vadd.f32 %v340_v52, %v239_v63  ;;  %v543_v14 = vmul.f32 %v1927_v1, %v1348_v28  ;;  %v1047_v10 = vmul.f32 %v1974_v34, %v1414_v15  ;;  %v1350_v1 = vld [vmem:[%s1498_s23 + $0x1a0] sm:$0xff] }
  0x9b   : > { %v1078_v46 = vadd.f32 %v1046_v57, %v977_v4  ;;  %v877_v47 = vadd.f32 %v845_v50, %v775_v2  ;;  %v846_v56 = vmul.f32 %v1980_v23, %v1349_v40  ;;  %v644_v20 = vmul.f32 %v1935_v18, %v1381_v0 }
  0x9c   : > { %v675_v53 = vadd.f32 %v643_v41, %v574_v7  ;;  %v473_v19 = vadd.f32 %v441_v45, %v372_v62  ;;  %v947_v13 = vmul.f32 %v1992_v36, %v1382_v59  ;;  %v745_v22 = vmul.f32 %v1965_v12, %v1414_v15 }
  0x9d   : > { %v1117_v58 = vadd.f32 %v2038_v51, %v1078_v46  ;;  %v978_v24 = vadd.f32 %v946_v54, %v877_v47  ;;  %v1048_v31 = vmul.f32 %v1974_v34, %v1415_v9  ;;  %v847_v18 = vmul.f32 %v1980_v23, %v1350_v1 }
  0x9e   : > { %v776_v21 = vadd.f32 %v744_v5, %v675_v53  ;;  %v575_v8 = vadd.f32 %v543_v14, %v473_v19  ;;  %v948_v42 = vmul.f32 %v1992_v36, %v1383_v33  ;;  %v1049_v11 = vmul.f32 %v1974_v34, %v1416_v29 }
  0x9f   : > { %1150 = vst.msk [vmem:[%s1628_s15 + $0xe0] sm:$0xff] %vm1121_vm0, %v1117_v58  ;;  %v1079_v30 = vadd.f32 %v1047_v10, %v978_v24 }
  0xa0   : > { %v878_v16 = vadd.f32 %v846_v56, %v776_v21  ;;  %v676_v38 = vadd.f32 %v644_v20, %v575_v8 }
  0xa1   : > { %v1118_v32 = vadd.f32 %v2038_v51, %v1079_v30 }
  0xa2   : > { %v979_v35 = vadd.f32 %v947_v13, %v878_v16  ;;  %v777_v39 = vadd.f32 %v745_v22, %v676_v38 }
  0xa3   : > { %1151 = vst.msk [vmem:[%s1628_s15 + $0xe8] sm:$0xff] %vm1121_vm0, %v1118_v32 }
  0xa4   : > { %v1080_v12 = vadd.f32 %v1048_v31, %v979_v35  ;;  %v879_v17 = vadd.f32 %v847_v18, %v777_v39 }
  0xa6   : > { %v1119_v43 = vadd.f32 %v2038_v51, %v1080_v12  ;;  %v980_v44 = vadd.f32 %v948_v42, %v879_v17 }
  0xa8   : > { %1152 = vst.msk [vmem:[%s1628_s15 + $0xf0] sm:$0xff] %vm1121_vm0, %v1119_v43  ;;  %v1081_v61 = vadd.f32 %v1049_v11, %v980_v44 }
  0xaa   : > { %v1120_v23 = vadd.f32 %v2038_v51, %v1081_v61 }
  0xac   : > { %1153 = vst.msk [vmem:[%s1628_s15 + $0xf8] sm:$0xff] %vm1121_vm0, %v1120_v23 }
  0xad PF: > { %s13_s12 = sadd.s32 1, %s1447_s12  }
  0xae   : > { %p10_p4 = scmp.ge.s32.totalorder %s13_s12, 4  }
  0xb0   :  { %12 = sbr.rel (!%p10_p4) target bundleno = 1 (0x1), region = 64 }

// kernel: discriminator_block_forward.7
= control target key start
LH: loop header
LB: loop body
LE: loop exit
PB: predicated region body
PF: predicated region fallthrough
CT: control target
= control target key end

     0   :  { %s1530_s21 = smov 0   ;;  %s1833_s0 = inlined_call_operand.vmem [shape: f32[512,8], index: 0, kind: input, shape index: {}]   ;;  %s1834_s1 = inlined_call_operand.vmem [shape: f32[512,4], index: 1, kind: input, shape index: {}]   ;;  %s1835_s2 = inlined_call_operand.vmem [shape: f32[8,8], index: 2, kind: input, shape index: {}]   ;;  %s1836_s3 = inlined_call_operand.vmem [shape: f32[1,8], index: 3, kind: input, shape index: {}]   ;;  %s1837_s4 = inlined_call_operand.vmem [shape: f32[4,8], index: 4, kind: input, shape index: {}]   ;;  %s1838_s5 = inlined_call_operand.vmem [shape: f32[1,8], index: 5, kind: input, shape index: {}]   ;;  %s1839_s6 = inlined_call_operand.vmem [shape: f32[512,8], index: 6, kind: output, shape index: {}]  }
   0x1 LB: > { %s1233_s22 = sadd.s32 4294967295, %s1493_s21   ;;  %p1237_p0 = scmp.ge.s32.totalorder %s1493_s21, 1  ;;  %s1493_s21 = sphi %s1530_s21, %s16_s21  }
   0x2   : > { %p224_p1 = scmp.lt.s32.totalorder %s1493_s21, 3 }
   0x4   : > { %p225_p2 = pnand %p1237_p0, %p224_p1 }
   0x5   : > { %v309_v0 = vld [vmem:[%s1835_s2] sm:$0xff] (!%p225_p2)  ;;  %s1238_s25 = sshll.u32 (!%p225_p2), %s1233_s22, 5  ;;  %vm872_vm0 = vcmask (!%p225_p2), 1043456   ;;  %vm317_vm1 = vcmask (!%p225_p2), 64512   ;;  %vm775_vm2 = vcmask (!%p225_p2), 31744  }
   0x6   : > { %228 = sbr.rel (%p225_p2) target bundleno = 299 (0x12b), region = 44  ;;  %v767_v1 = vld [vmem:[%s1837_s4] sm:$0xf] (!%p225_p2)  ;;  %1379 = vmatprep.subr.mxu0 (!%p225_p2), %v309_v0  ;;  %p260_p3 = scmp.lt.s32.totalorder (!%p225_p2), %s1238_s25, 63 }
   0x7   : > { %1429 = vmatprep.subr.msk.mxu1 (!%p225_p2), %vm872_vm0, %v767_v1  ;;  %1380 = vmatpush3.msra.mxu0 (!%p225_p2), %v309_v0 }
   0x8   : > { %1430 = vmatpush3.msk.msra.mxu1 (!%p225_p2), %vm872_vm0, %v767_v1 }
   0xd   : > { %s1841_s25 = smov (!%p260_p3, %s1238_s25), 63 }
   0xe   : > { %s1544_s28 = sshll.u32 %s1841_s25, 3 }
   0xf   : > { %s1550_s7 = scalar_lea.vmem %s1833_s0, %s1544_s28  ;;  %s1558_s10 = scalar_lea.vmem %s1834_s1, %s1544_s28 }
  0x10   : > { %v277_v2 = vld [vmem:[%s1550_s7] sm:$0xff]  ;;  %v278_v3 = vld [vmem:[%s1550_s7 + $0x8] sm:$0xff]  ;;  %v279_v4 = vld [vmem:[%s1550_s7 + $0x10] sm:$0xff]  ;;  %s1704_s17 = scalar_lea.vmem %s1839_s6, %s1544_s28 }
  0x11   : > { %1381 = vmatprep.mubr.msk.f32.mxu0 %vm317_vm1, %v277_v2  ;;  %v735_v5 = vld [vmem:[%s1558_s10] sm:$0xff]  ;;  %v736_v6 = vld [vmem:[%s1558_s10 + $0x8] sm:$0xff]  ;;  %v737_v7 = vld [vmem:[%s1558_s10 + $0x10] sm:$0xff] }
  0x12   : > { %1382 = vmatmul.mubr.msk.f32.vlgmr.msra.gmra.mrb[0].mxu0 %vm317_vm1, %v278_v3  ;;  %1431 = vmatprep.mubr.msk.f32.mxu1 %vm775_vm2, %v735_v5  ;;  %v280_v8 = vld [vmem:[%s1550_s7 + $0x18] sm:$0xff]  ;;  %v281_v10 = vld [vmem:[%s1550_s7 + $0x20] sm:$0xff]  ;;  %v282_v12 = vld [vmem:[%s1550_s7 + $0x28] sm:$0xff] }
  0x13   : > { %1432 = vmatmul.mubr.msk.f32.vlgmr.msra.gmra.mrb[0].mxu1 %vm775_vm2, %v736_v6  ;;  %1384 = vmatprep.mubr.msk.f32.mxu0 %vm317_vm1, %v279_v4  ;;  %v738_v9 = vld [vmem:[%s1558_s10 + $0x18] sm:$0xff]  ;;  %v739_v11 = vld [vmem:[%s1558_s10 + $0x20] sm:$0xff]  ;;  %v740_v13 = vld [vmem:[%s1558_s10 + $0x28] sm:$0xff] }
  0x14   : > { %1434 = vmatprep.mubr.msk.f32.mxu1 %vm775_vm2, %v737_v7  ;;  %v283_v14 = vld [vmem:[%s1550_s7 + $0x30] sm:$0xff]  ;;  %v284_v16 = vld [vmem:[%s1550_s7 + $0x38] sm:$0xff]  ;;  %v285_v18 = vld [vmem:[%s1550_s7 + $0x40] sm:$0xff] }
  0x15   : > { %v741_v15 = vld [vmem:[%s1558_s10 + $0x30] sm:$0xff]  ;;  %v742_v17 = vld [vmem:[%s1558_s10 + $0x38] sm:$0xff]  ;;  %v743_v19 = vld [vmem:[%s1558_s10 + $0x40] sm:$0xff] }
  0x16   : > { %1385 = vmatmul.mubr.msk.f32.gmra.mrb[2].mxu0 %vm317_vm1, %v280_v8  ;;  %v286_v20 = vld [vmem:[%s1550_s7 + $0x48] sm:$0xff]  ;;  %v287_v22 = vld [vmem:[%s1550_s7 + $0x50] sm:$0xff]  ;;  %v288_v24 = vld [vmem:[%s1550_s7 + $0x58] sm:$0xff] }
  0x17   : > { %1435 = vmatmul.mubr.msk.f32.gmra.mrb[2].mxu1 %vm775_vm2, %v738_v9  ;;  %1387 = vmatprep.mubr.msk.f32.mxu0 %vm317_vm1, %v281_v10  ;;  %v744_v21 = vld [vmem:[%s1558_s10 + $0x48] sm:$0xff]  ;;  %v745_v23 = vld [vmem:[%s1558_s10 + $0x50] sm:$0xff]  ;;  %v746_v25 = vld [vmem:[%s1558_s10 + $0x58] sm:$0xff] }
  0x18   : > { %1437 = vmatprep.mubr.msk.f32.mxu1 %vm775_vm2, %v739_v11  ;;  %v289_v26 = vld [vmem:[%s1550_s7 + $0x60] sm:$0xff]  ;;  %v290_v28 = vld [vmem:[%s1550_s7 + $0x68] sm:$0xff]  ;;  %v291_v30 = vld [vmem:[%s1550_s7 + $0x70] sm:$0xff] }
  0x19   : > { %v747_v27 = vld [vmem:[%s1558_s10 + $0x60] sm:$0xff]  ;;  %v748_v29 = vld [vmem:[%s1558_s10 + $0x68] sm:$0xff]  ;;  %v749_v31 = vld [vmem:[%s1558_s10 + $0x70] sm:$0xff] }
  0x1a   : > { %1388 = vmatmul.mubr.msk.f32.gmra.mrb[4].mxu0 %vm317_vm1, %v282_v12  ;;  %v292_v32 = vld [vmem:[%s1550_s7 + $0x78] sm:$0xff]  ;;  %v293_v34 = vld [vmem:[%s1550_s7 + $0x80] sm:$0xff]  ;;  %v294_v36 = vld [vmem:[%s1550_s7 + $0x88] sm:$0xff] }
  0x1b   : > { %1438 = vmatmul.mubr.msk.f32.gmra.mrb[4].mxu1 %vm775_vm2, %v740_v13  ;;  %1390 = vmatprep.mubr.msk.f32.mxu0 %vm317_vm1, %v283_v14  ;;  %v750_v33 = vld [vmem:[%s1558_s10 + $0x78] sm:$0xff]  ;;  %v751_v35 = vld [vmem:[%s1558_s10 + $0x80] sm:$0xff]  ;;  %v752_v37 = vld [vmem:[%s1558_s10 + $0x88] sm:$0xff] }
  0x1c   : > { %1440 = vmatprep.mubr.msk.f32.mxu1 %vm775_vm2, %v741_v15  ;;  %v295_v38 = vld [vmem:[%s1550_s7 + $0x90] sm:$0xff]  ;;  %v296_v40 = vld [vmem:[%s1550_s7 + $0x98] sm:$0xff]  ;;  %v297_v42 = vld [vmem:[%s1550_s7 + $0xa0] sm:$0xff] }
  0x1d   : > { %v753_v39 = vld [vmem:[%s1558_s10 + $0x90] sm:$0xff]  ;;  %v754_v41 = vld [vmem:[%s1558_s10 + $0x98] sm:$0xff]  ;;  %v755_v43 = vld [vmem:[%s1558_s10 + $0xa0] sm:$0xff] }
  0x1e   : > { %1391 = vmatmul.mubr.msk.f32.gmra.mrb[6].mxu0 %vm317_vm1, %v284_v16  ;;  %v298_v44 = vld [vmem:[%s1550_s7 + $0xa8] sm:$0xff]  ;;  %v299_v46 = vld [vmem:[%s1550_s7 + $0xb0] sm:$0xff]  ;;  %v300_v48 = vld [vmem:[%s1550_s7 + $0xb8] sm:$0xff] }
  0x1f   : > { %1441 = vmatmul.mubr.msk.f32.gmra.mrb[6].mxu1 %vm775_vm2, %v742_v17  ;;  %1393 = vmatprep.mubr.msk.f32.mxu0 %vm317_vm1, %v285_v18  ;;  %v756_v45 = vld [vmem:[%s1558_s10 + $0xa8] sm:$0xff]  ;;  %v757_v47 = vld [vmem:[%s1558_s10 + $0xb0] sm:$0xff]  ;;  %v758_v49 = vld [vmem:[%s1558_s10 + $0xb8] sm:$0xff] }
  0x20   : > { %1443 = vmatprep.mubr.msk.f32.mxu1 %vm775_vm2, %v743_v19  ;;  %v301_v50 = vld [vmem:[%s1550_s7 + $0xc0] sm:$0xff]  ;;  %v302_v52 = vld [vmem:[%s1550_s7 + $0xc8] sm:$0xff]  ;;  %v303_v54 = vld [vmem:[%s1550_s7 + $0xd0] sm:$0xff] }
  0x21   : > { %v759_v51 = vld [vmem:[%s1558_s10 + $0xc0] sm:$0xff]  ;;  %v760_v53 = vld [vmem:[%s1558_s10 + $0xc8] sm:$0xff]  ;;  %v761_v55 = vld [vmem:[%s1558_s10 + $0xd0] sm:$0xff] }
  0x22   : > { %1394 = vmatmul.mubr.msk.f32.gmra.mrb[8].mxu0 %vm317_vm1, %v286_v20  ;;  %v304_v56 = vld [vmem:[%s1550_s7 + $0xd8] sm:$0xff]  ;;  %v305_v58 = vld [vmem:[%s1550_s7 + $0xe0] sm:$0xff]  ;;  %v306_v60 = vld [vmem:[%s1550_s7 + $0xe8] sm:$0xff] }
  0x23   : > { %1444 = vmatmul.mubr.msk.f32.gmra.mrb[8].mxu1 %vm775_vm2, %v744_v21  ;;  %1396 = vmatprep.mubr.msk.f32.mxu0 %vm317_vm1, %v287_v22  ;;  %v762_v57 = vld [vmem:[%s1558_s10 + $0xd8] sm:$0xff]  ;;  %v763_v59 = vld [vmem:[%s1558_s10 + $0xe0] sm:$0xff]  ;;  %v764_v61 = vld [vmem:[%s1558_s10 + $0xe8] sm:$0xff] }
  0x24   : > { %1446 = vmatprep.mubr.msk.f32.mxu1 %vm775_vm2, %v745_v23  ;;  %v307_v62 = vld [vmem:[%s1550_s7 + $0xf0] sm:$0xff]  ;;  %v308_v0 = vld [vmem:[%s1550_s7 + $0xf8] sm:$0xff]  ;;  %v1689_v2 = vld [vmem:[%s1836_s3] ss:$0 sm:$0xff] }
  0x25   : > { %v765_v63 = vld [vmem:[%s1558_s10 + $0xf0] sm:$0xff]  ;;  %v766_v1 = vld [vmem:[%s1558_s10 + $0xf8] sm:$0xff]  ;;  %v1694_v3 = vld [vmem:[%s1838_s5] ss:$0 sm:$0xff] }
  0x26   : > { %1397 = vmatmul.mubr.msk.f32.gmra.mrb[10].mxu0 %vm317_vm1, %v288_v24 }
  0x27   : > { %1447 = vmatmul.mubr.msk.f32.gmra.mrb[10].mxu1 %vm775_vm2, %v746_v25  ;;  %1399 = vmatprep.mubr.msk.f32.mxu0 %vm317_vm1, %v289_v26 }
  0x28   : > { %1449 = vmatprep.mubr.msk.f32.mxu1 %vm775_vm2, %v747_v27 }
  0x2a   : > { %1400 = vmatmul.mubr.msk.f32.gmra.mrb[12].mxu0 %vm317_vm1, %v290_v28 }
  0x2b   : > { %1450 = vmatmul.mubr.msk.f32.gmra.mrb[12].mxu1 %vm775_vm2, %v748_v29  ;;  %1402 = vmatprep.mubr.msk.f32.mxu0 %vm317_vm1, %v291_v30 }
  0x2c   : > { %1452 = vmatprep.mubr.msk.f32.mxu1 %vm775_vm2, %v749_v31 }
  0x2e   : > { %1403 = vmatmul.mubr.msk.f32.gmra.mrb[14].mxu0 %vm317_vm1, %v292_v32 }
  0x2f   : > { %1453 = vmatmul.mubr.msk.f32.gmra.mrb[14].mxu1 %vm775_vm2, %v750_v33  ;;  %1405 = vmatprep.mubr.msk.f32.mxu0 %vm317_vm1, %v293_v34 }
  0x30   : > { %1455 = vmatprep.mubr.msk.f32.mxu1 %vm775_vm2, %v751_v35 }
  0x32   : > { %1406 = vmatmul.mubr.msk.f32.gmra.mrb[16].mxu0 %vm317_vm1, %v294_v36 }
  0x33   : > { %1456 = vmatmul.mubr.msk.f32.gmra.mrb[16].mxu1 %vm775_vm2, %v752_v37  ;;  %1408 = vmatprep.mubr.msk.f32.mxu0 %vm317_vm1, %v295_v38 }
  0x34   : > { %1458 = vmatprep.mubr.msk.f32.mxu1 %vm775_vm2, %v753_v39 }
  0x36   : > { %1409 = vmatmul.mubr.msk.f32.gmra.mrb[18].mxu0 %vm317_vm1, %v296_v40 }
  0x37   : > { %1459 = vmatmul.mubr.msk.f32.gmra.mrb[18].mxu1 %vm775_vm2, %v754_v41  ;;  %1411 = vmatprep.mubr.msk.f32.mxu0 %vm317_vm1, %v297_v42 }
  0x38   : > { %1461 = vmatprep.mubr.msk.f32.mxu1 %vm775_vm2, %v755_v43 }
  0x3a   : > { %1412 = vmatmul.mubr.msk.f32.gmra.mrb[20].mxu0 %vm317_vm1, %v298_v44 }
  0x3b   : > { %1462 = vmatmul.mubr.msk.f32.gmra.mrb[20].mxu1 %vm775_vm2, %v756_v45  ;;  %1414 = vmatprep.mubr.msk.f32.mxu0 %vm317_vm1, %v299_v46 }
  0x3c   : > { %1464 = vmatprep.mubr.msk.f32.mxu1 %vm775_vm2, %v757_v47 }
  0x3e   : > { %1415 = vmatmul.mubr.msk.f32.gmra.mrb[22].mxu0 %vm317_vm1, %v300_v48 }
  0x3f   : > { %1465 = vmatmul.mubr.msk.f32.gmra.mrb[22].mxu1 %vm775_vm2, %v758_v49  ;;  %1417 = vmatprep.mubr.msk.f32.mxu0 %vm317_vm1, %v301_v50 }
  0x40   : > { %1467 = vmatprep.mubr.msk.f32.mxu1 %vm775_vm2, %v759_v51 }
  0x42   : > { %1418 = vmatmul.mubr.msk.f32.gmra.mrb[24].mxu0 %vm317_vm1, %v302_v52 }
  0x43   : > { %1468 = vmatmul.mubr.msk.f32.gmra.mrb[24].mxu1 %vm775_vm2, %v760_v53  ;;  %1420 = vmatprep.mubr.msk.f32.mxu0 %vm317_vm1, %v303_v54 }
  0x44   : > { %1470 = vmatprep.mubr.msk.f32.mxu1 %vm775_vm2, %v761_v55 }
  0x46   : > { %1421 = vmatmul.mubr.msk.f32.gmra.mrb[26].mxu0 %vm317_vm1, %v304_v56 }
  0x47   : > { %1471 = vmatmul.mubr.msk.f32.gmra.mrb[26].mxu1 %vm775_vm2, %v762_v57  ;;  %1423 = vmatprep.mubr.msk.f32.mxu0 %vm317_vm1, %v305_v58 }
  0x48   : > { %1473 = vmatprep.mubr.msk.f32.mxu1 %vm775_vm2, %v763_v59 }
  0x4a   : > { %1424 = vmatmul.mubr.msk.f32.gmra.mrb[28].mxu0 %vm317_vm1, %v306_v60 }
  0x4b   : > { %1474 = vmatmul.mubr.msk.f32.gmra.mrb[28].mxu1 %vm775_vm2, %v764_v61  ;;  %1426 = vmatprep.mubr.msk.f32.mxu0 %vm317_vm1, %v307_v62 }
  0x4c   : > { %1476 = vmatprep.mubr.msk.f32.mxu1 %vm775_vm2, %v765_v63 }
  0x4e   : > { %1427 = vmatmul.mubr.msk.f32.gmra.mrb[30].mxu0 %vm317_vm1, %v308_v0 }
  0x4f   : > { %1477 = vmatmul.mubr.msk.f32.gmra.mrb[30].mxu1 %vm775_vm2, %v766_v1 }
  0xe5   : > { %v1383_v4 = vpop.f32.mrb[0].mxu0 }
  0xe6   : > { %v486_v5 = vadd.f32 %v1383_v4, %v1689_v2  ;;  %v480_v6 = vpop.f32.mrb[1].mxu0  ;;  %v1433_v7 = vpop.f32.mrb[0].mxu1 }
  0xe7   : > { %v481_v8 = vadd.f32 %v1689_v2, %v480_v6  ;;  %v948_v9 = vadd.f32 %v1433_v7, %v1694_v3  ;;  %v942_v10 = vpop.f32.mrb[1].mxu1 }
  0xe8   : > { %vm640_vm3 = vcmp.ge.f32.partialorder %v486_v5, 0.0  ;;  %v672_v11 = vmul.f32 0.2, %v486_v5  ;;  %v943_v12 = vadd.f32 %v1694_v3, %v942_v10 }
  0xe9   : > { %vm639_vm4 = vcmp.ge.f32.partialorder %v481_v8, 0.0  ;;  %v671_v13 = vmul.f32 0.2, %v481_v8  ;;  %v1386_v14 = vpop.f32.mrb[2].mxu0 }
  0xea   : > { %v704_v15 = vsel %vm640_vm3, %v486_v5, %v672_v11  ;;  %v496_v16 = vadd.f32 %v1386_v14, %v1689_v2  ;;  %v490_v17 = vpop.f32.mrb[3].mxu0  ;;  %v1436_v18 = vpop.f32.mrb[2].mxu1 }
  0xeb   : > { %v1102_v19 = vadd.f32 %v948_v9, %v704_v15  ;;  %v703_v20 = vsel %vm639_vm4, %v481_v8, %v671_v13  ;;  %v491_v21 = vadd.f32 %v1689_v2, %v490_v17  ;;  %v958_v22 = vadd.f32 %v1436_v18, %v1694_v3  ;;  %v952_v23 = vpop.f32.mrb[3].mxu1 }
  0xec   : > { %v1101_v24 = vadd.f32 %v943_v12, %v703_v20  ;;  %vm642_vm5 = vcmp.ge.f32.partialorder %v496_v16, 0.0  ;;  %v674_v25 = vmul.f32 0.2, %v496_v16  ;;  %v953_v26 = vadd.f32 %v1694_v3, %v952_v23 }
  0xed   : > { %1134 = vst.msk [vmem:[%s1704_s17 + $0x8] sm:$0xff] %vm317_vm1, %v1102_v19  ;;  %vm641_vm6 = vcmp.ge.f32.partialorder %v491_v21, 0.0  ;;  %v673_v27 = vmul.f32 0.2, %v491_v21  ;;  %v1389_v28 = vpop.f32.mrb[4].mxu0 }
  0xee   : > { %1133 = vst.msk [vmem:[%s1704_s17] sm:$0xff] %vm317_vm1, %v1101_v24  ;;  %v706_v29 = vsel %vm642_vm5, %v496_v16, %v674_v25  ;;  %v506_v30 = vadd.f32 %v1389_v28, %v1689_v2  ;;  %v500_v31 = vpop.f32.mrb[5].mxu0  ;;  %v1439_v32 = vpop.f32.mrb[4].mxu1 }
  0xef   : > { %v1104_v33 = vadd.f32 %v958_v22, %v706_v29  ;;  %v705_v34 = vsel %vm641_vm6, %v491_v21, %v673_v27  ;;  %v501_v35 = vadd.f32 %v1689_v2, %v500_v31  ;;  %v968_v36 = vadd.f32 %v1439_v32, %v1694_v3  ;;  %v962_v37 = vpop.f32.mrb[5].mxu1 }
  0xf0   : > { %v1103_v38 = vadd.f32 %v953_v26, %v705_v34  ;;  %vm644_vm7 = vcmp.ge.f32.partialorder %v506_v30, 0.0  ;;  %v676_v39 = vmul.f32 0.2, %v506_v30  ;;  %v963_v40 = vadd.f32 %v1694_v3, %v962_v37 }
  0xf1   : > { %1136 = vst.msk [vmem:[%s1704_s17 + $0x18] sm:$0xff] %vm317_vm1, %v1104_v33  ;;  %vm643_vm8 = vcmp.ge.f32.partialorder %v501_v35, 0.0  ;;  %v675_v41 = vmul.f32 0.2, %v501_v35  ;;  %v1392_v42 = vpop.f32.mrb[6].mxu0 }
  0xf2   : > { %1135 = vst.msk [vmem:[%s1704_s17 + $0x10] sm:$0xff] %vm317_vm1, %v1103_v38  ;;  %v708_v43 = vsel %vm644_vm7, %v506_v30, %v676_v39  ;;  %v516_v44 = vadd.f32 %v1392_v42, %v1689_v2  ;;  %v510_v45 = vpop.f32.mrb[7].mxu0  ;;  %v1442_v46 = vpop.f32.mrb[6].mxu1 }
  0xf3   : > { %v1106_v47 = vadd.f32 %v968_v36, %v708_v43  ;;  %v707_v48 = vsel %vm643_vm8, %v501_v35, %v675_v41  ;;  %v511_v49 = vadd.f32 %v1689_v2, %v510_v45  ;;  %v978_v50 = vadd.f32 %v1442_v46, %v1694_v3  ;;  %v972_v51 = vpop.f32.mrb[7].mxu1 }
  0xf4   : > { %v1105_v52 = vadd.f32 %v963_v40, %v707_v48  ;;  %vm646_vm9 = vcmp.ge.f32.partialorder %v516_v44, 0.0  ;;  %v678_v53 = vmul.f32 0.2, %v516_v44  ;;  %v973_v54 = vadd.f32 %v1694_v3, %v972_v51 }
  0xf5   : > { %1138 = vst.msk [vmem:[%s1704_s17 + $0x28] sm:$0xff] %vm317_vm1, %v1106_v47  ;;  %vm645_vm10 = vcmp.ge.f32.partialorder %v511_v49, 0.0  ;;  %v677_v55 = vmul.f32 0.2, %v511_v49  ;;  %v1395_v56 = vpop.f32.mrb[8].mxu0 }
  0xf6   : > { %1137 = vst.msk [vmem:[%s1704_s17 + $0x20] sm:$0xff] %vm317_vm1, %v1105_v52  ;;  %v710_v57 = vsel %vm646_vm9, %v516_v44, %v678_v53  ;;  %v526_v58 = vadd.f32 %v1395_v56, %v1689_v2  ;;  %v520_v59 = vpop.f32.mrb[9].mxu0  ;;  %v1445_v60 = vpop.f32.mrb[8].mxu1 }
  0xf7   : > { %v1108_v61 = vadd.f32 %v978_v50, %v710_v57  ;;  %v709_v62 = vsel %vm645_vm10, %v511_v49, %v677_v55  ;;  %v521_v63 = vadd.f32 %v1689_v2, %v520_v59  ;;  %v988_v0 = vadd.f32 %v1445_v60, %v1694_v3  ;;  %v982_v1 = vpop.f32.mrb[9].mxu1 }
  0xf8   : > { %v1107_v4 = vadd.f32 %v973_v54, %v709_v62  ;;  %vm648_vm11 = vcmp.ge.f32.partialorder %v526_v58, 0.0  ;;  %v680_v5 = vmul.f32 0.2, %v526_v58  ;;  %v983_v6 = vadd.f32 %v1694_v3, %v982_v1 }
  0xf9   : > { %1140 = vst.msk [vmem:[%s1704_s17 + $0x38] sm:$0xff] %vm317_vm1, %v1108_v61  ;;  %vm647_vm12 = vcmp.ge.f32.partialorder %v521_v63, 0.0  ;;  %v679_v7 = vmul.f32 0.2, %v521_v63  ;;  %v1398_v8 = vpop.f32.mrb[10].mxu0 }
  0xfa   : > { %1139 = vst.msk [vmem:[%s1704_s17 + $0x30] sm:$0xff] %vm317_vm1, %v1107_v4  ;;  %v712_v9 = vsel %vm648_vm11, %v526_v58, %v680_v5  ;;  %v536_v10 = vadd.f32 %v1398_v8, %v1689_v2  ;;  %v530_v11 = vpop.f32.mrb[11].mxu0  ;;  %v1448_v12 = vpop.f32.mrb[10].mxu1 }
  0xfb   : > { %v1110_v13 = vadd.f32 %v988_v0, %v712_v9  ;;  %v711_v14 = vsel %vm647_vm12, %v521_v63, %v679_v7  ;;  %v531_v15 = vadd.f32 %v1689_v2, %v530_v11  ;;  %v998_v16 = vadd.f32 %v1448_v12, %v1694_v3  ;;  %v992_v17 = vpop.f32.mrb[11].mxu1 }
  0xfc   : > { %v1109_v18 = vadd.f32 %v983_v6, %v711_v14  ;;  %vm650_vm13 = vcmp.ge.f32.partialorder %v536_v10, 0.0  ;;  %v682_v19 = vmul.f32 0.2, %v536_v10  ;;  %v993_v20 = vadd.f32 %v1694_v3, %v992_v17 }
  0xfd   : > { %1142 = vst.msk [vmem:[%s1704_s17 + $0x48] sm:$0xff] %vm317_vm1, %v1110_v13  ;;  %vm649_vm14 = vcmp.ge.f32.partialorder %v531_v15, 0.0  ;;  %v681_v21 = vmul.f32 0.2, %v531_v15  ;;  %v1401_v22 = vpop.f32.mrb[12].mxu0 }
  0xfe   : > { %1141 = vst.msk [vmem:[%s1704_s17 + $0x40] sm:$0xff] %vm317_vm1, %v1109_v18  ;;  %v714_v23 = vsel %vm650_vm13, %v536_v10, %v682_v19  ;;  %v546_v24 = vadd.f32 %v1401_v22, %v1689_v2  ;;  %v540_v25 = vpop.f32.mrb[13].mxu0  ;;  %v1451_v26 = vpop.f32.mrb[12].mxu1 }
  0xff   : > { %v1112_v27 = vadd.f32 %v998_v16, %v714_v23  ;;  %v713_v28 = vsel %vm649_vm14, %v531_v15, %v681_v21  ;;  %v541_v29 = vadd.f32 %v1689_v2, %v540_v25  ;;  %v1008_v30 = vadd.f32 %v1451_v26, %v1694_v3  ;;  %v1002_v31 = vpop.f32.mrb[13].mxu1 }
 0x100   : > { %v1111_v32 = vadd.f32 %v993_v20, %v713_v28  ;;  %vm652_vm15 = vcmp.ge.f32.partialorder %v546_v24, 0.0  ;;  %v684_v33 = vmul.f32 0.2, %v546_v24  ;;  %v1003_v34 = vadd.f32 %v1694_v3, %v1002_v31 }
 0x101   : > { %1144 = vst.msk [vmem:[%s1704_s17 + $0x58] sm:$0xff] %vm317_vm1, %v1112_v27  ;;  %vm651_vm0 = vcmp.ge.f32.partialorder %v541_v29, 0.0  ;;  %v683_v35 = vmul.f32 0.2, %v541_v29  ;;  %v1404_v36 = vpop.f32.mrb[14].mxu0 }
 0x102   : > { %1143 = vst.msk [vmem:[%s1704_s17 + $0x50] sm:$0xff] %vm317_vm1, %v1111_v32  ;;  %v716_v37 = vsel %vm652_vm15, %v546_v24, %v684_v33  ;;  %v556_v38 = vadd.f32 %v1404_v36, %v1689_v2  ;;  %v550_v39 = vpop.f32.mrb[15].mxu0  ;;  %v1454_v40 = vpop.f32.mrb[14].mxu1 }
 0x103   : > { %v1114_v41 = vadd.f32 %v1008_v30, %v716_v37  ;;  %v715_v42 = vsel %vm651_vm0, %v541_v29, %v683_v35  ;;  %v551_v43 = vadd.f32 %v1689_v2, %v550_v39  ;;  %v1018_v44 = vadd.f32 %v1454_v40, %v1694_v3  ;;  %v1012_v45 = vpop.f32.mrb[15].mxu1 }
 0x104   : > { %v1113_v46 = vadd.f32 %v1003_v34, %v715_v42  ;;  %vm654_vm2 = vcmp.ge.f32.partialorder %v556_v38, 0.0  ;;  %v686_v47 = vmul.f32 0.2, %v556_v38  ;;  %v1013_v48 = vadd.f32 %v1694_v3, %v1012_v45 }
 0x105   : > { %1146 = vst.msk [vmem:[%s1704_s17 + $0x68] sm:$0xff] %vm317_vm1, %v1114_v41  ;;  %vm653_vm3 = vcmp.ge.f32.partialorder %v551_v43, 0.0  ;;  %v685_v49 = vmul.f32 0.2, %v551_v43  ;;  %v1407_v50 = vpop.f32.mrb[16].mxu0 }
 0x106   : > { %1145 = vst.msk [vmem:[%s1704_s17 + $0x60] sm:$0xff] %vm317_vm1, %v1113_v46  ;;  %v718_v51 = vsel %vm654_vm2, %v556_v38, %v686_v47  ;;  %v566_v52 = vadd.f32 %v1407_v50, %v1689_v2  ;;  %v560_v53 = vpop.f32.mrb[17].mxu0  ;;  %v1457_v54 = vpop.f32.mrb[16].mxu1 }
 0x107   : > { %v1116_v55 = vadd.f32 %v1018_v44, %v718_v51  ;;  %v717_v56 = vsel %vm653_vm3, %v551_v43, %v685_v49  ;;  %v561_v57 = vadd.f32 %v1689_v2, %v560_v53  ;;  %v1028_v58 = vadd.f32 %v1457_v54, %v1694_v3  ;;  %v1022_v59 = vpop.f32.mrb[17].mxu1 }
 0x108   : > { %v1115_v60 = vadd.f32 %v1013_v48, %v717_v56  ;;  %vm656_vm4 = vcmp.ge.f32.partialorder %v566_v52, 0.0  ;;  %v688_v61 = vmul.f32 0.2, %v566_v52  ;;  %v1023_v62 = vadd.f32 %v1694_v3, %v1022_v59 }
 0x109   : > { %1148 = vst.msk [vmem:[%s1704_s17 + $0x78] sm:$0xff] %vm317_vm1, %v1116_v55  ;;  %vm655_vm5 = vcmp.ge.f32.partialorder %v561_v57, 0.0  ;;  %v687_v63 = vmul.f32 0.2, %v561_v57  ;;  %v1410_v0 = vpop.f32.mrb[18].mxu0 }
 0x10a   : > { %1147 = vst.msk [vmem:[%s1704_s17 + $0x70] sm:$0xff] %vm317_vm1, %v1115_v60  ;;  %v720_v1 = vsel %vm656_vm4, %v566_v52, %v688_v61  ;;  %v576_v4 = vadd.f32 %v1410_v0, %v1689_v2  ;;  %v570_v5 = vpop.f32.mrb[19].mxu0  ;;  %v1460_v6 = vpop.f32.mrb[18].mxu1 }
 0x10b   : > { %v1118_v7 = vadd.f32 %v1028_v58, %v720_v1  ;;  %v719_v8 = vsel %vm655_vm5, %v561_v57, %v687_v63  ;;  %v571_v9 = vadd.f32 %v1689_v2, %v570_v5  ;;  %v1038_v10 = vadd.f32 %v1460_v6, %v1694_v3  ;;  %v1032_v11 = vpop.f32.mrb[19].mxu1 }
 0x10c   : > { %v1117_v12 = vadd.f32 %v1023_v62, %v719_v8  ;;  %vm658_vm6 = vcmp.ge.f32.partialorder %v576_v4, 0.0  ;;  %v690_v13 = vmul.f32 0.2, %v576_v4  ;;  %v1033_v14 = vadd.f32 %v1694_v3, %v1032_v11 }
 0x10d   : > { %1150 = vst.msk [vmem:[%s1704_s17 + $0x88] sm:$0xff] %vm317_vm1, %v1118_v7  ;;  %vm657_vm7 = vcmp.ge.f32.partialorder %v571_v9, 0.0  ;;  %v689_v15 = vmul.f32 0.2, %v571_v9  ;;  %v1413_v16 = vpop.f32.mrb[20].mxu0 }
 0x10e   : > { %1149 = vst.msk [vmem:[%s1704_s17 + $0x80] sm:$0xff] %vm317_vm1, %v1117_v12  ;;  %v722_v17 = vsel %vm658_vm6, %v576_v4, %v690_v13  ;;  %v586_v18 = vadd.f32 %v1413_v16, %v1689_v2  ;;  %v580_v19 = vpop.f32.mrb[21].mxu0  ;;  %v1463_v20 = vpop.f32.mrb[20].mxu1 }
 0x10f   : > { %v1120_v21 = vadd.f32 %v1038_v10, %v722_v17  ;;  %v721_v22 = vsel %vm657_vm7, %v571_v9, %v689_v15  ;;  %v581_v23 = vadd.f32 %v1689_v2, %v580_v19  ;;  %v1048_v24 = vadd.f32 %v1463_v20, %v1694_v3  ;;  %v1042_v25 = vpop.f32.mrb[21].mxu1 }
 0x110   : > { %v1119_v26 = vadd.f32 %v1033_v14, %v721_v22  ;;  %vm660_vm8 = vcmp.ge.f32.partialorder %v586_v18, 0.0  ;;  %v692_v27 = vmul.f32 0.2, %v586_v18  ;;  %v1043_v28 = vadd.f32 %v1694_v3, %v1042_v25 }
 0x111   : > { %1152 = vst.msk [vmem:[%s1704_s17 + $0x98] sm:$0xff] %vm317_vm1, %v1120_v21  ;;  %vm659_vm9 = vcmp.ge.f32.partialorder %v581_v23, 0.0  ;;  %v691_v29 = vmul.f32 0.2, %v581_v23  ;;  %v1416_v30 = vpop.f32.mrb[22].mxu0 }
 0x112   : > { %1151 = vst.msk [vmem:[%s1704_s17 + $0x90] sm:$0xff] %vm317_vm1, %v1119_v26  ;;  %v724_v31 = vsel %vm660_vm8, %v586_v18, %v692_v27  ;;  %v596_v32 = vadd.f32 %v1416_v30, %v1689_v2  ;;  %v590_v33 = vpop.f32.mrb[23].mxu0  ;;  %v1466_v34 = vpop.f32.mrb[22].mxu1 }
 0x113   : > { %v1122_v35 = vadd.f32 %v1048_v24, %v724_v31  ;;  %v723_v36 = vsel %vm659_vm9, %v581_v23, %v691_v29  ;;  %v591_v37 = vadd.f32 %v1689_v2, %v590_v33  ;;  %v1058_v38 = vadd.f32 %v1466_v34, %v1694_v3  ;;  %v1052_v39 = vpop.f32.mrb[23].mxu1 }
 0x114   : > { %v1121_v40 = vadd.f32 %v1043_v28, %v723_v36  ;;  %vm662_vm10 = vcmp.ge.f32.partialorder %v596_v32, 0.0  ;;  %v694_v41 = vmul.f32 0.2, %v596_v32  ;;  %v1053_v42 = vadd.f32 %v1694_v3, %v1052_v39 }
 0x115   : > { %1154 = vst.msk [vmem:[%s1704_s17 + $0xa8] sm:$0xff] %vm317_vm1, %v1122_v35  ;;  %vm661_vm11 = vcmp.ge.f32.partialorder %v591_v37, 0.0  ;;  %v693_v43 = vmul.f32 0.2, %v591_v37  ;;  %v1419_v44 = vpop.f32.mrb[24].mxu0 }
 0x116   : > { %1153 = vst.msk [vmem:[%s1704_s17 + $0xa0] sm:$0xff] %vm317_vm1, %v1121_v40  ;;  %v726_v45 = vsel %vm662_vm10, %v596_v32, %v694_v41  ;;  %v606_v46 = vadd.f32 %v1419_v44, %v1689_v2  ;;  %v600_v47 = vpop.f32.mrb[25].mxu0  ;;  %v1469_v48 = vpop.f32.mrb[24].mxu1 }
 0x117   : > { %v1124_v49 = vadd.f32 %v1058_v38, %v726_v45  ;;  %v725_v50 = vsel %vm661_vm11, %v591_v37, %v693_v43  ;;  %v601_v51 = vadd.f32 %v1689_v2, %v600_v47  ;;  %v1068_v52 = vadd.f32 %v1469_v48, %v1694_v3  ;;  %v1062_v53 = vpop.f32.mrb[25].mxu1 }
 0x118   : > { %v1123_v54 = vadd.f32 %v1053_v42, %v725_v50  ;;  %vm664_vm12 = vcmp.ge.f32.partialorder %v606_v46, 0.0  ;;  %v696_v55 = vmul.f32 0.2, %v606_v46  ;;  %v1063_v56 = vadd.f32 %v1694_v3, %v1062_v53 }
 0x119   : > { %1156 = vst.msk [vmem:[%s1704_s17 + $0xb8] sm:$0xff] %vm317_vm1, %v1124_v49  ;;  %vm663_vm13 = vcmp.ge.f32.partialorder %v601_v51, 0.0  ;;  %v695_v57 = vmul.f32 0.2, %v601_v51  ;;  %v1422_v58 = vpop.f32.mrb[26].mxu0 }
 0x11a   : > { %1155 = vst.msk [vmem:[%s1704_s17 + $0xb0] sm:$0xff] %vm317_vm1, %v1123_v54  ;;  %v728_v59 = vsel %vm664_vm12, %v606_v46, %v696_v55  ;;  %v616_v60 = vadd.f32 %v1422_v58, %v1689_v2  ;;  %v610_v61 = vpop.f32.mrb[27].mxu0  ;;  %v1472_v62 = vpop.f32.mrb[26].mxu1 }
 0x11b   : > { %v1126_v63 = vadd.f32 %v1068_v52, %v728_v59  ;;  %v727_v0 = vsel %vm663_vm13, %v601_v51, %v695_v57  ;;  %v611_v1 = vadd.f32 %v1689_v2, %v610_v61  ;;  %v1078_v4 = vadd.f32 %v1472_v62, %v1694_v3  ;;  %v1072_v5 = vpop.f32.mrb[27].mxu1 }
 0x11c   : > { %v1125_v6 = vadd.f32 %v1063_v56, %v727_v0  ;;  %vm666_vm14 = vcmp.ge.f32.partialorder %v616_v60, 0.0  ;;  %v698_v7 = vmul.f32 0.2, %v616_v60  ;;  %v1073_v8 = vadd.f32 %v1694_v3, %v1072_v5 }
 0x11d   : > { %1158 = vst.msk [vmem:[%s1704_s17 + $0xc8] sm:$0xff] %vm317_vm1, %v1126_v63  ;;  %vm665_vm15 = vcmp.ge.f32.partialorder %v611_v1, 0.0  ;;  %v697_v9 = vmul.f32 0.2, %v611_v1  ;;  %v1425_v10 = vpop.f32.mrb[28].mxu0 }
 0x11e   : > { %1157 = vst.msk [vmem:[%s1704_s17 + $0xc0] sm:$0xff] %vm317_vm1, %v1125_v6  ;;  %v730_v11 = vsel %vm666_vm14, %v616_v60, %v698_v7  ;;  %v626_v12 = vadd.f32 %v1425_v10, %v1689_v2  ;;  %v620_v13 = vpop.f32.mrb[29].mxu0  ;;  %v1475_v14 = vpop.f32.mrb[28].mxu1 }
 0x11f   : > { %v1128_v15 = vadd.f32 %v1078_v4, %v730_v11  ;;  %v729_v16 = vsel %vm665_vm15, %v611_v1, %v697_v9  ;;  %v621_v17 = vadd.f32 %v1689_v2, %v620_v13  ;;  %v1088_v18 = vadd.f32 %v1475_v14, %v1694_v3  ;;  %v1082_v19 = vpop.f32.mrb[29].mxu1 }
 0x120   : > { %v1127_v20 = vadd.f32 %v1073_v8, %v729_v16  ;;  %vm668_vm0 = vcmp.ge.f32.partialorder %v626_v12, 0.0  ;;  %v700_v21 = vmul.f32 0.2, %v626_v12  ;;  %v1083_v22 = vadd.f32 %v1694_v3, %v1082_v19 }
 0x121   : > { %1160 = vst.msk [vmem:[%s1704_s17 + $0xd8] sm:$0xff] %vm317_vm1, %v1128_v15  ;;  %vm667_vm2 = vcmp.ge.f32.partialorder %v621_v17, 0.0  ;;  %v699_v23 = vmul.f32 0.2, %v621_v17  ;;  %v1428_v24 = vpop.f32.mrb[30].mxu0 }
 0x122   : > { %1159 = vst.msk [vmem:[%s1704_s17 + $0xd0] sm:$0xff] %vm317_vm1, %v1127_v20  ;;  %v732_v25 = vsel %vm668_vm0, %v626_v12, %v700_v21  ;;  %v636_v26 = vadd.f32 %v1428_v24, %v1689_v2  ;;  %v630_v27 = vpop.f32.mrb[31].mxu0  ;;  %v1478_v28 = vpop.f32.mrb[30].mxu1 }
 0x123   : > { %v1130_v29 = vadd.f32 %v1088_v18, %v732_v25  ;;  %v731_v30 = vsel %vm667_vm2, %v621_v17, %v699_v23  ;;  %v631_v31 = vadd.f32 %v1689_v2, %v630_v27  ;;  %v1098_v32 = vadd.f32 %v1478_v28, %v1694_v3  ;;  %v1092_v33 = vpop.f32.mrb[31].mxu1 }
 0x124   : > { %v1129_v34 = vadd.f32 %v1083_v22, %v731_v30  ;;  %vm670_vm3 = vcmp.ge.f32.partialorder %v636_v26, 0.0  ;;  %v702_v35 = vmul.f32 0.2, %v636_v26  ;;  %v1093_v36 = vadd.f32 %v1694_v3, %v1092_v33 }
 0x125   : > { %1162 = vst.msk [vmem:[%s1704_s17 + $0xe8] sm:$0xff] %vm317_vm1, %v1130_v29  ;;  %vm669_vm4 = vcmp.ge.f32.partialorder %v631_v31, 0.0  ;;  %v701_v37 = vmul.f32 0.2, %v631_v31 }
 0x126   : > { %1161 = vst.msk [vmem:[%s1704_s17 + $0xe0] sm:$0xff] %vm317_vm1, %v1129_v34  ;;  %v734_v38 = vsel %vm670_vm3, %v636_v26, %v702_v35 }
 0x127   : > { %v1132_v39 = vadd.f32 %v1098_v32, %v734_v38  ;;  %v733_v40 = vsel %vm669_vm4, %v631_v31, %v701_v37 }
 0x128   : > { %v1131_v41 = vadd.f32 %v1093_v36, %v733_v40 }
 0x129   : > { %1164 = vst.msk [vmem:[%s1704_s17 + $0xf8] sm:$0xff] %vm317_vm1, %v1132_v39 }
 0x12a   : > { %1163 = vst.msk [vmem:[%s1704_s17 + $0xf0] sm:$0xff] %vm317_vm1, %v1131_v41 }
 0x12b PF: > { %s16_s21 = sadd.s32 1, %s1493_s21  }
 0x12c   : > { %p13_p4 = scmp.ge.s32.totalorder %s16_s21, 4  }
 0x12e   :  { %15 = sbr.rel (!%p13_p4) target bundleno = 1 (0x1), region = 77 }

</bundles_post_ra>
